<compile_context>
chip_gen: v7x
topology: tpu7x:2x2x1
jax: 0.10.0
libtpu: 0.0.40
codegen_flags: <defaults>
</compile_context>

<pallas_src>
import jax
import jax.numpy as jnp
from jax.experimental import pallas as pl
from jax.experimental.pallas import tpu as pltpu


def mixture_kernel(ids_ref, mask_ref, denom_ref, table_ref, wp_ref, bp_ref,
                   wc_ref, bc_ref, pooled_ref, logits_ref, acc_ref):
    """Grid = (B//TB, S//TS).  S axis is the reduction ('arbitrary')."""
    s = pl.program_id(1)

    @pl.when(s == 0)
    def _init():
        acc_ref[...] = jnp.zeros_like(acc_ref)

    ids = ids_ref[...]                                    # [TB, TS] int32
    mask = mask_ref[...]                                  # [TB, TS] bf16 (0/1)
    tb, ts = ids.shape
    V = table_ref.shape[0]

    # Fused embedding "gather" for a VMEM-resident table, done on the MXU:
    #   counts[b, v] = sum_s mask[b, s] * (ids[b, s] == v)        (batched MXU)
    #   acc[b, h]   += counts[b, :] @ table[:, h]                 (MXU)
    # which equals sum_s mask[b, s] * table[ids[b, s], h] exactly, without ever
    # materializing a [B, S, H] embedding tensor in HBM or VMEM.
    vocab_iota = jax.lax.broadcasted_iota(jnp.int32, (tb, ts, V), 2)
    onehot = (ids[:, :, None] == vocab_iota).astype(jnp.bfloat16)   # [TB, TS, V]
    counts = jnp.einsum(
        "bqs,bsv->bqv", mask[:, None, :], onehot,
        preferred_element_type=jnp.float32)[:, 0, :]                # [TB, V] f32
    acc_ref[...] += jnp.dot(counts, table_ref[...].astype(jnp.float32),
                            preferred_element_type=jnp.float32)     # [TB, H]

    @pl.when(s == pl.num_programs(1) - 1)
    def _finalize():
        # Masked mean (valid-token count precomputed in the wrapper).
        h = acc_ref[...] / denom_ref[...]                            # [TB, H] f32
        # BERT-style pooler: tanh(h @ Wp + bp)  (bf16 MXU, f32 accumulate).
        pooled = jnp.tanh(
            jnp.dot(h.astype(jnp.bfloat16), wp_ref[...],
                    preferred_element_type=jnp.float32) + bp_ref[...])
        pooled_ref[...] = pooled.astype(pooled_ref.dtype)            # bf16 out
        # Single shared classifier head; label dim zero-padded to 128 lanes so
        # the store is unmasked (wrapper slices back to L and replicates to K).
        logits_ref[...] = (
            jnp.dot(pooled.astype(jnp.bfloat16), wc_ref[...],
                    preferred_element_type=jnp.float32) + bc_ref[...])


def mixture_forward(input_ids, mask, denom, emb_table, wp, bp, wc_pad, bc_pad,
                    *, tb=16, ts=256):
    """input_ids: [B,S] i32, mask: [B,S] bf16, denom: [B,1] f32 (clamped >=1)."""
    B, S = input_ids.shape
    V, H = emb_table.shape
    Lp = wc_pad.shape[1]
    tb = min(tb, B)
    ts = min(ts, S)
    # v7x has 2 TensorCores: only engaged if the "parallel" batch axis has >= 2
    # blocks.  Split the batch when a single block would cover it.
    if B // tb < 2 and B >= 16 and (B // 2) % 8 == 0:
        tb = B // 2
    assert B % tb == 0 and S % ts == 0, "demo requires divisible tiles"
    grid = (B // tb, S // ts)

    pooled, logits_pad = pl.pallas_call(
        mixture_kernel,
        out_shape=(
            jax.ShapeDtypeStruct((B, H), jnp.bfloat16),   # pooler_output
            jax.ShapeDtypeStruct((B, Lp), jnp.float32),   # padded logits
        ),
        grid_spec=pltpu.PrefetchScalarGridSpec(
            num_scalar_prefetch=0,
            grid=grid,
            in_specs=[
                pl.BlockSpec((tb, ts), lambda b, s: (b, s)),   # input_ids
                pl.BlockSpec((tb, ts), lambda b, s: (b, s)),   # attention mask
                pl.BlockSpec((tb, 1), lambda b, s: (b, 0)),    # valid-token count
                # Constant-index blocks below are fetched once (index never
                # changes across the grid):
                pl.BlockSpec((V, H), lambda b, s: (0, 0)),     # emb table (bf16)
                pl.BlockSpec((H, H), lambda b, s: (0, 0)),     # wp (bf16)
                pl.BlockSpec((1, H), lambda b, s: (0, 0)),     # bp (f32)
                pl.BlockSpec((H, Lp), lambda b, s: (0, 0)),    # wc padded (bf16)
                pl.BlockSpec((1, Lp), lambda b, s: (0, 0)),    # bc padded (f32)
            ],
            out_specs=(
                pl.BlockSpec((tb, H), lambda b, s: (b, 0)),
                pl.BlockSpec((tb, Lp), lambda b, s: (b, 0)),
            ),
            scratch_shapes=[
                pltpu.VMEM((tb, H), jnp.float32),   # masked-sum accumulator
            ],
        ),
        compiler_params=pltpu.CompilerParams(
            dimension_semantics=("parallel", "arbitrary"),
            # Actual footprint here is well under 2 MiB (ids/mask tiles + tiny
            # weights); re-derive this when vocab/tiles grow (v7x physical VMEM
            # is 64 MiB, v5e/v6e 128 MiB).
            vmem_limit_bytes=32 * 1024 * 1024,
        ),
    )(input_ids, mask, denom, emb_table, wp, bp, wc_pad, bc_pad)
    return pooled, logits_pad


def model_forward(input_ids, attention_mask, params):
    """Full module forward (kernel + alpha softmax + K-way replication)."""
    K = params["K"]
    L = params["num_labels"]
    mask_bf16 = attention_mask.astype(jnp.bfloat16)                  # 0/1 exact
    denom = jnp.maximum(
        attention_mask.astype(jnp.float32).sum(-1, keepdims=True), 1.0)  # [B,1]
    pooled, logits_pad = mixture_forward(
        input_ids.astype(jnp.int32), mask_bf16, denom,
        params["emb_table"], params["wp"], params["bp"],
        params["wc_pad"], params["bc_pad"])
    logits_one = logits_pad[:, :L]                                   # [B, L]
    # [nn.Linear]*K shares one Linear -> K identical heads.
    logits = jnp.broadcast_to(logits_one[None], (K,) + logits_one.shape)
    alpha_soft = jax.nn.softmax(params["alpha"])                     # hoisted
    return logits, alpha_soft, pooled


def _reference(input_ids, mask_f, table_bf16, wp_bf16, bp, wc_bf16, bc):
    """Pure-JAX reference of the surrogate forward (for validation)."""
    emb = table_bf16[input_ids].astype(jnp.float32)                  # [B,S,H]
    h_sum = jnp.einsum("bsh,bs->bh", emb, mask_f)
    denom = jnp.maximum(jnp.sum(mask_f, axis=-1, keepdims=True), 1.0)
    h = h_sum / denom
    pooled = jnp.tanh(jnp.dot(h, wp_bf16.astype(jnp.float32)) + bp)
    logits = jnp.dot(pooled, wc_bf16.astype(jnp.float32)) + bc
    return pooled, logits


if __name__ == "__main__":
    # Small but 128/8-aligned shapes; batch sized so the parallel grid axis has
    # >= 2 blocks (v7x dual TensorCore).
    B, S, H, L, K, V = 32, 512, 128, 4, 2, 64

    key = jax.random.PRNGKey(0)
    k_emb, k_wp, k_wc, k_bc, k_ids = jax.random.split(key, 5)

    # Deterministic "pretrained" surrogate + head parameters (bf16 weights,
    # f32 biases; f32 accumulation happens inside the kernel).
    emb_table = (jax.random.normal(k_emb, (V, H), jnp.float32) * 0.1
                 ).astype(jnp.bfloat16)
    wp = (jax.random.normal(k_wp, (H, H), jnp.float32) * 0.1).astype(jnp.bfloat16)
    bp = jnp.zeros((1, H), jnp.float32)

    # One Linear(hidden_size, num_labels), shared by all K heads ([module] * K).
    w_single = (jax.random.normal(k_wc, (H, L), jnp.float32) * 0.1
                ).astype(jnp.bfloat16)
    b_single = jax.random.normal(k_bc, (1, L), jnp.float32) * 0.1
    Lp = pl.cdiv(L, 128) * 128                         # lane-dense padded labels
    wc_pad = jnp.zeros((H, Lp), jnp.bfloat16).at[:, :L].set(w_single)
    bc_pad = jnp.zeros((1, Lp), jnp.float32).at[:, :L].set(b_single)

    # nn.Parameter(torch.zeros(K)) -> softmax gives uniform mixture weights.
    alpha = jnp.zeros((K,), jnp.float32)

    params = dict(emb_table=emb_table, wp=wp, bp=bp, wc_pad=wc_pad, bc_pad=bc_pad,
                  alpha=alpha, K=K, num_labels=L)

    # Example inputs (a couple of rows partially masked).
    input_ids = jax.random.randint(k_ids, (B, S), 0, V)
    attention_mask = (jnp.ones((B, S), jnp.int32)
                      .at[1, 400:].set(0)
                      .at[3, 10:].set(0))

    logits, alpha_soft, pooled = model_forward(input_ids, attention_mask, params)
    jax.block_until_ready((logits, alpha_soft, pooled))

    assert logits.shape == (K, B, L)
    assert alpha_soft.shape == (K,)
    assert pooled.shape == (B, H)

    # Validate against a pure-JAX reference of the same surrogate math.
    mask_f = attention_mask.astype(jnp.float32)
    ref_pooled, ref_logits = _reference(input_ids, mask_f, emb_table, wp, bp,
                                        w_single, b_single)
    assert bool(jnp.allclose(pooled.astype(jnp.float32), ref_pooled,
                             atol=1e-2, rtol=1e-2))
    assert bool(jnp.allclose(logits[0], ref_logits, atol=1e-2, rtol=1e-2))
    assert bool(jnp.allclose(logits[0], logits[1]))          # shared head
    assert bool(jnp.allclose(alpha_soft, jnp.full((K,), 1.0 / K), atol=1e-6))

    print("KERNEL_OK")
</pallas_src>

<mosaic_0001>
module attributes {stable_mosaic.version = 11 : i64} {
  func.func @mixture_kernel(%arg0: i32, %arg1: i32, %arg2: memref<16x256xi32, #tpu.memory_space<vmem>>, %arg3: memref<16x256xbf16, #tpu.memory_space<vmem>>, %arg4: memref<16x1xf32, #tpu.memory_space<vmem>>, %arg5: memref<64x128xbf16, #tpu.memory_space<vmem>>, %arg6: memref<128x128xbf16, #tpu.memory_space<vmem>>, %arg7: memref<1x128xf32, #tpu.memory_space<vmem>>, %arg8: memref<128x128xbf16, #tpu.memory_space<vmem>>, %arg9: memref<1x128xf32, #tpu.memory_space<vmem>>, %arg10: memref<16x128xbf16, #tpu.memory_space<vmem>>, %arg11: memref<16x128xf32, #tpu.memory_space<vmem>>, %arg12: memref<16x128xf32, #tpu.memory_space<vmem>>) attributes {dimension_semantics = [#tpu.dimension_semantics<parallel>, #tpu.dimension_semantics<arbitrary>], iteration_bounds = array<i64: 2, 2>, scalar_prefetch = 0 : i64, scratch_operands = 1 : i64, tpu.core_type = #tpu.core_type<tc>, window_params = [{transform_indices = @transform_0, window_bounds = array<i64: 16, 256>}, {transform_indices = @transform_1, window_bounds = array<i64: 16, 256>}, {transform_indices = @transform_2, window_bounds = array<i64: 16, 1>}, {pipeline_mode = #tpu.pipeline_mode<synchronous>, transform_indices = @transform_3, window_bounds = array<i64: 64, 128>}, {pipeline_mode = #tpu.pipeline_mode<synchronous>, transform_indices = @transform_4, window_bounds = array<i64: 128, 128>}, {pipeline_mode = #tpu.pipeline_mode<synchronous>, transform_indices = @transform_5, window_bounds = array<i64: 1, 128>}, {pipeline_mode = #tpu.pipeline_mode<synchronous>, transform_indices = @transform_6, window_bounds = array<i64: 128, 128>}, {pipeline_mode = #tpu.pipeline_mode<synchronous>, transform_indices = @transform_7, window_bounds = array<i64: 1, 128>}, {transform_indices = @transform_8, window_bounds = array<i64: 16, 128>}, {transform_indices = @transform_9, window_bounds = array<i64: 16, 128>}]} {
    %c0_i32 = arith.constant 0 : i32
    %0 = arith.cmpi eq, %arg1, %c0_i32 : i32
    %1 = arith.extui %0 : i1 to i32
    %c0_i32_0 = arith.constant 0 : i32
    %2 = arith.cmpi ne, %1, %c0_i32_0 : i32
    scf.if %2 {
      %cst_12 = arith.constant 0.000000e+00 : f32
      %24 = vector.broadcast %cst_12 : f32 to vector<16x128xf32>
      %c0_13 = arith.constant 0 : index
      %c0_14 = arith.constant 0 : index
      %25 = vector.load %arg12[%c0_13, %c0_14] : memref<16x128xf32, #tpu.memory_space<vmem>>, vector<16x128xf32>
      tpu.vector_store %arg12[%c0_13, %c0_14], %24 {strides = array<i32>} : memref<16x128xf32, #tpu.memory_space<vmem>>, vector<16x128xf32>,
    } else {
    }
    %c0 = arith.constant 0 : index
    %c0_1 = arith.constant 0 : index
    %3 = vector.load %arg2[%c0, %c0_1] : memref<16x256xi32, #tpu.memory_space<vmem>>, vector<16x256xi32>
    %c0_2 = arith.constant 0 : index
    %c0_3 = arith.constant 0 : index
    %4 = vector.load %arg3[%c0_2, %c0_3] : memref<16x256xbf16, #tpu.memory_space<vmem>>, vector<16x256xbf16>
    %5 = tpu.iota {dimensions = array<i32: 2>} : vector<16x256x64xi32>
    %6 = vector.shape_cast %3 : vector<16x256xi32> to vector<16x256x1xi32>
    %7 = vector.broadcast %6 : vector<16x256x1xi32> to vector<16x256x64xi32>
    %8 = arith.cmpi eq, %7, %5 : vector<16x256x64xi32>
    %9 = arith.extui %8 : vector<16x256x64xi1> to vector<16x256x64xi32>
    %10 = arith.sitofp %9 : vector<16x256x64xi32> to vector<16x256x64xf32>
    %11 = arith.truncf %10 : vector<16x256x64xf32> to vector<16x256x64xbf16>
    %12 = vector.shape_cast %4 : vector<16x256xbf16> to vector<16x1x256xbf16>
    "tpu.trace_start"() <{level = 10 : i32, message = "bqs,bsv->bqv"}> : () -> ()
    %cst = arith.constant dense<0.000000e+00> : vector<16x1x64xf32>
    %13 = tpu.matmul %12, %11, %cst {dimension_numbers = #tpu.dot_dimension_numbers<[2], [1], [1], [2], [0, 0, 0, 1, 1, 2], [0], [0]>} : vector<16x1x256xbf16>, vector<16x256x64xbf16>, vector<16x1x64xf32> -> vector<16x1x64xf32>
    "tpu.trace_stop"() : () -> ()
    %14 = vector.shape_cast %13 : vector<16x1x64xf32> to vector<16x64xf32>
    %c0_4 = arith.constant 0 : index
    %c0_5 = arith.constant 0 : index
    %15 = vector.load %arg12[%c0_4, %c0_5] : memref<16x128xf32, #tpu.memory_space<vmem>>, vector<16x128xf32>
    %c0_6 = arith.constant 0 : index
    %c0_7 = arith.constant 0 : index
    %16 = vector.load %arg5[%c0_6, %c0_7] : memref<64x128xbf16, #tpu.memory_space<vmem>>, vector<64x128xbf16>
    %17 = arith.extf %16 : vector<64x128xbf16> to vector<64x128xf32>
    %cst_8 = arith.constant dense<0.000000e+00> : vector<16x128xf32>
    %18 = tpu.matmul %14, %17, %cst_8 {dimension_numbers = #tpu.dot_dimension_numbers<[1], [0], [0], [1], [0, 0, 1, 1], [], []>} : vector<16x64xf32>, vector<64x128xf32>, vector<16x128xf32> -> vector<16x128xf32>
    %19 = arith.addf %15, %18 : vector<16x128xf32>
    %c0_9 = arith.constant 0 : index
    %c0_10 = arith.constant 0 : index
    %20 = vector.load %arg12[%c0_9, %c0_10] : memref<16x128xf32, #tpu.memory_space<vmem>>, vector<16x128xf32>
    tpu.vector_store %arg12[%c0_9, %c0_10], %19 {strides = array<i32>} : memref<16x128xf32, #tpu.memory_space<vmem>>, vector<16x128xf32>,
    %c1_i32 = arith.constant 1 : i32
    %21 = arith.cmpi eq, %arg1, %c1_i32 : i32
    %22 = arith.extui %21 : i1 to i32
    %c0_i32_11 = arith.constant 0 : i32
    %23 = arith.cmpi ne, %22, %c0_i32_11 : i32
    scf.if %23 {
      %c0_12 = arith.constant 0 : index
      %c0_13 = arith.constant 0 : index
      %24 = vector.load %arg12[%c0_12, %c0_13] : memref<16x128xf32, #tpu.memory_space<vmem>>, vector<16x128xf32>
      %c0_14 = arith.constant 0 : index
      %c0_15 = arith.constant 0 : index
      %25 = vector.load %arg4[%c0_14, %c0_15] : memref<16x1xf32, #tpu.memory_space<vmem>>, vector<16x1xf32>
      %26 = vector.broadcast %25 : vector<16x1xf32> to vector<16x128xf32>
      %27 = arith.divf %24, %26 : vector<16x128xf32>
      %28 = arith.truncf %27 : vector<16x128xf32> to vector<16x128xbf16>
      %c0_16 = arith.constant 0 : index
      %c0_17 = arith.constant 0 : index
      %29 = vector.load %arg6[%c0_16, %c0_17] : memref<128x128xbf16, #tpu.memory_space<vmem>>, vector<128x128xbf16>
      %cst_18 = arith.constant dense<0.000000e+00> : vector<16x128xf32>
      %30 = tpu.matmul %28, %29, %cst_18 {dimension_numbers = #tpu.dot_dimension_numbers<[1], [0], [0], [1], [0, 0, 1, 1], [], []>} : vector<16x128xbf16>, vector<128x128xbf16>, vector<16x128xf32> -> vector<16x128xf32>
      %c0_19 = arith.constant 0 : index
      %c0_20 = arith.constant 0 : index
      %31 = vector.load %arg7[%c0_19, %c0_20] : memref<1x128xf32, #tpu.memory_space<vmem>>, vector<1x128xf32>
      %32 = vector.broadcast %31 : vector<1x128xf32> to vector<16x128xf32>
      %33 = arith.addf %30, %32 : vector<16x128xf32>
      %34 = math.tanh %33 : vector<16x128xf32>
      %35 = arith.truncf %34 : vector<16x128xf32> to vector<16x128xbf16>
      %c0_21 = arith.constant 0 : index
      %c0_22 = arith.constant 0 : index
      %36 = vector.load %arg10[%c0_21, %c0_22] : memref<16x128xbf16, #tpu.memory_space<vmem>>, vector<16x128xbf16>
      tpu.vector_store %arg10[%c0_21, %c0_22], %35 {strides = array<i32>} : memref<16x128xbf16, #tpu.memory_space<vmem>>, vector<16x128xbf16>,
      %37 = arith.truncf %34 : vector<16x128xf32> to vector<16x128xbf16>
      %c0_23 = arith.constant 0 : index
      %c0_24 = arith.constant 0 : index
      %38 = vector.load %arg8[%c0_23, %c0_24] : memref<128x128xbf16, #tpu.memory_space<vmem>>, vector<128x128xbf16>
      %cst_25 = arith.constant dense<0.000000e+00> : vector<16x128xf32>
      %39 = tpu.matmul %37, %38, %cst_25 {dimension_numbers = #tpu.dot_dimension_numbers<[1], [0], [0], [1], [0, 0, 1, 1], [], []>} : vector<16x128xbf16>, vector<128x128xbf16>, vector<16x128xf32> -> vector<16x128xf32>
      %c0_26 = arith.constant 0 : index
      %c0_27 = arith.constant 0 : index
      %40 = vector.load %arg9[%c0_26, %c0_27] : memref<1x128xf32, #tpu.memory_space<vmem>>, vector<1x128xf32>
      %41 = vector.broadcast %40 : vector<1x128xf32> to vector<16x128xf32>
      %42 = arith.addf %39, %41 : vector<16x128xf32>
      %c0_28 = arith.constant 0 : index
      %c0_29 = arith.constant 0 : index
      %43 = vector.load %arg11[%c0_28, %c0_29] : memref<16x128xf32, #tpu.memory_space<vmem>>, vector<16x128xf32>
      tpu.vector_store %arg11[%c0_28, %c0_29], %42 {strides = array<i32>} : memref<16x128xf32, #tpu.memory_space<vmem>>, vector<16x128xf32>,
    } else {
    }
    return
  }
  func.func @transform_0(%arg0: i32, %arg1: i32) -> (i32, i32) {
    %c0_i32 = arith.constant 0 : i32
    return %arg0, %arg1 : i32, i32
  }
  func.func @transform_1(%arg0: i32, %arg1: i32) -> (i32, i32) {
    %c0_i32 = arith.constant 0 : i32
    return %arg0, %arg1 : i32, i32
  }
  func.func @transform_2(%arg0: i32, %arg1: i32) -> (i32, i32) {
    %c0_i32 = arith.constant 0 : i32
    %c0_i32_0 = arith.constant 0 : i32
    return %arg0, %c0_i32 : i32, i32
  }
  func.func @transform_3(%arg0: i32, %arg1: i32) -> (i32, i32) {
    %c0_i32 = arith.constant 0 : i32
    %c0_i32_0 = arith.constant 0 : i32
    %c0_i32_1 = arith.constant 0 : i32
    return %c0_i32, %c0_i32_0 : i32, i32
  }
  func.func @transform_4(%arg0: i32, %arg1: i32) -> (i32, i32) {
    %c0_i32 = arith.constant 0 : i32
    %c0_i32_0 = arith.constant 0 : i32
    %c0_i32_1 = arith.constant 0 : i32
    return %c0_i32, %c0_i32_0 : i32, i32
  }
  func.func @transform_5(%arg0: i32, %arg1: i32) -> (i32, i32) {
    %c0_i32 = arith.constant 0 : i32
    %c0_i32_0 = arith.constant 0 : i32
    %c0_i32_1 = arith.constant 0 : i32
    return %c0_i32, %c0_i32_0 : i32, i32
  }
  func.func @transform_6(%arg0: i32, %arg1: i32) -> (i32, i32) {
    %c0_i32 = arith.constant 0 : i32
    %c0_i32_0 = arith.constant 0 : i32
    %c0_i32_1 = arith.constant 0 : i32
    return %c0_i32, %c0_i32_0 : i32, i32
  }
  func.func @transform_7(%arg0: i32, %arg1: i32) -> (i32, i32) {
    %c0_i32 = arith.constant 0 : i32
    %c0_i32_0 = arith.constant 0 : i32
    %c0_i32_1 = arith.constant 0 : i32
    return %c0_i32, %c0_i32_0 : i32, i32
  }
  func.func @transform_8(%arg0: i32, %arg1: i32) -> (i32, i32) {
    %c0_i32 = arith.constant 0 : i32
    %c0_i32_0 = arith.constant 0 : i32
    return %arg0, %c0_i32 : i32, i32
  }
  func.func @transform_9(%arg0: i32, %arg1: i32) -> (i32, i32) {
    %c0_i32 = arith.constant 0 : i32
    %c0_i32_0 = arith.constant 0 : i32
    return %arg0, %c0_i32 : i32, i32
  }
}

</mosaic_0001>

<bundles_post_ra>
// kernel: tpu_custom_call.1
= control target key start
LH: loop header
LB: loop body
LE: loop exit
PB: predicated region body
PF: predicated region fallthrough
CT: control target
= control target key end

     0   :  { %s10197_s0 = inlined_call_operand.hbm [shape: s32[32,512], index: 0, kind: input, shape index: {}]   ;;  %s10198_s1 = inlined_call_operand.hbm [shape: bf16[32,512], index: 1, kind: input, shape index: {}]   ;;  %s10199_s2 = inlined_call_operand.vmem [shape: f32[32,1], index: 2, kind: input, shape index: {}]   ;;  %s10200_s3 = inlined_call_operand.vmem [shape: bf16[64,128], index: 3, kind: input, shape index: {}]   ;;  %s10201_s4 = inlined_call_operand.hbm [shape: bf16[128,128], index: 4, kind: input, shape index: {}]   ;;  %s10202_s5 = inlined_call_operand.vmem [shape: f32[1,128], index: 5, kind: input, shape index: {}]   ;;  %s10203_s6 = inlined_call_operand.hbm [shape: bf16[128,128], index: 6, kind: input, shape index: {}]   ;;  %s10204_s7 = inlined_call_operand.vmem [shape: f32[1,128], index: 7, kind: input, shape index: {}]   ;;  %s10205_s8 = inlined_call_operand.hbm [shape: bf16[32,128], index: 8, kind: output, shape index: {0}]   ;;  %s10206_s9 = inlined_call_operand.hbm [shape: f32[32,128], index: 9, kind: output, shape index: {1}]  }
   0x1   :  { %10221 = sst [smem:[#allocation29_spill]] %s10197_s0 }
   0x2   :  { %10222 = sst [smem:[#allocation30_spill]] %s10200_s3 }
   0x3   :  { %10223 = sst [smem:[#allocation31_spill]] %s10201_s4 }
   0x4   :  { %10224 = sst [smem:[#allocation32_spill]] %s10202_s5 }
   0x5   :  { %10225 = sst [smem:[#allocation33_spill]] %s10203_s6 }
   0x6   :  { %10226 = sst [smem:[#allocation34_spill]] %s10204_s7 }
   0x7   :  { %10227 = sst [smem:[#allocation35_spill]] %s10205_s8 }
   0x8   :  { %10228 = sst [smem:[#allocation36_spill]] %s10206_s9 }
   0x9   :  { %15 = vsyncpa [#allocation4], 0 }
   0xa   :  { %17 = vsyncpa [#allocation4 + $0x1], 0 }
   0xb   :  { %18 = vsyncpa [#allocation7], 0 }
   0xc   :  { %20 = vsyncpa [#allocation7 + $0x1], 0 }
   0xd   :  { %21 = vsyncpa [#allocation10], 0 }
   0xe   :  { %22 = vsyncpa [#allocation5], 0 }
   0xf   :  { %24 = vsyncpa [#allocation5 + $0x1], 0 }
  0x10   :  { %25 = vsyncpa [#allocation13], 0 }
  0x11   :  { %27 = vsyncpa [#allocation13 + $0x1], 0  ;;  %s8051_s30 = smov 0   ;;  %s8053_s10 = smov 0  }
  0x12   :  { %s8055_s11 = smov 0   ;;  %s8057_s12 = smov 0  }
  0x13   :  { %s8059_s13 = smov 0   ;;  %s8061_s14 = smov 0  }
  0x14   :  { %s8063_s15 = smov 0   ;;  %s8065_s16 = smov 0  }
  0x15   :  { %s8067_s17 = smov 0   ;;  %s8069_s18 = smov 0  }
  0x16   :  { %s8071_s19 = smov 0  }
  0x17 LB: > { %10229 = sst [smem:[#allocation20_spill]] %s7936_s30  ;;  %s8105_s20 = sadd.s32 4294967295, %s7976_s19   ;;  %s7976_s19 = sphi %s8071_s19, %s33_s19   ;;  %s7972_s18 = sphi %s8069_s18, %s10271_s18   ;;  %s7968_s17 = sphi %s8067_s17, %s10270_s17   ;;  %s7964_s16 = sphi %s8065_s16, %s10269_s16   ;;  %s7960_s15 = sphi %s8063_s15, %s10268_s15   ;;  %s7956_s14 = sphi %s8061_s14, %s10277_s14   ;;  %s7952_s13 = sphi %s8059_s13, %s10276_s13   ;;  %s7948_s12 = sphi %s8057_s12, %s10275_s12   ;;  %s7944_s11 = sphi %s8055_s11, %s10274_s11   ;;  %s7940_s10 = sphi %s8053_s10, %s10273_s10   ;;  %s7936_s30 = sphi %s8051_s30, %s10272_s30  }
  0x18   : > { %10230 = sst [smem:[#allocation21_spill]] %s7960_s15  ;;  %s5940_s21 = sadd.s32 4294967294, %s7976_s19  }
  0x19   : > { %10231 = sst [smem:[#allocation22_spill]] %s7968_s17  ;;  %p61_p0 = scmp.ne.s32.totalorder %s7956_s14, %s7952_s13 }
  0x1a   : > { %10232 = sst [smem:[#allocation23_spill]] %s7972_s18  ;;  %p62_p1 = scmp.eq.s32.totalorder %s7976_s19, 0 }
  0x1b   : > { %p67_p2 = scmp.ne.s32.totalorder %s7952_s13, %s7948_s12  ;;  %p10213_p3 = scmp.eq.s32.totalorder %s8105_s20, 0 }
  0x1c   : > { %p8115_p4 = por %p62_p1, %p61_p0  ;;  %p249_p5 = scmp.ne.s32.totalorder %s7944_s11, %s7940_s10 }
  0x1d   : > { %p8123_p6 = por %p10213_p3, %p67_p2  ;;  %p250_p7 = scmp.eq.s32.totalorder %s8105_s20, 3 }
  0x1e   : > { %p255_p8 = scmp.ne.s32.totalorder %s7940_s10, %s7936_s30  ;;  %p256_p9 = scmp.eq.s32.totalorder %s5940_s21, 3 }
  0x1f   : > { %s10234_s25 = scalar_select %p8123_p6, 1, 0 }
  0x20   : > { %p8130_p10 = por %p250_p7, %p249_p5  ;;  %p5941_p11 = scmp.ge.s32.totalorder %s7976_s19, 1 }
  0x21   : > { %p8135_p12 = por %p256_p9, %p255_p8  ;;  %p289_p13 = scmp.lt.s32.totalorder %s7976_s19, 5 }
  0x22   : > { %s10235_s26 = scalar_select %p8130_p10, 1, 0 }
  0x23   : > { %s10237_s27 = scalar_select %p8135_p12, 1, 0 }
  0x24   : > { %10236 = sst [smem:[#allocation24_spill]] %s10235_s26  ;;  %p8140_p0 = pnand %p5941_p11, %p289_p13 }
  0x25   : > { %10238 = sst [smem:[#allocation25_spill]] %s10237_s27  ;;  %s7978_s29 = smov [#allocation8]  }
  0x26   : > { %s304_s12 = sshll.u32 %s7978_s29, 4  ;;  %p7531_p1 = pneg %p8140_p0  ;;  %s8144_s12 = int_to_ptr.vmem [resolvable:$true] %s304_s12 }
  0x27   : > { %p7554_p2 = scmp.lt.s32.totalorder %s7976_s19, 4  ;;  %s7979_s23 = smov [#allocation9]  }
  0x28   : > { %p8151_p5 = pnand %p7531_p1, %p10213_p3  ;;  %s320_s27 = sshll.u32 %s7979_s23, 4  ;;  %s8161_s27 = int_to_ptr.vmem [resolvable:$true] %s320_s27 }
  0x29   : > { %p8157_p7 = pnand %p7554_p2, %p8115_p4  ;;  %s10242_s4 = sld [smem:[#allocation31_spill]] }
  0x2a   : > { %p7696_p9 = pneg %p8151_p5 }
  0x2f   : > { %s7694_s9 = scalar_lea.hbm %s10242_s4, 1024 }
  0x30   : > { %p7695_p8 = scmp.ne.s32.totalorder %s10242_s4, %s7694_s9  ;;  %p7701_p13 = scmp.lt.u32.totalorder %s7694_s9, %s10242_s4 }
  0x32   : > { %p7697_p4 = pnand %p7696_p9, %p7695_p8 }
  0x34   : > { %p7698_p11 = pneg %p7697_p4 }
  0x36   : > { %p7703_p1 = pnand %p7701_p13, %p7698_p11 }
  0x38   : > { %7706 = shalt.err (!%p7703_p1)
}
  0x39   : > { %s7707_s30 = scalar_lea.vmem %s8144_s12, 1024  ;;  %p7715_p10 = scmp.lt.s32.totalorder %s8144_s12, %s8144_s12 }
  0x3a   : > { %p7708_p2 = scmp.ne.s32.totalorder %s8144_s12, %s7707_s30  ;;  %p7716_p8 = scmp.lt.s32.totalorder %s7707_s30, %s7707_s30 }
  0x3c   : > { %p7710_p3 = pnand %p7708_p2, %p7696_p9  ;;  %p7717_p4 = por %p7716_p8, %p7715_p10 }
  0x3e   : > { %p7711_p12 = pneg %p7710_p3 }
  0x40   : > { %p7718_p6 = pnand %p7717_p4, %p7711_p12 }
  0x42   : > { %7721 = shalt.err (!%p7718_p6)
}
  0x43   : > { %s7980_s7 = smov 64   ;;  %s7981_s8 = smov 4  }
  0x44   : > { %7534 = dma.hbm_to_vmem [thread:$0]  (!%p8151_p5), %s10242_s4, 1024, %s8144_s12, [#allocation7], %s7980_s7, %s7980_s7, %s7981_s8  }
  0x45   : > { %s10243_s6 = sld [smem:[#allocation33_spill]] }
  0x4b   : > { %s7722_s24 = scalar_lea.hbm %s10243_s6, 1024 }
  0x4c   : > { %p7723_p3 = scmp.ne.s32.totalorder %s10243_s6, %s7722_s24  ;;  %p7729_p12 = scmp.lt.u32.totalorder %s7722_s24, %s10243_s6 }
  0x4e   : > { %p7725_p6 = pnand %p7723_p3, %p7696_p9 }
  0x50   : > { %p7726_p10 = pneg %p7725_p6 }
  0x52   : > { %p7731_p11 = pnand %p7729_p12, %p7726_p10 }
  0x54   : > { %7734 = shalt.err (!%p7731_p11)
}
  0x55   : > { %s7735_s12 = scalar_lea.vmem %s8161_s27, 1024  ;;  %p7743_p8 = scmp.lt.s32.totalorder %s8161_s27, %s8161_s27 }
  0x56   : > { %p7736_p13 = scmp.ne.s32.totalorder %s8161_s27, %s7735_s12  ;;  %p7744_p4 = scmp.lt.s32.totalorder %s7735_s12, %s7735_s12 }
  0x58   : > { %p7738_p1 = pnand %p7736_p13, %p7696_p9  ;;  %p7745_p3 = por %p7744_p4, %p7743_p8 }
  0x5a   : > { %p7739_p2 = pneg %p7738_p1 }
  0x5c   : > { %p7746_p6 = pnand %p7745_p3, %p7739_p2 }
  0x5e   : > { %7749 = shalt.err (!%p7746_p6)
}
  0x5f   : > { %7537 = dma.hbm_to_vmem [thread:$0]  (!%p8151_p5), %s10243_s6, 1024, %s8161_s27, [#allocation10], %s7980_s7, %s7980_s7, %s7981_s8  }
  0x60   : > { %s42_s15 = sadd.s32 1, %s7968_s17  ;;  %s45_s9 = sadd.s32 1, %s7972_s18 }
  0x61   : > { %p43_p9 = scmp.ge.s32.totalorder %s42_s15, 2  ;;  %s8218_s23 = sand.u32 1, %s7956_s14  }
  0x62   : > { %s5947_s21 = sshll.u32 %s7968_s17, 1  ;;  %s5945_s27 = sshll.u32 %s8218_s23, 5 }
  0x63   : > { %s10279_s15 = smov (%p43_p9, %s42_s15), 0  ;;  %s10281_s9 = smov (!%p43_p9, %s45_s9), %s7972_s18 }
  0x64   : > { %10244 = sst [smem:[#allocation26_spill]] %s10279_s15  ;;  %s50_s26 = ssub.s32 %s7968_s17, %s10279_s15 }
  0x65   : > { %p47_p10 = scmp.ge.s32.totalorder %s10281_s9, 2  ;;  %s7030_s7 = sshll.u32 %s7972_s18, 3 }
  0x66   : > { %s8230_s8 = sadd.s32 %s7030_s7, %s5947_s21  ;;  %s341_s29 = scalar_lea.vmem [#allocation3], %s5945_s27 }
  0x67   : > { %s10283_s9 = smov (%p47_p10, %s10281_s9), 0  ;;  %s351_s24 = sshll.u32 %s341_s29, 4  ;;  %s8250_s24 = int_to_ptr.vmem [resolvable:$true] %s351_s24 }
  0x68   : > { %10245 = sst [smem:[#allocation27_spill]] %s10283_s9  ;;  %s49_s30 = ssub.s32 %s7972_s18, %s10283_s9 }
  0x69   : > { %s5949_s12 = sshll.u32 %s8230_s8, 7  ;;  %s51_s3 = sor.u32 %s50_s26, %s49_s30 }
  0x6a   : > { %p237_p5 = scmp.eq.s32.totalorder %s49_s30, 0  ;;  %p52_p12 = scmp.eq.s32.totalorder %s51_s3, 0 }
  0x6b   : > { %s10246_s0 = sld [smem:[#allocation29_spill]]  ;;  %s10247_s15 = sadd.s32 1, %s7944_s11 }
  0x6c   : > { %s8243_s21 = scalar_select %p237_p5, %s7944_s11, %s10247_s15  }
  0x6d   : > { %s10248_s7 = sadd.s32 1, %s7956_s14  ;;  %s338_s26 = scalar_lea.sflag [#allocation4], %s8218_s23 }
  0x6e   : > { %s8248_s27 = scalar_select %p52_p12, %s7956_s14, %s10248_s7  }
  0x6f   : > { %p7752_p13 = pneg %p8157_p7 }
  0x70   : > { %10249 = sst [smem:[#allocation28_spill]] %s8248_s27 }
  0x71   : > { %s8238_s6 = scalar_lea.hbm %s10246_s0, %s5949_s12  ;;  %s7755_s12 = scalar_lea.hbm %s10246_s0, 2048 }
  0x72   : > { %s7750_s29 = scalar_lea.hbm %s8238_s6, 512  ;;  %p7756_p8 = scmp.lt.u32.totalorder %s8238_s6, %s10246_s0 }
  0x73   : > { %p7751_p11 = scmp.ne.s32.totalorder %s8238_s6, %s7750_s29  ;;  %p7757_p4 = scmp.lt.u32.totalorder %s7755_s12, %s7750_s29 }
  0x74   : > { %p7759_p6 = scmp.lt.u32.totalorder %s7750_s29, %s8238_s6 }
  0x75   : > { %p7753_p1 = pnand %p7752_p13, %p7751_p11  ;;  %p7758_p3 = por %p7757_p4, %p7756_p8 }
  0x77   : > { %p7754_p2 = pneg %p7753_p1  ;;  %p7760_p9 = por %p7759_p6, %p7758_p3 }
  0x79   : > { %p7761_p10 = pnand %p7760_p9, %p7754_p2 }
  0x7b   : > { %7764 = shalt.err (!%p7761_p10)
}
  0x7c   : > { %s7765_s5 = scalar_lea.vmem %s8250_s24, 512  ;;  %s7982_s7 = smov [#allocation3]  }
  0x7d   : > { %p7766_p5 = scmp.ne.s32.totalorder %s8250_s24, %s7765_s5  ;;  %s7770_s4 = sshll.u32 %s7982_s7, 4  ;;  %s7771_s4 = int_to_ptr.vmem [resolvable:$false] %s7770_s4 }
  0x7e   : > { %s7772_s30 = scalar_lea.vmem %s7771_s4, 1024  ;;  %p7773_p1 = scmp.lt.s32.totalorder %s8250_s24, %s7771_s4 }
  0x7f   : > { %p7768_p12 = pnand %p7766_p5, %p7752_p13  ;;  %p7774_p8 = scmp.lt.s32.totalorder %s7772_s30, %s7765_s5 }
  0x81   : > { %p7769_p11 = pneg %p7768_p12  ;;  %p7775_p4 = por %p7774_p8, %p7773_p1 }
  0x83   : > { %p7776_p3 = pnand %p7775_p4, %p7769_p11 }
  0x85   : > { %7779 = shalt.err (!%p7776_p3)
}
  0x86   : > { %s7983_s29 = smov 512   ;;  %s7984_s12 = smov 256  }
  0x87   : > { %s7985_s15 = smov 16   ;;  %s5954_s3 = sshll.u32 %s8230_s8, 6 }
  0x88   : > { %7541 = dma.hbm_to_vmem [thread:$0]  (!%p8157_p7), %s8238_s6, 512, %s8250_s24, %s338_s26, %s7983_s29, %s7984_s12, %s7985_s15  }
  0x89   : > { %s361_s5 = sand.u32 1, %s7976_s19   ;;  %s8286_s30 = scalar_lea.hbm %s10198_s1, %s5954_s3 }
  0x8a   : > { %s5950_s0 = sshll.u32 %s8218_s23, 4  ;;  %s8291_s17 = scalar_lea.sflag [#allocation7], %s361_s5 }
  0x8b   : > { %s365_s9 = scalar_lea.vmem [#allocation6], %s5950_s0  ;;  %s7780_s27 = scalar_lea.hbm %s8286_s30, 256 }
  0x8c   : > { %s375_s18 = sshll.u32 %s365_s9, 4  ;;  %p7781_p2 = scmp.ne.s32.totalorder %s8286_s30, %s7780_s27  ;;  %s8289_s18 = int_to_ptr.vmem [resolvable:$true] %s375_s18 }
  0x8d   : > { %s7785_s24 = scalar_lea.hbm %s10198_s1, 1024  ;;  %p7786_p10 = scmp.lt.u32.totalorder %s8286_s30, %s10198_s1 }
  0x8e   : > { %p7783_p6 = pnand %p7781_p2, %p7752_p13  ;;  %p7787_p5 = scmp.lt.u32.totalorder %s7785_s24, %s7780_s27 }
  0x8f   : > { %p7789_p11 = scmp.lt.u32.totalorder %s7780_s27, %s8286_s30 }
  0x90   : > { %p7784_p9 = pneg %p7783_p6  ;;  %p7788_p12 = por %p7787_p5, %p7786_p10 }
  0x92   : > { %p7790_p1 = por %p7789_p11, %p7788_p12 }
  0x94   : > { %p7791_p8 = pnand %p7790_p1, %p7784_p9 }
  0x96   : > { %7794 = shalt.err (!%p7791_p8)
}
  0x97   : > { %s7795_s0 = scalar_lea.vmem %s8289_s18, 256  ;;  %s7986_s9 = smov [#allocation6]  }
  0x98   : > { %p7796_p4 = scmp.ne.s32.totalorder %s8289_s18, %s7795_s0  ;;  %s7800_s23 = sshll.u32 %s7986_s9, 4  ;;  %s7801_s23 = int_to_ptr.vmem [resolvable:$false] %s7800_s23 }
  0x99   : > { %s7802_s15 = scalar_lea.vmem %s7801_s23, 512  ;;  %p7803_p6 = scmp.lt.s32.totalorder %s8289_s18, %s7801_s23 }
  0x9a   : > { %p7798_p3 = pnand %p7796_p4, %p7752_p13  ;;  %p7804_p10 = scmp.lt.s32.totalorder %s7802_s15, %s7795_s0 }
  0x9c   : > { %p7799_p2 = pneg %p7798_p3  ;;  %p7805_p5 = por %p7804_p10, %p7803_p6 }
  0x9e   : > { %p7806_p12 = pnand %p7805_p5, %p7799_p2 }
  0xa0   : > { %7809 = shalt.err (!%p7806_p12)
}
  0xa1   : > { %s7987_s27 = smov 128   ;;  %s7988_s3 = smov 8  }
  0xa2   : > { %7544 = dma.hbm_to_vmem [thread:$0]  (!%p8157_p7), %s8286_s30, 256, %s8289_s18, %s8291_s17, %s7984_s12, %s7987_s27, %s7988_s3  }
  0xa3   : > { %396 = sbr.rel (%p8140_p0) target bundleno = 2291 (0x8f3), region = 52  ;;  %s398_s5 = sand.u32 (!%p8140_p0), 1, %s7952_s13  }
  0xa4   : > { %s5956_s7 = sshll.u32 (!%p8140_p0), %s398_s5, 5  ;;  %s399_s4 = scalar_lea.sflag (!%p8140_p0), [#allocation4], %s398_s5 }
  0xa5   : > { %s8321_s6 = scalar_lea.vmem (!%p8140_p0), [#allocation3], %s5956_s7  ;;  %p10250_p13 = scmp.ne.s32.totalorder (!%p8140_p0), %s10234_s25, 0 }
  0xaa   : > { %7911 = dma.done.wait (%p10250_p13), %s399_s4, 512  }
  0xab   : > { %7913 = vsyncadd (%p10250_p13), %s399_s4, 4294966784  ;;  %s407_s22 = sand.u32 1, %s8105_s20   ;;  %s5957_s8 = sshll.u32 %s398_s5, 4 }
  0xac   : > { %s408_s17 = scalar_lea.sflag [#allocation7], %s407_s22  ;;  %s8328_s18 = scalar_lea.vmem [#allocation6], %s5957_s8 }
  0xad   : > { %7915 = dma.done.wait (%p10250_p13), %s408_s17, 256  }
  0xae   : > { %7917 = vsyncadd (%p10250_p13), %s408_s17, 4294967040  ;;  %p10251_p0 = scmp.eq.s32.totalorder %s8105_s20, 0 }
  0xb0   : > { %7919 = dma.done.wait (%p10251_p0), [#allocation7], 1024   ;;  %p10252_p7 = pmov %p10251_p0 }
  0xb1   : > { %p10253_p9 = pmov %p10251_p0 }
  0xb2   : > { %7921 = vsyncadd (%p10252_p7), [#allocation7], 4294966272 }
  0xb3   : > { %7923 = dma.done.wait (%p10253_p9), [#allocation10], 1024   ;;  %p10254_p11 = pmov %p10251_p0 }
  0xb4   : > { %s8343_s28 = sand.u32 1, %s7940_s10   ;;  %s5962_s25 = sshll.u32 %s7964_s16, 1 }
  0xb5   : > { %7925 = vsyncadd (%p10254_p11), [#allocation10], 4294966272  ;;  %s5960_s12 = sshll.u32 %s8343_s28, 3  ;;  %s5961_s30 = sshll.u32 %s8343_s28, 4 }
  0xb6   : > { %p474_p1 = scmp.lt.s32.totalorder %s5962_s25, 3  ;;  %s8353_s9 = scalar_lea.vmem [#allocation11], %s5960_s12 }
  0xb7   : > { %s8355_s20 = scalar_lea.vmem [#allocation12], %s5961_s30  ;;  %s10255_s23 = sld [smem:[#allocation21_spill]] }
  0xb8   : > { %s10285_s25 = smov (!%p474_p1, %s5962_s25), 3 }
  0xb9   : > { %s5963_s24 = sshll.u32 %s10285_s25, 3 }
  0xba   : > { %s8351_s0 = scalar_lea.vmem %s10199_s2, %s5963_s24 }
  0xbd   : > { %p5964_p8 = scmp.ne.s32.totalorder %s10255_s23, 0 }
  0xbe   : > { %v7989_v0 = vmov (!%p5964_p8), 0.0  }
  0xbf   : > { %485 = sbr.rel (%p5964_p8) target bundleno = 198 (0xc6), region = 72  ;;  %486 = vst [vmem:[#allocation2] sm:$0xff] (!%p5964_p8), %v7989_v0  ;;  %487 = vst [vmem:[#allocation2 + $0x8] sm:$0xff] (!%p5964_p8), %v7989_v0 }
  0xc6 PF: > { %v494_v1 = vlaneseq  ;;  %v8362_v3 = vld [vmem:[%s8321_s6] sm:$0xff]  ;;  %v8370_v6 = vld [vmem:[%s8321_s6 + $0x8] sm:$0xff]  ;;  %v7990_v27 = vmov 1966171168   ;;  %v7991_v40 = vmov 1.0|1.0  }
  0xc7   : > { %v4443_v28 = vunpack.c.l.s4 %v7990_v27  ;;  %v8426_v33 = vld.sshfl [vmem:[%s8328_s18] sm:$0xff pattern:$0x75316420]  ;;  %s10256_s3 = sld [smem:[#allocation30_spill]]  ;;  %s10257_s17 = sld [smem:[#allocation21_spill]] }
  0xc8   : > { %v8359_v2 = vshrl.u32 %v494_v1, 7  ;;  %v8429_v34 = vand.u32 127, %v494_v1 }
  0xc9   : > { %v4444_v29 = vunpack.c.0.s8 %v4443_v28 }
  0xca   : > { %v8365_v4 = vsub.s32 0, %v8359_v2  ;;  %v8375_v8 = vsub.s32 1, %v8359_v2  ;;  %v8384_v15 = vsub.s32 2, %v8359_v2  ;;  %v8531_v61 = vsub.s32 3, %v8359_v2 }
  0xcb   : > { %v8423_v32 = vsub.s32 %v4444_v29, %v8359_v2 }
  0xcc   : > { %v499_v5 = vrot.slane %v8362_v3, %v8365_v4  ;;  %v566_v7 = vrot.slane %v8370_v6, %v8365_v4  ;;  %v633_v9 = vrot.slane %v8362_v3, %v8375_v8  ;;  %v700_v10 = vrot.slane %v8370_v6, %v8375_v8 }
  0xcd   : > { %v8392_v18 = vrot.slane %v8362_v3, %v8384_v15  ;;  %v8435_v35 = vrot.slane %v8426_v33, %v8423_v32  ;;  %v8470_v45 = vrot.slane %v8370_v6, %v8384_v15  ;;  %v901_v0 = vrot.slane %v8362_v3, %v8531_v61  ;;  %p7001_p4 = scmp.ne.s32.totalorder %s10257_s17, 1 }
  0xce   : > { %509 = vbcast.lane.b32.xlu1 %v499_v5, 272  ;;  %501 = vbcast.lane.b32.xlu0 %v499_v5, 256  ;;  %s10258_s12 = sld [smem:[#allocation32_spill]] (!%p7001_p4)  ;;  %s10259_s26 = sld [smem:[#allocation34_spill]] (!%p7001_p4) }
  0xcf   : > { %v8440_v38 = vpack.i.b16 %v8435_v35, %v8435_v35 }
  0xd1   : > { %v4506_v39 = vrot.slane %v8440_v38, %v8375_v8  ;;  %v4502_v56 = vrot.slane %v8440_v38, %v8365_v4 }
  0xd2   : > { %513 = vbcast.lane.b32.xlu1 %v499_v5, 280  ;;  %505 = vbcast.lane.b32.xlu0 %v499_v5, 264 }
  0xd3   : > { %4541 = vmatprep.mubr.bf16.mxu0 %v4506_v39 }
  0xd6   : > { %521 = vbcast.lane.b32.xlu1 %v499_v5, 296  ;;  %517 = vbcast.lane.b32.xlu0 %v499_v5, 288 }
  0xda   : > { %529 = vbcast.lane.b32.xlu1 %v499_v5, 312  ;;  %525 = vbcast.lane.b32.xlu0 %v499_v5, 304 }
  0xde   : > { %537 = vbcast.lane.b32.xlu1 %v499_v5, 328  ;;  %533 = vbcast.lane.b32.xlu0 %v499_v5, 320 }
  0xe2   : > { %545 = vbcast.lane.b32.xlu1 %v499_v5, 344  ;;  %541 = vbcast.lane.b32.xlu0 %v499_v5, 336 }
  0xe6   : > { %553 = vbcast.lane.b32.xlu1 %v499_v5, 360  ;;  %549 = vbcast.lane.b32.xlu0 %v499_v5, 352 }
  0xea   : > { %561 = vbcast.lane.b32.xlu1 %v499_v5, 376  ;;  %557 = vbcast.lane.b32.xlu0 %v499_v5, 368 }
  0xee   : > { %572 = vbcast.lane.b32.xlu1 %v566_v7, 264  ;;  %568 = vbcast.lane.b32.xlu0 %v566_v7, 256 }
  0xf2   : > { %580 = vbcast.lane.b32.xlu1 %v566_v7, 280  ;;  %576 = vbcast.lane.b32.xlu0 %v566_v7, 272 }
  0xf6   : > { %588 = vbcast.lane.b32.xlu1 %v566_v7, 296  ;;  %584 = vbcast.lane.b32.xlu0 %v566_v7, 288 }
  0xfa   : > { %596 = vbcast.lane.b32.xlu1 %v566_v7, 312  ;;  %592 = vbcast.lane.b32.xlu0 %v566_v7, 304 }
  0xfe   : > { %604 = vbcast.lane.b32.xlu1 %v566_v7, 328  ;;  %600 = vbcast.lane.b32.xlu0 %v566_v7, 320 }
 0x102   : > { %612 = vbcast.lane.b32.xlu1 %v566_v7, 344  ;;  %608 = vbcast.lane.b32.xlu0 %v566_v7, 336 }
 0x106   : > { %620 = vbcast.lane.b32.xlu1 %v566_v7, 360  ;;  %616 = vbcast.lane.b32.xlu0 %v566_v7, 352 }
 0x10a   : > { %628 = vbcast.lane.b32.xlu1 %v566_v7, 376  ;;  %624 = vbcast.lane.b32.xlu0 %v566_v7, 368 }
 0x10e   : > { %639 = vbcast.lane.b32.xlu1 %v633_v9, 264  ;;  %635 = vbcast.lane.b32.xlu0 %v633_v9, 256 }
 0x112   : > { %647 = vbcast.lane.b32.xlu1 %v633_v9, 280  ;;  %643 = vbcast.lane.b32.xlu0 %v633_v9, 272 }
 0x116   : > { %655 = vbcast.lane.b32.xlu1 %v633_v9, 296  ;;  %651 = vbcast.lane.b32.xlu0 %v633_v9, 288 }
 0x11a   : > { %663 = vbcast.lane.b32.xlu1 %v633_v9, 312  ;;  %659 = vbcast.lane.b32.xlu0 %v633_v9, 304 }
 0x11e   : > { %671 = vbcast.lane.b32.xlu1 %v633_v9, 328  ;;  %667 = vbcast.lane.b32.xlu0 %v633_v9, 320 }
 0x122   : > { %679 = vbcast.lane.b32.xlu1 %v633_v9, 344  ;;  %675 = vbcast.lane.b32.xlu0 %v633_v9, 336 }
 0x126   : > { %687 = vbcast.lane.b32.xlu1 %v633_v9, 360  ;;  %683 = vbcast.lane.b32.xlu0 %v633_v9, 352 }
 0x12a   : > { %695 = vbcast.lane.b32.xlu1 %v633_v9, 376  ;;  %691 = vbcast.lane.b32.xlu0 %v633_v9, 368 }
 0x12e   : > { %706 = vbcast.lane.b32.xlu1 %v700_v10, 264  ;;  %702 = vbcast.lane.b32.xlu0 %v700_v10, 256 }
 0x132   : > { %714 = vbcast.lane.b32.xlu1 %v700_v10, 280  ;;  %710 = vbcast.lane.b32.xlu0 %v700_v10, 272 }
 0x136   : > { %722 = vbcast.lane.b32.xlu1 %v700_v10, 296  ;;  %718 = vbcast.lane.b32.xlu0 %v700_v10, 288 }
 0x13a   : > { %730 = vbcast.lane.b32.xlu1 %v700_v10, 312  ;;  %726 = vbcast.lane.b32.xlu0 %v700_v10, 304 }
 0x13e   : > { %738 = vbcast.lane.b32.xlu1 %v700_v10, 328  ;;  %734 = vbcast.lane.b32.xlu0 %v700_v10, 320 }
 0x140   : > { %v8381_v11 = vpop.permute.xlu1 %509  ;;  %v502_v12 = vpop.permute.xlu0 %501 }
 0x141   : > { %vm2640_vm3 = vcmp.eq.s32.totalorder %v502_v12, %v8429_v34  ;;  %vm2642_vm9 = vcmp.eq.s32.totalorder %v8381_v11, %v8429_v34 }
 0x142   : > { %746 = vbcast.lane.b32.xlu1 %v700_v10, 344  ;;  %742 = vbcast.lane.b32.xlu0 %v700_v10, 336 }
 0x144   : > { %v514_v13 = vpop.permute.xlu1 %513  ;;  %v506_v14 = vpop.permute.xlu0 %505 }
 0x145   : > { %vm2641_vm0 = vcmp.eq.s32.totalorder %v506_v14, %v8429_v34  ;;  %vm2643_vm6 = vcmp.eq.s32.totalorder %v514_v13, %v8429_v34 }
 0x146   : > { %754 = vbcast.lane.b32.xlu1 %v700_v10, 360  ;;  %750 = vbcast.lane.b32.xlu0 %v700_v10, 352  ;;  %vm6480_vm5 = vmpackc.low %vm2641_vm0, %vm2640_vm3 }
 0x147   : > { %vm6482_vm11 = vmpackc.low %vm2643_vm6, %vm2642_vm9 }
 0x148   : > { %v8386_v16 = vpop.permute.xlu1 %521  ;;  %v8388_v17 = vpop.permute.xlu0 %517 }
 0x149   : > { %vm2645_vm12 = vcmp.eq.s32.totalorder %v8386_v16, %v8429_v34  ;;  %vm2644_vm13 = vcmp.eq.s32.totalorder %v8388_v17, %v8429_v34  ;;  %v4483_v17 = vunpack.i.h.s16 %v8435_v35 }
 0x14a   : > { %762 = vbcast.lane.b32.xlu1 %v700_v10, 376  ;;  %758 = vbcast.lane.b32.xlu0 %v700_v10, 368 }
 0x14c   : > { %v8394_v19 = vpop.permute.xlu1 %529  ;;  %v8396_v20 = vpop.permute.xlu0 %525 }
 0x14d   : > { %vm2646_vm3 = vcmp.eq.s32.totalorder %v8396_v20, %v8429_v34  ;;  %v8562_v20 = vpack.i.b16 %v4483_v17, %v4483_v17 }
 0x14e   : > { %773 = vbcast.lane.b32.xlu1 %v8392_v18, 264  ;;  %769 = vbcast.lane.b32.xlu0 %v8392_v18, 256 }
 0x150   : > { %v8400_v21 = vpop.permute.xlu1 %537  ;;  %v8402_v22 = vpop.permute.xlu0 %533 }
 0x151   : > { %vm2648_vm9 = vcmp.eq.s32.totalorder %v8402_v22, %v8429_v34 }
 0x152   : > { %781 = vbcast.lane.b32.xlu1 %v8392_v18, 280  ;;  %777 = vbcast.lane.b32.xlu0 %v8392_v18, 272 }
 0x154   : > { %v8406_v23 = vpop.permute.xlu1 %545  ;;  %v8408_v24 = vpop.permute.xlu0 %541 }
 0x156   : > { %789 = vbcast.lane.b32.xlu1 %v8392_v18, 296  ;;  %785 = vbcast.lane.b32.xlu0 %v8392_v18, 288 }
 0x158   : > { %v8412_v25 = vpop.permute.xlu1 %553  ;;  %v8414_v26 = vpop.permute.xlu0 %549 }
 0x15a   : > { %797 = vbcast.lane.b32.xlu1 %v8392_v18, 312  ;;  %793 = vbcast.lane.b32.xlu0 %v8392_v18, 304 }
 0x15c   : > { %v8418_v30 = vpop.permute.xlu1 %561  ;;  %v8420_v31 = vpop.permute.xlu0 %557 }
 0x15e   : > { %805 = vbcast.lane.b32.xlu1 %v8392_v18, 328  ;;  %801 = vbcast.lane.b32.xlu0 %v8392_v18, 320 }
 0x160   : > { %v573_v36 = vpop.permute.xlu1 %572  ;;  %v569_v37 = vpop.permute.xlu0 %568 }
 0x161   : > { %vm2656_vm1 = vcmp.eq.s32.totalorder %v569_v37, %v8429_v34  ;;  %vm2657_vm2 = vcmp.eq.s32.totalorder %v573_v36, %v8429_v34 }
 0x162   : > { %813 = vbcast.lane.b32.xlu1 %v8392_v18, 344  ;;  %809 = vbcast.lane.b32.xlu0 %v8392_v18, 336  ;;  %vm6496_vm4 = vmpackc.low %vm2657_vm2, %vm2656_vm1  ;;  %vm2647_vm2 = vcmp.eq.s32.totalorder %v8394_v19, %v8429_v34 }
 0x163   : > { %7060 = vmatprep.subr.msk.bf16.mxu0 %vm6496_vm4, %v7991_v40  ;;  %vm6484_vm1 = vmpackc.low %vm2645_vm12, %vm2644_vm13 }
 0x164   : > { %v581_v41 = vpop.permute.xlu1 %580  ;;  %7061 = vmatpush3.bf16.msk.msra.mxu0 %vm6480_vm5, %v7991_v40  ;;  %v577_v42 = vpop.permute.xlu0 %576 }
 0x165   : > { %vm2659_vm7 = vcmp.eq.s32.totalorder %v581_v41, %v8429_v34  ;;  %vm2658_vm8 = vcmp.eq.s32.totalorder %v577_v42, %v8429_v34  ;;  %v4553_v42 = vrot.slane %v8562_v20, %v8365_v4 }
 0x166   : > { %vm6498_vm10 = vmpackc.low %vm2659_vm7, %vm2658_vm8  ;;  %821 = vbcast.lane.b32.xlu1 %v8392_v18, 360  ;;  %817 = vbcast.lane.b32.xlu0 %v8392_v18, 352  ;;  %vm2649_vm8 = vcmp.eq.s32.totalorder %v8400_v21, %v8429_v34  ;;  %v4557_v21 = vrot.slane %v8562_v20, %v8375_v8 }
 0x167   : > { %7062 = vmatprep.subr.msk.bf16.mxu0 %vm6498_vm10, %v7991_v40  ;;  %vm6486_vm7 = vmpackc.low %vm2647_vm2, %vm2646_vm3 }
 0x168   : > { %v589_v43 = vpop.permute.xlu1 %588  ;;  %7063 = vmatpush3.bf16.msk.msra.mxu0 %vm6482_vm11, %v7991_v40  ;;  %v585_v44 = vpop.permute.xlu0 %584  ;;  %vm6488_vm13 = vmpackc.low %vm2649_vm8, %vm2648_vm9  ;;  %4592 = vmatprep.mubr.bf16.mxu1 %v4557_v21 }
 0x169   : > { %vm2661_vm14 = vcmp.eq.s32.totalorder %v589_v43, %v8429_v34  ;;  %vm2660_vm15 = vcmp.eq.s32.totalorder %v585_v44, %v8429_v34 }
 0x16a   : > { %vm6500_vm0 = vmpackc.low %vm2661_vm14, %vm2660_vm15  ;;  %829 = vbcast.lane.b32.xlu1 %v8392_v18, 376  ;;  %825 = vbcast.lane.b32.xlu0 %v8392_v18, 368  ;;  %vm2651_vm14 = vcmp.eq.s32.totalorder %v8406_v23, %v8429_v34  ;;  %vm2650_vm15 = vcmp.eq.s32.totalorder %v8408_v24, %v8429_v34 }
 0x16b   : > { %7064 = vmatprep.subr.msk.bf16.mxu0 %vm6500_vm0, %v7991_v40  ;;  %vm6490_vm3 = vmpackc.low %vm2651_vm14, %vm2650_vm15 }
 0x16c   : > { %v597_v46 = vpop.permute.xlu1 %596  ;;  %7065 = vmatpush3.bf16.msk.msra.mxu0 %vm6484_vm1, %v7991_v40  ;;  %v593_v47 = vpop.permute.xlu0 %592 }
 0x16d   : > { %vm2663_vm4 = vcmp.eq.s32.totalorder %v597_v46, %v8429_v34  ;;  %vm2662_vm5 = vcmp.eq.s32.totalorder %v593_v47, %v8429_v34  ;;  %v8644_v47 = vsub.s32 4, %v8359_v2 }
 0x16e   : > { %vm6502_vm6 = vmpackc.low %vm2663_vm4, %vm2662_vm5  ;;  %840 = vbcast.lane.b32.xlu1 %v8470_v45, 264  ;;  %836 = vbcast.lane.b32.xlu0 %v8470_v45, 256  ;;  %vm2653_vm4 = vcmp.eq.s32.totalorder %v8412_v25, %v8429_v34  ;;  %vm2652_vm5 = vcmp.eq.s32.totalorder %v8414_v26, %v8429_v34  ;;  %v8583_v26 = vrot.slane %v8370_v6, %v8531_v61 }
 0x16f   : > { %7066 = vmatprep.subr.msk.bf16.mxu0 %vm6502_vm6, %v7991_v40  ;;  %vm6492_vm9 = vmpackc.low %vm2653_vm4, %vm2652_vm5 }
 0x170   : > { %v605_v48 = vpop.permute.xlu1 %604  ;;  %7067 = vmatpush3.bf16.msk.msra.mxu0 %vm6486_vm7, %v7991_v40  ;;  %v601_v49 = vpop.permute.xlu0 %600 }
 0x171   : > { %vm2665_vm10 = vcmp.eq.s32.totalorder %v605_v48, %v8429_v34  ;;  %vm2664_vm11 = vcmp.eq.s32.totalorder %v601_v49, %v8429_v34 }
 0x172   : > { %vm6504_vm12 = vmpackc.low %vm2665_vm10, %vm2664_vm11  ;;  %848 = vbcast.lane.b32.xlu1 %v8470_v45, 280  ;;  %844 = vbcast.lane.b32.xlu0 %v8470_v45, 272  ;;  %vm2655_vm10 = vcmp.eq.s32.totalorder %v8418_v30, %v8429_v34  ;;  %vm2654_vm11 = vcmp.eq.s32.totalorder %v8420_v31, %v8429_v34 }
 0x173   : > { %7068 = vmatprep.subr.msk.bf16.mxu0 %vm6504_vm12, %v7991_v40  ;;  %vm6494_vm15 = vmpackc.low %vm2655_vm10, %vm2654_vm11 }
 0x174   : > { %v613_v50 = vpop.permute.xlu1 %612  ;;  %7069 = vmatpush3.bf16.msk.msra.mxu0 %vm6488_vm13, %v7991_v40  ;;  %v609_v51 = vpop.permute.xlu0 %608 }
 0x175   : > { %vm2667_vm0 = vcmp.eq.s32.totalorder %v613_v50, %v8429_v34  ;;  %vm2666_vm1 = vcmp.eq.s32.totalorder %v609_v51, %v8429_v34  ;;  %v1035_v50 = vrot.slane %v8362_v3, %v8644_v47 }
 0x176   : > { %vm6506_vm2 = vmpackc.low %vm2667_vm0, %vm2666_vm1  ;;  %856 = vbcast.lane.b32.xlu1 %v8470_v45, 296  ;;  %852 = vbcast.lane.b32.xlu0 %v8470_v45, 288 }
 0x177   : > { %7070 = vmatprep.subr.msk.bf16.mxu0 %vm6506_vm2, %v7991_v40 }
 0x178   : > { %v621_v52 = vpop.permute.xlu1 %620  ;;  %7071 = vmatpush3.bf16.msk.msra.mxu0 %vm6490_vm3, %v7991_v40  ;;  %v617_v53 = vpop.permute.xlu0 %616 }
 0x179   : > { %vm2669_vm6 = vcmp.eq.s32.totalorder %v621_v52, %v8429_v34  ;;  %vm2668_vm7 = vcmp.eq.s32.totalorder %v617_v53, %v8429_v34 }
 0x17a   : > { %vm6508_vm8 = vmpackc.low %vm2669_vm6, %vm2668_vm7  ;;  %864 = vbcast.lane.b32.xlu1 %v8470_v45, 312  ;;  %860 = vbcast.lane.b32.xlu0 %v8470_v45, 304 }
 0x17b   : > { %7072 = vmatprep.subr.msk.bf16.mxu0 %vm6508_vm8, %v7991_v40 }
 0x17c   : > { %v629_v54 = vpop.permute.xlu1 %628  ;;  %7073 = vmatpush3.bf16.msk.msra.mxu0 %vm6492_vm9, %v7991_v40  ;;  %v625_v55 = vpop.permute.xlu0 %624 }
 0x17d   : > { %vm2671_vm12 = vcmp.eq.s32.totalorder %v629_v54, %v8429_v34  ;;  %vm2670_vm13 = vcmp.eq.s32.totalorder %v625_v55, %v8429_v34 }
 0x17e   : > { %vm6510_vm14 = vmpackc.low %vm2671_vm12, %vm2670_vm13  ;;  %872 = vbcast.lane.b32.xlu1 %v8470_v45, 328  ;;  %868 = vbcast.lane.b32.xlu0 %v8470_v45, 320 }
 0x17f   : > { %7074 = vmatprep.subr.msk.bf16.mxu0 %vm6510_vm14, %v7991_v40 }
 0x180   : > { %v640_v57 = vpop.permute.xlu1 %639  ;;  %7075 = vmatpush3.bf16.msk.msra.mxu0 %vm6494_vm15, %v7991_v40  ;;  %v636_v58 = vpop.permute.xlu0 %635 }
 0x181   : > { %vm2673_vm0 = vcmp.eq.s32.totalorder %v640_v57, %v8429_v34  ;;  %vm2672_vm1 = vcmp.eq.s32.totalorder %v636_v58, %v8429_v34 }
 0x182   : > { %880 = vbcast.lane.b32.xlu1 %v8470_v45, 344  ;;  %876 = vbcast.lane.b32.xlu0 %v8470_v45, 336  ;;  %vm6512_vm5 = vmpackc.low %vm2673_vm0, %vm2672_vm1 }
 0x183   : > { %4542 = vmatmul.mubr.bf16.vlgmr.msra.gmra.mrb[0].mxu0 %v4502_v56 }
 0x184   : > { %v648_v59 = vpop.permute.xlu1 %647  ;;  %v644_v60 = vpop.permute.xlu0 %643 }
 0x185   : > { %vm2675_vm6 = vcmp.eq.s32.totalorder %v648_v59, %v8429_v34  ;;  %vm2674_vm7 = vcmp.eq.s32.totalorder %v644_v60, %v8429_v34  ;;  %v4441_v59 = vcombine.high %v8426_v33, %v8426_v33 }
 0x186   : > { %888 = vbcast.lane.b32.xlu1 %v8470_v45, 360  ;;  %884 = vbcast.lane.b32.xlu0 %v8470_v45, 352  ;;  %vm6514_vm11 = vmpackc.low %vm2675_vm6, %vm2674_vm7 }
 0x188   : > { %v8533_v62 = vpop.permute.xlu1 %655  ;;  %v652_v63 = vpop.permute.xlu0 %651 }
 0x189   : > { %vm2677_vm12 = vcmp.eq.s32.totalorder %v8533_v62, %v8429_v34  ;;  %vm2676_vm13 = vcmp.eq.s32.totalorder %v652_v63, %v8429_v34  ;;  %v8677_v63 = vrot.slane %v4441_v59, %v8423_v32 }
 0x18a   : > { %896 = vbcast.lane.b32.xlu1 %v8470_v45, 376  ;;  %892 = vbcast.lane.b32.xlu0 %v8470_v45, 368  ;;  %vm6516_vm1 = vmpackc.low %vm2677_vm12, %vm2676_vm13 }
 0x18c   : > { %v8539_v1 = vpop.permute.xlu1 %663  ;;  %v8541_v5 = vpop.permute.xlu0 %659 }
 0x18e   : > { %907 = vbcast.lane.b32.xlu1 %v901_v0, 264  ;;  %903 = vbcast.lane.b32.xlu0 %v901_v0, 256 }
 0x190   : > { %v8543_v7 = vpop.permute.xlu1 %671  ;;  %v8545_v9 = vpop.permute.xlu0 %667 }
 0x192   : > { %915 = vbcast.lane.b32.xlu1 %v901_v0, 280  ;;  %911 = vbcast.lane.b32.xlu0 %v901_v0, 272 }
 0x194   : > { %v8547_v10 = vpop.permute.xlu1 %679  ;;  %v8549_v11 = vpop.permute.xlu0 %675 }
 0x196   : > { %923 = vbcast.lane.b32.xlu1 %v901_v0, 296  ;;  %919 = vbcast.lane.b32.xlu0 %v901_v0, 288 }
 0x198   : > { %v8551_v12 = vpop.permute.xlu1 %687  ;;  %v8553_v13 = vpop.permute.xlu0 %683 }
 0x19a   : > { %931 = vbcast.lane.b32.xlu1 %v901_v0, 312  ;;  %927 = vbcast.lane.b32.xlu0 %v901_v0, 304 }
 0x19c   : > { %v8555_v14 = vpop.permute.xlu1 %695  ;;  %v8557_v16 = vpop.permute.xlu0 %691 }
 0x19e   : > { %939 = vbcast.lane.b32.xlu1 %v901_v0, 328  ;;  %935 = vbcast.lane.b32.xlu0 %v901_v0, 320 }
 0x1a0   : > { %v707_v18 = vpop.permute.xlu1 %706  ;;  %v703_v19 = vpop.permute.xlu0 %702 }
 0x1a1   : > { %vm2688_vm2 = vcmp.eq.s32.totalorder %v703_v19, %v8429_v34  ;;  %vm2689_vm3 = vcmp.eq.s32.totalorder %v707_v18, %v8429_v34 }
 0x1a2   : > { %947 = vbcast.lane.b32.xlu1 %v901_v0, 344  ;;  %943 = vbcast.lane.b32.xlu0 %v901_v0, 336  ;;  %vm6528_vm4 = vmpackc.low %vm2689_vm3, %vm2688_vm2  ;;  %vm2679_vm2 = vcmp.eq.s32.totalorder %v8539_v1, %v8429_v34  ;;  %vm2678_vm3 = vcmp.eq.s32.totalorder %v8541_v5, %v8429_v34  ;;  %v8683_v5 = vpack.i.b16 %v8677_v63, %v8677_v63 }
 0x1a3   : > { %7082 = vmatprep.subr.msk.bf16.mxu1 %vm6528_vm4, %v7991_v40  ;;  %vm6518_vm7 = vmpackc.low %vm2679_vm2, %vm2678_vm3 }
 0x1a4   : > { %v715_v22 = vpop.permute.xlu1 %714  ;;  %7083 = vmatpush3.bf16.msk.msra.mxu1 %vm6512_vm5, %v7991_v40  ;;  %v711_v23 = vpop.permute.xlu0 %710  ;;  %v4608_v33 = vrot.slane %v8683_v5, %v8375_v8 }
 0x1a5   : > { %vm2691_vm8 = vcmp.eq.s32.totalorder %v715_v22, %v8429_v34  ;;  %vm2690_vm9 = vcmp.eq.s32.totalorder %v711_v23, %v8429_v34 }
 0x1a6   : > { %vm6530_vm10 = vmpackc.low %vm2691_vm8, %vm2690_vm9  ;;  %955 = vbcast.lane.b32.xlu1 %v901_v0, 360  ;;  %951 = vbcast.lane.b32.xlu0 %v901_v0, 352  ;;  %vm2681_vm8 = vcmp.eq.s32.totalorder %v8543_v7, %v8429_v34  ;;  %vm2680_vm9 = vcmp.eq.s32.totalorder %v8545_v9, %v8429_v34 }
 0x1a7   : > { %7084 = vmatprep.subr.msk.bf16.mxu1 %vm6530_vm10, %v7991_v40  ;;  %vm6520_vm13 = vmpackc.low %vm2681_vm8, %vm2680_vm9  ;;  %4643 = vmatprep.mubr.bf16.mxu0 %v4608_v33 }
 0x1a8   : > { %v723_v24 = vpop.permute.xlu1 %722  ;;  %7085 = vmatpush3.bf16.msk.msra.mxu1 %vm6514_vm11, %v7991_v40  ;;  %v719_v25 = vpop.permute.xlu0 %718 }
 0x1a9   : > { %vm2693_vm14 = vcmp.eq.s32.totalorder %v723_v24, %v8429_v34  ;;  %vm2692_vm15 = vcmp.eq.s32.totalorder %v719_v25, %v8429_v34  ;;  %v4604_v24 = vrot.slane %v8683_v5, %v8365_v4 }
 0x1aa   : > { %vm6532_vm0 = vmpackc.low %vm2693_vm14, %vm2692_vm15  ;;  %963 = vbcast.lane.b32.xlu1 %v901_v0, 376  ;;  %959 = vbcast.lane.b32.xlu0 %v901_v0, 368  ;;  %vm2683_vm14 = vcmp.eq.s32.totalorder %v8547_v10, %v8429_v34  ;;  %vm2682_vm15 = vcmp.eq.s32.totalorder %v8549_v11, %v8429_v34 }
 0x1ab   : > { %7086 = vmatprep.subr.msk.bf16.mxu1 %vm6532_vm0, %v7991_v40  ;;  %vm6522_vm3 = vmpackc.low %vm2683_vm14, %vm2682_vm15 }
 0x1ac   : > { %v731_v27 = vpop.permute.xlu1 %730  ;;  %7087 = vmatpush3.bf16.msk.msra.mxu1 %vm6516_vm1, %v7991_v40  ;;  %v727_v28 = vpop.permute.xlu0 %726 }
 0x1ad   : > { %vm2695_vm4 = vcmp.eq.s32.totalorder %v731_v27, %v8429_v34  ;;  %vm2694_vm5 = vcmp.eq.s32.totalorder %v727_v28, %v8429_v34 }
 0x1ae   : > { %vm6534_vm6 = vmpackc.low %vm2695_vm4, %vm2694_vm5  ;;  %974 = vbcast.lane.b32.xlu1 %v8583_v26, 264  ;;  %970 = vbcast.lane.b32.xlu0 %v8583_v26, 256  ;;  %vm2685_vm4 = vcmp.eq.s32.totalorder %v8551_v12, %v8429_v34  ;;  %vm2684_vm5 = vcmp.eq.s32.totalorder %v8553_v13, %v8429_v34  ;;  %v8705_v12 = vrot.slane %v8370_v6, %v8644_v47 }
 0x1af   : > { %7088 = vmatprep.subr.msk.bf16.mxu1 %vm6534_vm6, %v7991_v40  ;;  %vm6524_vm9 = vmpackc.low %vm2685_vm4, %vm2684_vm5 }
 0x1b0   : > { %v739_v29 = vpop.permute.xlu1 %738  ;;  %7089 = vmatpush3.bf16.msk.msra.mxu1 %vm6518_vm7, %v7991_v40  ;;  %v735_v30 = vpop.permute.xlu0 %734 }
 0x1b1   : > { %vm2697_vm10 = vcmp.eq.s32.totalorder %v739_v29, %v8429_v34  ;;  %vm2696_vm11 = vcmp.eq.s32.totalorder %v735_v30, %v8429_v34  ;;  %v8766_v29 = vsub.s32 5, %v8359_v2 }
 0x1b2   : > { %vm6536_vm12 = vmpackc.low %vm2697_vm10, %vm2696_vm11  ;;  %982 = vbcast.lane.b32.xlu1 %v8583_v26, 280  ;;  %978 = vbcast.lane.b32.xlu0 %v8583_v26, 272  ;;  %vm2687_vm10 = vcmp.eq.s32.totalorder %v8555_v14, %v8429_v34  ;;  %vm2686_vm11 = vcmp.eq.s32.totalorder %v8557_v16, %v8429_v34 }
 0x1b3   : > { %7090 = vmatprep.subr.msk.bf16.mxu1 %vm6536_vm12, %v7991_v40  ;;  %vm6526_vm15 = vmpackc.low %vm2687_vm10, %vm2686_vm11 }
 0x1b4   : > { %v747_v31 = vpop.permute.xlu1 %746  ;;  %7091 = vmatpush3.bf16.msk.msra.mxu1 %vm6520_vm13, %v7991_v40  ;;  %v743_v36 = vpop.permute.xlu0 %742 }
 0x1b5   : > { %vm2699_vm0 = vcmp.eq.s32.totalorder %v747_v31, %v8429_v34  ;;  %vm2698_vm1 = vcmp.eq.s32.totalorder %v743_v36, %v8429_v34  ;;  %v8774_v36 = vrot.slane %v8362_v3, %v8766_v29 }
 0x1b6   : > { %vm6538_vm2 = vmpackc.low %vm2699_vm0, %vm2698_vm1  ;;  %990 = vbcast.lane.b32.xlu1 %v8583_v26, 296  ;;  %986 = vbcast.lane.b32.xlu0 %v8583_v26, 288 }
 0x1b7   : > { %7092 = vmatprep.subr.msk.bf16.mxu1 %vm6538_vm2, %v7991_v40 }
 0x1b8   : > { %v755_v37 = vpop.permute.xlu1 %754  ;;  %7093 = vmatpush3.bf16.msk.msra.mxu1 %vm6522_vm3, %v7991_v40  ;;  %v751_v38 = vpop.permute.xlu0 %750 }
 0x1b9   : > { %vm2701_vm6 = vcmp.eq.s32.totalorder %v755_v37, %v8429_v34  ;;  %vm2700_vm7 = vcmp.eq.s32.totalorder %v751_v38, %v8429_v34 }
 0x1ba   : > { %vm6540_vm8 = vmpackc.low %vm2701_vm6, %vm2700_vm7  ;;  %998 = vbcast.lane.b32.xlu1 %v8583_v26, 312  ;;  %994 = vbcast.lane.b32.xlu0 %v8583_v26, 304 }
 0x1bb   : > { %7094 = vmatprep.subr.msk.bf16.mxu1 %vm6540_vm8, %v7991_v40 }
 0x1bc   : > { %v763_v39 = vpop.permute.xlu1 %762  ;;  %7095 = vmatpush3.bf16.msk.msra.mxu1 %vm6524_vm9, %v7991_v40  ;;  %v759_v41 = vpop.permute.xlu0 %758 }
 0x1bd   : > { %vm2703_vm12 = vcmp.eq.s32.totalorder %v763_v39, %v8429_v34  ;;  %vm2702_vm13 = vcmp.eq.s32.totalorder %v759_v41, %v8429_v34 }
 0x1be   : > { %vm6542_vm14 = vmpackc.low %vm2703_vm12, %vm2702_vm13  ;;  %1006 = vbcast.lane.b32.xlu1 %v8583_v26, 328  ;;  %1002 = vbcast.lane.b32.xlu0 %v8583_v26, 320 }
 0x1bf   : > { %7096 = vmatprep.subr.msk.bf16.mxu1 %vm6542_vm14, %v7991_v40 }
 0x1c0   : > { %v774_v43 = vpop.permute.xlu1 %773  ;;  %7097 = vmatpush3.bf16.msk.msra.mxu1 %vm6526_vm15, %v7991_v40  ;;  %v770_v44 = vpop.permute.xlu0 %769 }
 0x1c1   : > { %vm2705_vm0 = vcmp.eq.s32.totalorder %v774_v43, %v8429_v34  ;;  %vm2704_vm1 = vcmp.eq.s32.totalorder %v770_v44, %v8429_v34 }
 0x1c2   : > { %1014 = vbcast.lane.b32.xlu1 %v8583_v26, 344  ;;  %1010 = vbcast.lane.b32.xlu0 %v8583_v26, 336  ;;  %vm6545_vm5 = vmpackc.low %vm2705_vm0, %vm2704_vm1 }
 0x1c3   : > { %4593 = vmatmul.mubr.bf16.vlgmr.msra.gmra.mrb[0].mxu1 %v4553_v42  ;;  %v4485_v42 = vunpack.i.h.s16 %v8677_v63 }
 0x1c4   : > { %v782_v45 = vpop.permute.xlu1 %781  ;;  %v778_v46 = vpop.permute.xlu0 %777 }
 0x1c5   : > { %vm2707_vm6 = vcmp.eq.s32.totalorder %v782_v45, %v8429_v34  ;;  %vm2706_vm7 = vcmp.eq.s32.totalorder %v778_v46, %v8429_v34  ;;  %v8793_v44 = vpack.i.b16 %v4485_v42, %v4485_v42 }
 0x1c6   : > { %1022 = vbcast.lane.b32.xlu1 %v8583_v26, 360  ;;  %1018 = vbcast.lane.b32.xlu0 %v8583_v26, 352  ;;  %vm6547_vm11 = vmpackc.low %vm2707_vm6, %vm2706_vm7 }
 0x1c7   : > { %v4659_v45 = vrot.slane %v8793_v44, %v8375_v8 }
 0x1c8   : > { %v8646_v48 = vpop.permute.xlu1 %789  ;;  %v8648_v49 = vpop.permute.xlu0 %785 }
 0x1c9   : > { %vm2709_vm12 = vcmp.eq.s32.totalorder %v8646_v48, %v8429_v34  ;;  %vm2708_vm13 = vcmp.eq.s32.totalorder %v8648_v49, %v8429_v34  ;;  %4694 = vmatprep.mubr.bf16.mxu1 %v4659_v45 }
 0x1ca   : > { %1030 = vbcast.lane.b32.xlu1 %v8583_v26, 376  ;;  %1026 = vbcast.lane.b32.xlu0 %v8583_v26, 368  ;;  %vm6549_vm1 = vmpackc.low %vm2709_vm12, %vm2708_vm13 }
 0x1cc   : > { %v8654_v51 = vpop.permute.xlu1 %797  ;;  %v8656_v52 = vpop.permute.xlu0 %793 }
 0x1ce   : > { %1041 = vbcast.lane.b32.xlu1 %v1035_v50, 264  ;;  %1037 = vbcast.lane.b32.xlu0 %v1035_v50, 256 }
 0x1d0   : > { %v8658_v53 = vpop.permute.xlu1 %805  ;;  %v8660_v54 = vpop.permute.xlu0 %801 }
 0x1d2   : > { %1049 = vbcast.lane.b32.xlu1 %v1035_v50, 280  ;;  %1045 = vbcast.lane.b32.xlu0 %v1035_v50, 272 }
 0x1d4   : > { %v8662_v55 = vpop.permute.xlu1 %813  ;;  %v8664_v56 = vpop.permute.xlu0 %809 }
 0x1d6   : > { %1057 = vbcast.lane.b32.xlu1 %v1035_v50, 296  ;;  %1053 = vbcast.lane.b32.xlu0 %v1035_v50, 288 }
 0x1d8   : > { %v8666_v57 = vpop.permute.xlu1 %821  ;;  %v8668_v58 = vpop.permute.xlu0 %817 }
 0x1da   : > { %1065 = vbcast.lane.b32.xlu1 %v1035_v50, 312  ;;  %1061 = vbcast.lane.b32.xlu0 %v1035_v50, 304 }
 0x1dc   : > { %v8672_v60 = vpop.permute.xlu1 %829  ;;  %v8674_v62 = vpop.permute.xlu0 %825 }
 0x1de   : > { %1073 = vbcast.lane.b32.xlu1 %v1035_v50, 328  ;;  %1069 = vbcast.lane.b32.xlu0 %v1035_v50, 320 }
 0x1e0   : > { %v841_v0 = vpop.permute.xlu1 %840  ;;  %v837_v1 = vpop.permute.xlu0 %836 }
 0x1e1   : > { %vm2721_vm2 = vcmp.eq.s32.totalorder %v841_v0, %v8429_v34  ;;  %vm2720_vm3 = vcmp.eq.s32.totalorder %v837_v1, %v8429_v34 }
 0x1e2   : > { %vm6561_vm4 = vmpackc.low %vm2721_vm2, %vm2720_vm3  ;;  %1081 = vbcast.lane.b32.xlu1 %v1035_v50, 344  ;;  %1077 = vbcast.lane.b32.xlu0 %v1035_v50, 336  ;;  %vm2711_vm2 = vcmp.eq.s32.totalorder %v8654_v51, %v8429_v34  ;;  %vm2710_vm3 = vcmp.eq.s32.totalorder %v8656_v52, %v8429_v34  ;;  %v8813_v51 = vrot.slane %v8370_v6, %v8766_v29 }
 0x1e3   : > { %7104 = vmatprep.subr.msk.bf16.mxu0 %vm6561_vm4, %v7991_v40  ;;  %vm6551_vm7 = vmpackc.low %vm2711_vm2, %vm2710_vm3 }
 0x1e4   : > { %v849_v7 = vpop.permute.xlu1 %848  ;;  %7105 = vmatpush3.bf16.msk.msra.mxu0 %vm6545_vm5, %v7991_v40  ;;  %v845_v9 = vpop.permute.xlu0 %844 }
 0x1e5   : > { %vm2723_vm8 = vcmp.eq.s32.totalorder %v849_v7, %v8429_v34  ;;  %vm2722_vm9 = vcmp.eq.s32.totalorder %v845_v9, %v8429_v34  ;;  %v4655_v9 = vrot.slane %v8793_v44, %v8365_v4 }
 0x1e6   : > { %vm6563_vm10 = vmpackc.low %vm2723_vm8, %vm2722_vm9  ;;  %1089 = vbcast.lane.b32.xlu1 %v1035_v50, 360  ;;  %1085 = vbcast.lane.b32.xlu0 %v1035_v50, 352  ;;  %vm2713_vm8 = vcmp.eq.s32.totalorder %v8658_v53, %v8429_v34  ;;  %vm2712_vm9 = vcmp.eq.s32.totalorder %v8660_v54, %v8429_v34 }
 0x1e7   : > { %7106 = vmatprep.subr.msk.bf16.mxu0 %vm6563_vm10, %v7991_v40  ;;  %vm6553_vm13 = vmpackc.low %vm2713_vm8, %vm2712_vm9 }
 0x1e8   : > { %v857_v10 = vpop.permute.xlu1 %856  ;;  %7107 = vmatpush3.bf16.msk.msra.mxu0 %vm6547_vm11, %v7991_v40  ;;  %v853_v11 = vpop.permute.xlu0 %852 }
 0x1e9   : > { %vm2725_vm14 = vcmp.eq.s32.totalorder %v857_v10, %v8429_v34  ;;  %vm2724_vm15 = vcmp.eq.s32.totalorder %v853_v11, %v8429_v34 }
 0x1ea   : > { %vm6565_vm0 = vmpackc.low %vm2725_vm14, %vm2724_vm15  ;;  %1097 = vbcast.lane.b32.xlu1 %v1035_v50, 376  ;;  %1093 = vbcast.lane.b32.xlu0 %v1035_v50, 368  ;;  %vm2715_vm14 = vcmp.eq.s32.totalorder %v8662_v55, %v8429_v34  ;;  %vm2714_vm15 = vcmp.eq.s32.totalorder %v8664_v56, %v8429_v34 }
 0x1eb   : > { %7108 = vmatprep.subr.msk.bf16.mxu0 %vm6565_vm0, %v7991_v40  ;;  %vm6555_vm3 = vmpackc.low %vm2715_vm14, %vm2714_vm15 }
 0x1ec   : > { %v865_v13 = vpop.permute.xlu1 %864  ;;  %7109 = vmatpush3.bf16.msk.msra.mxu0 %vm6549_vm1, %v7991_v40  ;;  %v861_v14 = vpop.permute.xlu0 %860 }
 0x1ed   : > { %vm2727_vm4 = vcmp.eq.s32.totalorder %v865_v13, %v8429_v34  ;;  %vm2726_vm5 = vcmp.eq.s32.totalorder %v861_v14, %v8429_v34 }
 0x1ee   : > { %vm6567_vm6 = vmpackc.low %vm2727_vm4, %vm2726_vm5  ;;  %1108 = vbcast.lane.b32.xlu1 %v8705_v12, 264  ;;  %1104 = vbcast.lane.b32.xlu0 %v8705_v12, 256  ;;  %vm2717_vm4 = vcmp.eq.s32.totalorder %v8666_v57, %v8429_v34  ;;  %vm2716_vm5 = vcmp.eq.s32.totalorder %v8668_v58, %v8429_v34 }
 0x1ef   : > { %7110 = vmatprep.subr.msk.bf16.mxu0 %vm6567_vm6, %v7991_v40  ;;  %vm6557_vm9 = vmpackc.low %vm2717_vm4, %vm2716_vm5 }
 0x1f0   : > { %v873_v16 = vpop.permute.xlu1 %872  ;;  %7111 = vmatpush3.bf16.msk.msra.mxu0 %vm6551_vm7, %v7991_v40  ;;  %v869_v17 = vpop.permute.xlu0 %868 }
 0x1f1   : > { %vm2729_vm10 = vcmp.eq.s32.totalorder %v873_v16, %v8429_v34  ;;  %vm2728_vm11 = vcmp.eq.s32.totalorder %v869_v17, %v8429_v34 }
 0x1f2   : > { %vm6569_vm12 = vmpackc.low %vm2729_vm10, %vm2728_vm11  ;;  %1116 = vbcast.lane.b32.xlu1 %v8705_v12, 280  ;;  %1112 = vbcast.lane.b32.xlu0 %v8705_v12, 272  ;;  %vm2719_vm10 = vcmp.eq.s32.totalorder %v8672_v60, %v8429_v34  ;;  %vm2718_vm11 = vcmp.eq.s32.totalorder %v8674_v62, %v8429_v34 }
 0x1f3   : > { %7112 = vmatprep.subr.msk.bf16.mxu0 %vm6569_vm12, %v7991_v40  ;;  %vm6559_vm15 = vmpackc.low %vm2719_vm10, %vm2718_vm11 }
 0x1f4   : > { %v881_v18 = vpop.permute.xlu1 %880  ;;  %7113 = vmatpush3.bf16.msk.msra.mxu0 %vm6553_vm13, %v7991_v40  ;;  %v877_v19 = vpop.permute.xlu0 %876 }
 0x1f5   : > { %vm2731_vm0 = vcmp.eq.s32.totalorder %v881_v18, %v8429_v34  ;;  %vm2730_vm1 = vcmp.eq.s32.totalorder %v877_v19, %v8429_v34 }
 0x1f6   : > { %vm6571_vm2 = vmpackc.low %vm2731_vm0, %vm2730_vm1  ;;  %1124 = vbcast.lane.b32.xlu1 %v8705_v12, 296  ;;  %1120 = vbcast.lane.b32.xlu0 %v8705_v12, 288 }
 0x1f7   : > { %7114 = vmatprep.subr.msk.bf16.mxu0 %vm6571_vm2, %v7991_v40 }
 0x1f8   : > { %v889_v20 = vpop.permute.xlu1 %888  ;;  %7115 = vmatpush3.bf16.msk.msra.mxu0 %vm6555_vm3, %v7991_v40  ;;  %v885_v21 = vpop.permute.xlu0 %884 }
 0x1f9   : > { %vm2733_vm6 = vcmp.eq.s32.totalorder %v889_v20, %v8429_v34  ;;  %vm2732_vm7 = vcmp.eq.s32.totalorder %v885_v21, %v8429_v34  ;;  %v7665_v21 = vld [vmem:[%s8321_s6 + $0x8] sm:$0xff] }
 0x1fa   : > { %vm6573_vm8 = vmpackc.low %vm2733_vm6, %vm2732_vm7  ;;  %1132 = vbcast.lane.b32.xlu1 %v8705_v12, 312  ;;  %1128 = vbcast.lane.b32.xlu0 %v8705_v12, 304 }
 0x1fb   : > { %7116 = vmatprep.subr.msk.bf16.mxu0 %vm6573_vm8, %v7991_v40 }
 0x1fc   : > { %v897_v22 = vpop.permute.xlu1 %896  ;;  %7117 = vmatpush3.bf16.msk.msra.mxu0 %vm6557_vm9, %v7991_v40  ;;  %v893_v23 = vpop.permute.xlu0 %892 }
 0x1fd   : > { %vm2735_vm12 = vcmp.eq.s32.totalorder %v897_v22, %v8429_v34  ;;  %vm2734_vm13 = vcmp.eq.s32.totalorder %v893_v23, %v8429_v34 }
 0x1fe   : > { %vm6575_vm14 = vmpackc.low %vm2735_vm12, %vm2734_vm13  ;;  %1140 = vbcast.lane.b32.xlu1 %v8705_v12, 328  ;;  %1136 = vbcast.lane.b32.xlu0 %v8705_v12, 320 }
 0x1ff   : > { %7118 = vmatprep.subr.msk.bf16.mxu0 %vm6575_vm14, %v7991_v40 }
 0x200   : > { %v908_v25 = vpop.permute.xlu1 %907  ;;  %7119 = vmatpush3.bf16.msk.msra.mxu0 %vm6559_vm15, %v7991_v40  ;;  %v904_v26 = vpop.permute.xlu0 %903 }
 0x201   : > { %vm2737_vm0 = vcmp.eq.s32.totalorder %v908_v25, %v8429_v34  ;;  %vm2736_vm1 = vcmp.eq.s32.totalorder %v904_v26, %v8429_v34 }
 0x202   : > { %1148 = vbcast.lane.b32.xlu1 %v8705_v12, 344  ;;  %1144 = vbcast.lane.b32.xlu0 %v8705_v12, 336  ;;  %vm6577_vm5 = vmpackc.low %vm2737_vm0, %vm2736_vm1 }
 0x203   : > { %4644 = vmatmul.mubr.bf16.vlgmr.msra.gmra.mrb[4].mxu0 %v4604_v24 }
 0x204   : > { %v916_v27 = vpop.permute.xlu1 %915  ;;  %v912_v28 = vpop.permute.xlu0 %911 }
 0x205   : > { %vm2739_vm6 = vcmp.eq.s32.totalorder %v916_v27, %v8429_v34  ;;  %vm2738_vm7 = vcmp.eq.s32.totalorder %v912_v28, %v8429_v34  ;;  %v7666_v27 = vld [vmem:[%s8321_s6] sm:$0xff] }
 0x206   : > { %1156 = vbcast.lane.b32.xlu1 %v8705_v12, 360  ;;  %1152 = vbcast.lane.b32.xlu0 %v8705_v12, 352  ;;  %vm6579_vm11 = vmpackc.low %vm2739_vm6, %vm2738_vm7 }
 0x208   : > { %v8768_v30 = vpop.permute.xlu1 %923  ;;  %v920_v31 = vpop.permute.xlu0 %919 }
 0x209   : > { %vm2741_vm12 = vcmp.eq.s32.totalorder %v8768_v30, %v8429_v34  ;;  %vm2740_vm13 = vcmp.eq.s32.totalorder %v920_v31, %v8429_v34  ;;  %v8932_v30 = vsub.s32 7, %v8359_v2 }
 0x20a   : > { %1164 = vbcast.lane.b32.xlu1 %v8705_v12, 376  ;;  %1160 = vbcast.lane.b32.xlu0 %v8705_v12, 368  ;;  %vm6581_vm1 = vmpackc.low %vm2741_vm12, %vm2740_vm13  ;;  %v4456_v12 = vcombine.high %v8435_v35, %v8435_v35  ;;  %v8905_v35 = vsub.s32 6, %v8359_v2 }
 0x20b   : > { %v8950_v2 = vrot.slane %v7666_v27, %v8932_v30 }
 0x20c   : > { %v8776_v37 = vpop.permute.xlu1 %931  ;;  %v8778_v38 = vpop.permute.xlu0 %927  ;;  %v8896_v13 = vpack.i.b16 %v4456_v12, %v4456_v12  ;;  %v4487_v20 = vunpack.i.h.s16 %v4456_v12  ;;  %v8915_v22 = vrot.slane %v7665_v21, %v8905_v35  ;;  %v8929_v28 = vrot.slane %v7666_v27, %v8905_v35 }
 0x20e   : > { %1175 = vbcast.lane.b32.xlu1 %v8774_v36, 264  ;;  %1171 = vbcast.lane.b32.xlu0 %v8774_v36, 256  ;;  %v4710_v17 = vrot.slane %v8896_v13, %v8375_v8  ;;  %v8917_v23 = vpack.i.b16 %v4487_v20, %v4487_v20 }
 0x210   : > { %v8782_v39 = vpop.permute.xlu1 %939  ;;  %v8784_v41 = vpop.permute.xlu0 %935  ;;  %4745 = vmatprep.mubr.bf16.mxu0 %v4710_v17  ;;  %v4761_v26 = vrot.slane %v8917_v23, %v8375_v8 }
 0x212   : > { %1183 = vbcast.lane.b32.xlu1 %v8774_v36, 280  ;;  %1179 = vbcast.lane.b32.xlu0 %v8774_v36, 272 }
 0x214   : > { %v8789_v3 = vpop.permute.xlu1 %947  ;;  %v8791_v43 = vpop.permute.xlu0 %943 }
 0x216   : > { %1191 = vbcast.lane.b32.xlu1 %v8774_v36, 296  ;;  %1187 = vbcast.lane.b32.xlu0 %v8774_v36, 288 }
 0x218   : > { %v8799_v46 = vpop.permute.xlu1 %955  ;;  %v8801_v48 = vpop.permute.xlu0 %951 }
 0x21a   : > { %1199 = vbcast.lane.b32.xlu1 %v8774_v36, 312  ;;  %1195 = vbcast.lane.b32.xlu0 %v8774_v36, 304 }
 0x21c   : > { %v8805_v49 = vpop.permute.xlu1 %963  ;;  %v8807_v50 = vpop.permute.xlu0 %959 }
 0x21e   : > { %1207 = vbcast.lane.b32.xlu1 %v8774_v36, 328  ;;  %1203 = vbcast.lane.b32.xlu0 %v8774_v36, 320 }
 0x220   : > { %v975_v52 = vpop.permute.xlu1 %974  ;;  %v971_v53 = vpop.permute.xlu0 %970 }
 0x221   : > { %vm2753_vm2 = vcmp.eq.s32.totalorder %v975_v52, %v8429_v34  ;;  %vm2752_vm3 = vcmp.eq.s32.totalorder %v971_v53, %v8429_v34 }
 0x222   : > { %vm6593_vm4 = vmpackc.low %vm2753_vm2, %vm2752_vm3  ;;  %1242 = vbcast.lane.b32.xlu1 %v8813_v51, 264  ;;  %1238 = vbcast.lane.b32.xlu0 %v8813_v51, 256  ;;  %vm2743_vm2 = vcmp.eq.s32.totalorder %v8776_v37, %v8429_v34  ;;  %vm2742_vm3 = vcmp.eq.s32.totalorder %v8778_v38, %v8429_v34  ;;  %v8941_v37 = vrot.slane %v7665_v21, %v8932_v30 }
 0x223   : > { %7126 = vmatprep.subr.msk.bf16.mxu1 %vm6593_vm4, %v7991_v40  ;;  %vm6583_vm7 = vmpackc.low %vm2743_vm2, %vm2742_vm3 }
 0x224   : > { %v983_v6 = vpop.permute.xlu1 %982  ;;  %7127 = vmatpush3.bf16.msk.msra.mxu1 %vm6577_vm5, %v7991_v40  ;;  %v979_v54 = vpop.permute.xlu0 %978 }
 0x225   : > { %vm2755_vm8 = vcmp.eq.s32.totalorder %v983_v6, %v8429_v34  ;;  %vm2754_vm9 = vcmp.eq.s32.totalorder %v979_v54, %v8429_v34 }
 0x226   : > { %vm6595_vm10 = vmpackc.low %vm2755_vm8, %vm2754_vm9  ;;  %1250 = vbcast.lane.b32.xlu1 %v8813_v51, 280  ;;  %1246 = vbcast.lane.b32.xlu0 %v8813_v51, 272  ;;  %vm2745_vm8 = vcmp.eq.s32.totalorder %v8782_v39, %v8429_v34  ;;  %vm2744_vm9 = vcmp.eq.s32.totalorder %v8784_v41, %v8429_v34 }
 0x227   : > { %7128 = vmatprep.subr.msk.bf16.mxu1 %vm6595_vm10, %v7991_v40  ;;  %vm6585_vm13 = vmpackc.low %vm2745_vm8, %vm2744_vm9 }
 0x228   : > { %v991_v55 = vpop.permute.xlu1 %990  ;;  %7129 = vmatpush3.bf16.msk.msra.mxu1 %vm6579_vm11, %v7991_v40  ;;  %v987_v56 = vpop.permute.xlu0 %986 }
 0x229   : > { %vm2757_vm14 = vcmp.eq.s32.totalorder %v991_v55, %v8429_v34  ;;  %vm2756_vm15 = vcmp.eq.s32.totalorder %v987_v56, %v8429_v34 }
 0x22a   : > { %vm6597_vm0 = vmpackc.low %vm2757_vm14, %vm2756_vm15  ;;  %1258 = vbcast.lane.b32.xlu1 %v8813_v51, 296  ;;  %1254 = vbcast.lane.b32.xlu0 %v8813_v51, 288  ;;  %vm2747_vm14 = vcmp.eq.s32.totalorder %v8789_v3, %v8429_v34  ;;  %vm2746_vm15 = vcmp.eq.s32.totalorder %v8791_v43, %v8429_v34 }
 0x22b   : > { %7130 = vmatprep.subr.msk.bf16.mxu1 %vm6597_vm0, %v7991_v40  ;;  %vm6587_vm3 = vmpackc.low %vm2747_vm14, %vm2746_vm15 }
 0x22c   : > { %v999_v57 = vpop.permute.xlu1 %998  ;;  %7131 = vmatpush3.bf16.msk.msra.mxu1 %vm6581_vm1, %v7991_v40  ;;  %v995_v58 = vpop.permute.xlu0 %994 }
 0x22d   : > { %vm2759_vm4 = vcmp.eq.s32.totalorder %v999_v57, %v8429_v34  ;;  %vm2758_vm5 = vcmp.eq.s32.totalorder %v995_v58, %v8429_v34 }
 0x22e   : > { %vm6599_vm6 = vmpackc.low %vm2759_vm4, %vm2758_vm5  ;;  %1266 = vbcast.lane.b32.xlu1 %v8813_v51, 312  ;;  %1262 = vbcast.lane.b32.xlu0 %v8813_v51, 304  ;;  %vm2749_vm4 = vcmp.eq.s32.totalorder %v8799_v46, %v8429_v34  ;;  %vm2748_vm5 = vcmp.eq.s32.totalorder %v8801_v48, %v8429_v34 }
 0x22f   : > { %7132 = vmatprep.subr.msk.bf16.mxu1 %vm6599_vm6, %v7991_v40  ;;  %vm6589_vm9 = vmpackc.low %vm2749_vm4, %vm2748_vm5 }
 0x230   : > { %v1007_v59 = vpop.permute.xlu1 %1006  ;;  %7133 = vmatpush3.bf16.msk.msra.mxu1 %vm6583_vm7, %v7991_v40  ;;  %v1003_v60 = vpop.permute.xlu0 %1002 }
 0x231   : > { %vm2761_vm10 = vcmp.eq.s32.totalorder %v1007_v59, %v8429_v34  ;;  %vm2760_vm11 = vcmp.eq.s32.totalorder %v1003_v60, %v8429_v34  ;;  %v4706_v60 = vrot.slane %v8896_v13, %v8365_v4 }
 0x232   : > { %vm6601_vm12 = vmpackc.low %vm2761_vm10, %vm2760_vm11  ;;  %1274 = vbcast.lane.b32.xlu1 %v8813_v51, 328  ;;  %1270 = vbcast.lane.b32.xlu0 %v8813_v51, 320  ;;  %vm2751_vm10 = vcmp.eq.s32.totalorder %v8805_v49, %v8429_v34  ;;  %vm2750_vm11 = vcmp.eq.s32.totalorder %v8807_v50, %v8429_v34 }
 0x233   : > { %7134 = vmatprep.subr.msk.bf16.mxu1 %vm6601_vm12, %v7991_v40  ;;  %vm6591_vm15 = vmpackc.low %vm2751_vm10, %vm2750_vm11 }
 0x234   : > { %v1015_v62 = vpop.permute.xlu1 %1014  ;;  %7135 = vmatpush3.bf16.msk.msra.mxu1 %vm6585_vm13, %v7991_v40  ;;  %v1011_v0 = vpop.permute.xlu0 %1010 }
 0x235   : > { %vm2763_vm0 = vcmp.eq.s32.totalorder %v1015_v62, %v8429_v34  ;;  %vm2762_vm1 = vcmp.eq.s32.totalorder %v1011_v0, %v8429_v34 }
 0x236   : > { %vm6603_vm2 = vmpackc.low %vm2763_vm0, %vm2762_vm1  ;;  %1282 = vbcast.lane.b32.xlu1 %v8813_v51, 344  ;;  %1278 = vbcast.lane.b32.xlu0 %v8813_v51, 336 }
 0x237   : > { %7136 = vmatprep.subr.msk.bf16.mxu1 %vm6603_vm2, %v7991_v40 }
 0x238   : > { %v1023_v1 = vpop.permute.xlu1 %1022  ;;  %7137 = vmatpush3.bf16.msk.msra.mxu1 %vm6587_vm3, %v7991_v40  ;;  %v1019_v5 = vpop.permute.xlu0 %1018 }
 0x239   : > { %vm2765_vm6 = vcmp.eq.s32.totalorder %v1023_v1, %v8429_v34  ;;  %vm2764_vm7 = vcmp.eq.s32.totalorder %v1019_v5, %v8429_v34 }
 0x23a   : > { %vm6605_vm8 = vmpackc.low %vm2765_vm6, %vm2764_vm7  ;;  %1215 = vbcast.lane.b32.xlu1 %v8774_v36, 344  ;;  %1211 = vbcast.lane.b32.xlu0 %v8774_v36, 336 }
 0x23b   : > { %7138 = vmatprep.subr.msk.bf16.mxu1 %vm6605_vm8, %v7991_v40 }
 0x23c   : > { %v1031_v33 = vpop.permute.xlu1 %1030  ;;  %7139 = vmatpush3.bf16.msk.msra.mxu1 %vm6589_vm9, %v7991_v40  ;;  %v1027_v7 = vpop.permute.xlu0 %1026 }
 0x23d   : > { %vm2767_vm12 = vcmp.eq.s32.totalorder %v1031_v33, %v8429_v34  ;;  %vm2766_vm13 = vcmp.eq.s32.totalorder %v1027_v7, %v8429_v34 }
 0x23e   : > { %vm6607_vm14 = vmpackc.low %vm2767_vm12, %vm2766_vm13  ;;  %1290 = vbcast.lane.b32.xlu1 %v8813_v51, 360  ;;  %1286 = vbcast.lane.b32.xlu0 %v8813_v51, 352 }
 0x23f   : > { %7140 = vmatprep.subr.msk.bf16.mxu1 %vm6607_vm14, %v7991_v40 }
 0x240   : > { %v1042_v10 = vpop.permute.xlu1 %1041  ;;  %7141 = vmatpush3.bf16.msk.msra.mxu1 %vm6591_vm15, %v7991_v40  ;;  %v1038_v11 = vpop.permute.xlu0 %1037 }
 0x241   : > { %vm2769_vm0 = vcmp.eq.s32.totalorder %v1042_v10, %v8429_v34  ;;  %vm2768_vm1 = vcmp.eq.s32.totalorder %v1038_v11, %v8429_v34 }
 0x242   : > { %1223 = vbcast.lane.b32.xlu1 %v8774_v36, 360  ;;  %1219 = vbcast.lane.b32.xlu0 %v8774_v36, 352  ;;  %vm6610_vm5 = vmpackc.low %vm2769_vm0, %vm2768_vm1 }
 0x243   : > { %4695 = vmatmul.mubr.bf16.vlgmr.msra.gmra.mrb[4].mxu1 %v4655_v9 }
 0x244   : > { %v8898_v14 = vpop.permute.xlu1 %1049  ;;  %v1046_v16 = vpop.permute.xlu0 %1045  ;;  %4796 = vmatprep.mubr.bf16.mxu1 %v4761_v26 }
 0x245   : > { %vm2771_vm6 = vcmp.eq.s32.totalorder %v8898_v14, %v8429_v34  ;;  %vm2770_vm7 = vcmp.eq.s32.totalorder %v1046_v16, %v8429_v34 }
 0x246   : > { %1298 = vbcast.lane.b32.xlu1 %v8813_v51, 376  ;;  %1294 = vbcast.lane.b32.xlu0 %v8813_v51, 368  ;;  %vm6612_vm11 = vmpackc.low %vm2771_vm6, %vm2770_vm7 }
 0x248   : > { %v8907_v18 = vpop.permute.xlu1 %1057  ;;  %v8909_v19 = vpop.permute.xlu0 %1053 }
 0x249   : > { %vm2773_vm12 = vcmp.eq.s32.totalorder %v8907_v18, %v8429_v34  ;;  %vm2772_vm13 = vcmp.eq.s32.totalorder %v8909_v19, %v8429_v34 }
 0x24a   : > { %1231 = vbcast.lane.b32.xlu1 %v8774_v36, 376  ;;  %1227 = vbcast.lane.b32.xlu0 %v8774_v36, 368  ;;  %vm6614_vm1 = vmpackc.low %vm2773_vm12, %vm2772_vm13 }
 0x24c   : > { %v8919_v24 = vpop.permute.xlu1 %1065  ;;  %v8921_v25 = vpop.permute.xlu0 %1061 }
 0x24e   : > { %1376 = vbcast.lane.b32.xlu1 %v8915_v22, 264  ;;  %1372 = vbcast.lane.b32.xlu0 %v8915_v22, 256 }
 0x250   : > { %v8934_v31 = vpop.permute.xlu1 %1073  ;;  %v8936_v36 = vpop.permute.xlu0 %1069 }
 0x252   : > { %1309 = vbcast.lane.b32.xlu1 %v8929_v28, 264  ;;  %1305 = vbcast.lane.b32.xlu0 %v8929_v28, 256 }
 0x254   : > { %v8943_v38 = vpop.permute.xlu1 %1081  ;;  %v8945_v39 = vpop.permute.xlu0 %1077 }
 0x256   : > { %1510 = vbcast.lane.b32.xlu1 %v8941_v37, 264  ;;  %1506 = vbcast.lane.b32.xlu0 %v8941_v37, 256 }
 0x258   : > { %v8952_v41 = vpop.permute.xlu1 %1089  ;;  %v8954_v42 = vpop.permute.xlu0 %1085 }
 0x25a   : > { %1443 = vbcast.lane.b32.xlu1 %v8950_v2, 264  ;;  %1439 = vbcast.lane.b32.xlu0 %v8950_v2, 256 }
 0x25c   : > { %v8958_v3 = vpop.permute.xlu1 %1097  ;;  %v8960_v43 = vpop.permute.xlu0 %1093 }
 0x25e   : > { %1384 = vbcast.lane.b32.xlu1 %v8915_v22, 280  ;;  %1380 = vbcast.lane.b32.xlu0 %v8915_v22, 272 }
 0x260   : > { %v1109_v44 = vpop.permute.xlu1 %1108  ;;  %v1105_v45 = vpop.permute.xlu0 %1104 }
 0x261   : > { %vm2785_vm2 = vcmp.eq.s32.totalorder %v1109_v44, %v8429_v34  ;;  %vm2784_vm3 = vcmp.eq.s32.totalorder %v1105_v45, %v8429_v34 }
 0x262   : > { %vm6626_vm4 = vmpackc.low %vm2785_vm2, %vm2784_vm3  ;;  %1317 = vbcast.lane.b32.xlu1 %v8929_v28, 280  ;;  %1313 = vbcast.lane.b32.xlu0 %v8929_v28, 272  ;;  %vm2775_vm2 = vcmp.eq.s32.totalorder %v8919_v24, %v8429_v34  ;;  %vm2774_vm3 = vcmp.eq.s32.totalorder %v8921_v25, %v8429_v34 }
 0x263   : > { %7148 = vmatprep.subr.msk.bf16.mxu0 %vm6626_vm4, %v7991_v40  ;;  %vm6616_vm7 = vmpackc.low %vm2775_vm2, %vm2774_vm3 }
 0x264   : > { %v1117_v46 = vpop.permute.xlu1 %1116  ;;  %7149 = vmatpush3.bf16.msk.msra.mxu0 %vm6610_vm5, %v7991_v40  ;;  %v1113_v48 = vpop.permute.xlu0 %1112 }
 0x265   : > { %vm2787_vm8 = vcmp.eq.s32.totalorder %v1117_v46, %v8429_v34  ;;  %vm2786_vm9 = vcmp.eq.s32.totalorder %v1113_v48, %v8429_v34  ;;  %v4757_v46 = vrot.slane %v8917_v23, %v8365_v4 }
 0x266   : > { %vm6628_vm10 = vmpackc.low %vm2787_vm8, %vm2786_vm9  ;;  %1518 = vbcast.lane.b32.xlu1 %v8941_v37, 280  ;;  %1514 = vbcast.lane.b32.xlu0 %v8941_v37, 272  ;;  %vm2777_vm8 = vcmp.eq.s32.totalorder %v8934_v31, %v8429_v34  ;;  %vm2776_vm9 = vcmp.eq.s32.totalorder %v8936_v36, %v8429_v34 }
 0x267   : > { %7150 = vmatprep.subr.msk.bf16.mxu0 %vm6628_vm10, %v7991_v40  ;;  %vm6618_vm13 = vmpackc.low %vm2777_vm8, %vm2776_vm9 }
 0x268   : > { %v1125_v49 = vpop.permute.xlu1 %1124  ;;  %7151 = vmatpush3.bf16.msk.msra.mxu0 %vm6612_vm11, %v7991_v40  ;;  %v1121_v50 = vpop.permute.xlu0 %1120 }
 0x269   : > { %vm2789_vm14 = vcmp.eq.s32.totalorder %v1125_v49, %v8429_v34  ;;  %vm2788_vm15 = vcmp.eq.s32.totalorder %v1121_v50, %v8429_v34  ;;  %v4457_v50 = vcombine.high %v8677_v63, %v8677_v63 }
 0x26a   : > { %vm6630_vm0 = vmpackc.low %vm2789_vm14, %vm2788_vm15  ;;  %1451 = vbcast.lane.b32.xlu1 %v8950_v2, 280  ;;  %1447 = vbcast.lane.b32.xlu0 %v8950_v2, 272  ;;  %vm2779_vm14 = vcmp.eq.s32.totalorder %v8943_v38, %v8429_v34  ;;  %vm2778_vm15 = vcmp.eq.s32.totalorder %v8945_v39, %v8429_v34 }
 0x26b   : > { %7152 = vmatprep.subr.msk.bf16.mxu0 %vm6630_vm0, %v7991_v40  ;;  %vm6620_vm3 = vmpackc.low %vm2779_vm14, %vm2778_vm15 }
 0x26c   : > { %v1133_v51 = vpop.permute.xlu1 %1132  ;;  %7153 = vmatpush3.bf16.msk.msra.mxu0 %vm6614_vm1, %v7991_v40  ;;  %v1129_v52 = vpop.permute.xlu0 %1128 }
 0x26d   : > { %vm2791_vm4 = vcmp.eq.s32.totalorder %v1133_v51, %v8429_v34  ;;  %vm2790_vm5 = vcmp.eq.s32.totalorder %v1129_v52, %v8429_v34 }
 0x26e   : > { %vm6632_vm6 = vmpackc.low %vm2791_vm4, %vm2790_vm5  ;;  %1392 = vbcast.lane.b32.xlu1 %v8915_v22, 296  ;;  %1388 = vbcast.lane.b32.xlu0 %v8915_v22, 288  ;;  %vm2781_vm4 = vcmp.eq.s32.totalorder %v8952_v41, %v8429_v34  ;;  %vm2780_vm5 = vcmp.eq.s32.totalorder %v8954_v42, %v8429_v34 }
 0x26f   : > { %7154 = vmatprep.subr.msk.bf16.mxu0 %vm6632_vm6, %v7991_v40  ;;  %vm6622_vm9 = vmpackc.low %vm2781_vm4, %vm2780_vm5 }
 0x270   : > { %v1141_v53 = vpop.permute.xlu1 %1140  ;;  %7155 = vmatpush3.bf16.msk.msra.mxu0 %vm6616_vm7, %v7991_v40  ;;  %v1137_v6 = vpop.permute.xlu0 %1136 }
 0x271   : > { %vm2793_vm10 = vcmp.eq.s32.totalorder %v1141_v53, %v8429_v34  ;;  %vm2792_vm11 = vcmp.eq.s32.totalorder %v1137_v6, %v8429_v34  ;;  %v4489_v6 = vunpack.i.h.s16 %v4457_v50 }
 0x272   : > { %vm6634_vm12 = vmpackc.low %vm2793_vm10, %vm2792_vm11  ;;  %1325 = vbcast.lane.b32.xlu1 %v8929_v28, 296  ;;  %1321 = vbcast.lane.b32.xlu0 %v8929_v28, 288  ;;  %vm2783_vm10 = vcmp.eq.s32.totalorder %v8958_v3, %v8429_v34  ;;  %vm2782_vm11 = vcmp.eq.s32.totalorder %v8960_v43, %v8429_v34 }
 0x273   : > { %7156 = vmatprep.subr.msk.bf16.mxu0 %vm6634_vm12, %v7991_v40  ;;  %vm6624_vm15 = vmpackc.low %vm2783_vm10, %vm2782_vm11 }
 0x274   : > { %v1149_v54 = vpop.permute.xlu1 %1148  ;;  %7157 = vmatpush3.bf16.msk.msra.mxu0 %vm6618_vm13, %v7991_v40  ;;  %v1145_v55 = vpop.permute.xlu0 %1144 }
 0x275   : > { %vm2795_vm0 = vcmp.eq.s32.totalorder %v1149_v54, %v8429_v34  ;;  %vm2794_vm1 = vcmp.eq.s32.totalorder %v1145_v55, %v8429_v34  ;;  %v9154_v54 = vld [vmem:[%s8321_s6 + $0x10] sm:$0xff]  ;;  %v9156_v55 = vpack.i.b16 %v4489_v6, %v4489_v6 }
 0x276   : > { %vm6636_vm2 = vmpackc.low %vm2795_vm0, %vm2794_vm1  ;;  %1526 = vbcast.lane.b32.xlu1 %v8941_v37, 296  ;;  %1522 = vbcast.lane.b32.xlu0 %v8941_v37, 288 }
 0x277   : > { %7158 = vmatprep.subr.msk.bf16.mxu0 %vm6636_vm2, %v7991_v40 }
 0x278   : > { %v1157_v56 = vpop.permute.xlu1 %1156  ;;  %7159 = vmatpush3.bf16.msk.msra.mxu0 %vm6620_vm3, %v7991_v40  ;;  %v1153_v57 = vpop.permute.xlu0 %1152 }
 0x279   : > { %vm2797_vm6 = vcmp.eq.s32.totalorder %v1157_v56, %v8429_v34  ;;  %vm2796_vm7 = vcmp.eq.s32.totalorder %v1153_v57, %v8429_v34 }
 0x27a   : > { %vm6638_vm8 = vmpackc.low %vm2797_vm6, %vm2796_vm7  ;;  %1459 = vbcast.lane.b32.xlu1 %v8950_v2, 296  ;;  %1455 = vbcast.lane.b32.xlu0 %v8950_v2, 288 }
 0x27b   : > { %7160 = vmatprep.subr.msk.bf16.mxu0 %vm6638_vm8, %v7991_v40 }
 0x27c   : > { %v1165_v58 = vpop.permute.xlu1 %1164  ;;  %7161 = vmatpush3.bf16.msk.msra.mxu0 %vm6622_vm9, %v7991_v40  ;;  %v1161_v59 = vpop.permute.xlu0 %1160 }
 0x27d   : > { %vm2799_vm12 = vcmp.eq.s32.totalorder %v1165_v58, %v8429_v34  ;;  %vm2798_vm13 = vcmp.eq.s32.totalorder %v1161_v59, %v8429_v34  ;;  %v4863_v58 = vrot.slane %v9156_v55, %v8375_v8 }
 0x27e   : > { %vm6640_vm14 = vmpackc.low %vm2799_vm12, %vm2798_vm13  ;;  %1400 = vbcast.lane.b32.xlu1 %v8915_v22, 312  ;;  %1396 = vbcast.lane.b32.xlu0 %v8915_v22, 304 }
 0x27f   : > { %7162 = vmatprep.subr.msk.bf16.mxu0 %vm6640_vm14, %v7991_v40 }
 0x280   : > { %v1176_v62 = vpop.permute.xlu1 %1175  ;;  %7163 = vmatpush3.bf16.msk.msra.mxu0 %vm6624_vm15, %v7991_v40  ;;  %v1172_v0 = vpop.permute.xlu0 %1171 }
 0x281   : > { %vm2801_vm0 = vcmp.eq.s32.totalorder %v1176_v62, %v8429_v34  ;;  %vm2800_vm1 = vcmp.eq.s32.totalorder %v1172_v0, %v8429_v34 }
 0x282   : > { %1333 = vbcast.lane.b32.xlu1 %v8929_v28, 312  ;;  %1329 = vbcast.lane.b32.xlu0 %v8929_v28, 304  ;;  %vm6642_vm5 = vmpackc.low %vm2801_vm0, %vm2800_vm1 }
 0x283   : > { %4746 = vmatmul.mubr.bf16.vlgmr.msra.gmra.mrb[8].mxu0 %v4706_v60 }
 0x284   : > { %v1184_v1 = vpop.permute.xlu1 %1183  ;;  %v1180_v5 = vpop.permute.xlu0 %1179 }
 0x285   : > { %vm2803_vm6 = vcmp.eq.s32.totalorder %v1184_v1, %v8429_v34  ;;  %vm2802_vm7 = vcmp.eq.s32.totalorder %v1180_v5, %v8429_v34  ;;  %v9184_v5 = vrot.slane %v9154_v54, %v8375_v8 }
 0x286   : > { %1534 = vbcast.lane.b32.xlu1 %v8941_v37, 312  ;;  %1530 = vbcast.lane.b32.xlu0 %v8941_v37, 304  ;;  %vm6644_vm11 = vmpackc.low %vm2803_vm6, %vm2802_vm7 }
 0x288   : > { %v1192_v33 = vpop.permute.xlu1 %1191  ;;  %v1188_v7 = vpop.permute.xlu0 %1187 }
 0x289   : > { %vm2805_vm12 = vcmp.eq.s32.totalorder %v1192_v33, %v8429_v34  ;;  %vm2804_vm13 = vcmp.eq.s32.totalorder %v1188_v7, %v8429_v34 }
 0x28a   : > { %1467 = vbcast.lane.b32.xlu1 %v8950_v2, 312  ;;  %1463 = vbcast.lane.b32.xlu0 %v8950_v2, 304  ;;  %vm6646_vm1 = vmpackc.low %vm2805_vm12, %vm2804_vm13 }
 0x28c   : > { %v1200_v9 = vpop.permute.xlu1 %1199  ;;  %v1196_v10 = vpop.permute.xlu0 %1195 }
 0x28e   : > { %1408 = vbcast.lane.b32.xlu1 %v8915_v22, 328  ;;  %1404 = vbcast.lane.b32.xlu0 %v8915_v22, 320 }
 0x290   : > { %v1208_v11 = vpop.permute.xlu1 %1207  ;;  %v1204_v12 = vpop.permute.xlu0 %1203 }
 0x292   : > { %1341 = vbcast.lane.b32.xlu1 %v8929_v28, 328  ;;  %1337 = vbcast.lane.b32.xlu0 %v8929_v28, 320 }
 0x294   : > { %v1243_v13 = vpop.permute.xlu1 %1242  ;;  %v1239_v14 = vpop.permute.xlu0 %1238 }
 0x295   : > { %vm2817_vm2 = vcmp.eq.s32.totalorder %v1243_v13, %v8429_v34  ;;  %vm2816_vm3 = vcmp.eq.s32.totalorder %v1239_v14, %v8429_v34 }
 0x296   : > { %vm6658_vm4 = vmpackc.low %vm2817_vm2, %vm2816_vm3  ;;  %1542 = vbcast.lane.b32.xlu1 %v8941_v37, 328  ;;  %1538 = vbcast.lane.b32.xlu0 %v8941_v37, 320  ;;  %vm2807_vm2 = vcmp.eq.s32.totalorder %v1200_v9, %v8429_v34  ;;  %vm2806_vm3 = vcmp.eq.s32.totalorder %v1196_v10, %v8429_v34 }
 0x297   : > { %7170 = vmatprep.subr.msk.bf16.mxu1 %vm6658_vm4, %v7991_v40  ;;  %vm6648_vm7 = vmpackc.low %vm2807_vm2, %vm2806_vm3 }
 0x298   : > { %v1251_v16 = vpop.permute.xlu1 %1250  ;;  %7171 = vmatpush3.bf16.msk.msra.mxu1 %vm6642_vm5, %v7991_v40  ;;  %v1247_v17 = vpop.permute.xlu0 %1246 }
 0x299   : > { %vm2819_vm8 = vcmp.eq.s32.totalorder %v1251_v16, %v8429_v34  ;;  %vm2818_vm9 = vcmp.eq.s32.totalorder %v1247_v17, %v8429_v34 }
 0x29a   : > { %vm6660_vm10 = vmpackc.low %vm2819_vm8, %vm2818_vm9  ;;  %1475 = vbcast.lane.b32.xlu1 %v8950_v2, 328  ;;  %1471 = vbcast.lane.b32.xlu0 %v8950_v2, 320  ;;  %vm2809_vm8 = vcmp.eq.s32.totalorder %v1208_v11, %v8429_v34  ;;  %vm2808_vm9 = vcmp.eq.s32.totalorder %v1204_v12, %v8429_v34 }
 0x29b   : > { %7172 = vmatprep.subr.msk.bf16.mxu1 %vm6660_vm10, %v7991_v40  ;;  %vm6650_vm13 = vmpackc.low %vm2809_vm8, %vm2808_vm9 }
 0x29c   : > { %v1259_v18 = vpop.permute.xlu1 %1258  ;;  %7173 = vmatpush3.bf16.msk.msra.mxu1 %vm6644_vm11, %v7991_v40  ;;  %v1255_v19 = vpop.permute.xlu0 %1254 }
 0x29d   : > { %vm2821_vm14 = vcmp.eq.s32.totalorder %v1259_v18, %v8429_v34  ;;  %vm2820_vm15 = vcmp.eq.s32.totalorder %v1255_v19, %v8429_v34 }
 0x29e   : > { %vm6662_vm0 = vmpackc.low %vm2821_vm14, %vm2820_vm15  ;;  %1416 = vbcast.lane.b32.xlu1 %v8915_v22, 344  ;;  %1412 = vbcast.lane.b32.xlu0 %v8915_v22, 336 }
 0x29f   : > { %7174 = vmatprep.subr.msk.bf16.mxu1 %vm6662_vm0, %v7991_v40 }
 0x2a0   : > { %v1267_v20 = vpop.permute.xlu1 %1266  ;;  %7175 = vmatpush3.bf16.msk.msra.mxu1 %vm6646_vm1, %v7991_v40  ;;  %v1263_v21 = vpop.permute.xlu0 %1262 }
 0x2a1   : > { %vm2823_vm4 = vcmp.eq.s32.totalorder %v1267_v20, %v8429_v34  ;;  %vm2822_vm5 = vcmp.eq.s32.totalorder %v1263_v21, %v8429_v34 }
 0x2a2   : > { %vm6664_vm6 = vmpackc.low %vm2823_vm4, %vm2822_vm5  ;;  %1349 = vbcast.lane.b32.xlu1 %v8929_v28, 344  ;;  %1345 = vbcast.lane.b32.xlu0 %v8929_v28, 336 }
 0x2a3   : > { %7176 = vmatprep.subr.msk.bf16.mxu1 %vm6664_vm6, %v7991_v40 }
 0x2a4   : > { %v1275_v24 = vpop.permute.xlu1 %1274  ;;  %7177 = vmatpush3.bf16.msk.msra.mxu1 %vm6648_vm7, %v7991_v40  ;;  %v1271_v25 = vpop.permute.xlu0 %1270 }
 0x2a5   : > { %vm2825_vm10 = vcmp.eq.s32.totalorder %v1275_v24, %v8429_v34  ;;  %vm2824_vm11 = vcmp.eq.s32.totalorder %v1271_v25, %v8429_v34 }
 0x2a6   : > { %vm6666_vm12 = vmpackc.low %vm2825_vm10, %vm2824_vm11  ;;  %1550 = vbcast.lane.b32.xlu1 %v8941_v37, 344  ;;  %1546 = vbcast.lane.b32.xlu0 %v8941_v37, 336 }
 0x2a7   : > { %7178 = vmatprep.subr.msk.bf16.mxu1 %vm6666_vm12, %v7991_v40 }
 0x2a8   : > { %v1283_v26 = vpop.permute.xlu1 %1282  ;;  %7179 = vmatpush3.bf16.msk.msra.mxu1 %vm6650_vm13, %v7991_v40  ;;  %v1279_v27 = vpop.permute.xlu0 %1278 }
 0x2a9   : > { %vm2827_vm14 = vcmp.eq.s32.totalorder %v1283_v26, %v8429_v34  ;;  %vm2826_vm15 = vcmp.eq.s32.totalorder %v1279_v27, %v8429_v34 }
 0x2aa   : > { %vm6668_vm0 = vmpackc.low %vm2827_vm14, %vm2826_vm15  ;;  %1483 = vbcast.lane.b32.xlu1 %v8950_v2, 344  ;;  %1479 = vbcast.lane.b32.xlu0 %v8950_v2, 336 }
 0x2ab   : > { %7180 = vmatprep.subr.msk.bf16.mxu1 %vm6668_vm0, %v7991_v40 }
 0x2ac   : > { %v1216_v31 = vpop.permute.xlu1 %1215  ;;  %v1212_v36 = vpop.permute.xlu0 %1211 }
 0x2ad   : > { %vm2811_vm1 = vcmp.eq.s32.totalorder %v1216_v31, %v8429_v34  ;;  %vm2810_vm2 = vcmp.eq.s32.totalorder %v1212_v36, %v8429_v34 }
 0x2ae   : > { %vm6652_vm3 = vmpackc.low %vm2811_vm1, %vm2810_vm2  ;;  %1424 = vbcast.lane.b32.xlu1 %v8915_v22, 360  ;;  %1420 = vbcast.lane.b32.xlu0 %v8915_v22, 352 }
 0x2af   : > { %7181 = vmatpush3.bf16.msk.msra.mxu1 %vm6652_vm3, %v7991_v40 }
 0x2b0   : > { %v1291_v38 = vpop.permute.xlu1 %1290  ;;  %v1287_v39 = vpop.permute.xlu0 %1286 }
 0x2b1   : > { %vm2829_vm4 = vcmp.eq.s32.totalorder %v1291_v38, %v8429_v34  ;;  %vm2828_vm5 = vcmp.eq.s32.totalorder %v1287_v39, %v8429_v34 }
 0x2b2   : > { %vm6670_vm6 = vmpackc.low %vm2829_vm4, %vm2828_vm5  ;;  %1357 = vbcast.lane.b32.xlu1 %v8929_v28, 360  ;;  %1353 = vbcast.lane.b32.xlu0 %v8929_v28, 352 }
 0x2b3   : > { %7182 = vmatprep.subr.msk.bf16.mxu1 %vm6670_vm6, %v7991_v40 }
 0x2b4   : > { %v1224_v41 = vpop.permute.xlu1 %1223  ;;  %v1220_v42 = vpop.permute.xlu0 %1219 }
 0x2b5   : > { %vm2813_vm7 = vcmp.eq.s32.totalorder %v1224_v41, %v8429_v34  ;;  %vm2812_vm8 = vcmp.eq.s32.totalorder %v1220_v42, %v8429_v34 }
 0x2b6   : > { %vm6654_vm9 = vmpackc.low %vm2813_vm7, %vm2812_vm8  ;;  %1558 = vbcast.lane.b32.xlu1 %v8941_v37, 360  ;;  %1554 = vbcast.lane.b32.xlu0 %v8941_v37, 352 }
 0x2b7   : > { %7183 = vmatpush3.bf16.msk.msra.mxu1 %vm6654_vm9, %v7991_v40 }
 0x2b8   : > { %v1299_v3 = vpop.permute.xlu1 %1298  ;;  %v1295_v43 = vpop.permute.xlu0 %1294 }
 0x2b9   : > { %vm2831_vm10 = vcmp.eq.s32.totalorder %v1299_v3, %v8429_v34  ;;  %vm2830_vm11 = vcmp.eq.s32.totalorder %v1295_v43, %v8429_v34 }
 0x2ba   : > { %vm6672_vm12 = vmpackc.low %vm2831_vm10, %vm2830_vm11  ;;  %1491 = vbcast.lane.b32.xlu1 %v8950_v2, 360  ;;  %1487 = vbcast.lane.b32.xlu0 %v8950_v2, 352 }
 0x2bb   : > { %7184 = vmatprep.subr.msk.bf16.mxu1 %vm6672_vm12, %v7991_v40 }
 0x2bc   : > { %v1232_v44 = vpop.permute.xlu1 %1231  ;;  %v1228_v45 = vpop.permute.xlu0 %1227 }
 0x2bd   : > { %vm2815_vm13 = vcmp.eq.s32.totalorder %v1232_v44, %v8429_v34  ;;  %vm2814_vm14 = vcmp.eq.s32.totalorder %v1228_v45, %v8429_v34 }
 0x2be   : > { %vm6656_vm15 = vmpackc.low %vm2815_vm13, %vm2814_vm14  ;;  %1432 = vbcast.lane.b32.xlu1 %v8915_v22, 376  ;;  %1428 = vbcast.lane.b32.xlu0 %v8915_v22, 368  ;;  %v9132_v22 = vpack.i.b16 %v4457_v50, %v4457_v50 }
 0x2bf   : > { %7185 = vmatpush3.bf16.msk.msra.mxu1 %vm6656_vm15, %v7991_v40 }
 0x2c0   : > { %v1377_v48 = vpop.permute.xlu1 %1376  ;;  %v1373_v49 = vpop.permute.xlu0 %1372  ;;  %v4812_v63 = vrot.slane %v9132_v22, %v8375_v8 }
 0x2c1   : > { %vm2849_vm0 = vcmp.eq.s32.totalorder %v1377_v48, %v8429_v34  ;;  %vm2848_vm1 = vcmp.eq.s32.totalorder %v1373_v49, %v8429_v34 }
 0x2c2   : > { %vm6691_vm2 = vmpackc.low %vm2849_vm0, %vm2848_vm1  ;;  %1365 = vbcast.lane.b32.xlu1 %v8929_v28, 376  ;;  %1361 = vbcast.lane.b32.xlu0 %v8929_v28, 368  ;;  %v9142_v28 = vld [vmem:[%s8321_s6 + $0x18] sm:$0xff] }
 0x2c3   : > { %7192 = vmatprep.subr.msk.bf16.mxu0 %vm6691_vm2, %v7991_v40  ;;  %4797 = vmatmul.mubr.bf16.vlgmr.msra.gmra.mrb[8].mxu1 %v4757_v46  ;;  %v9175_v62 = vrot.slane %v9142_v28, %v8375_v8 }
 0x2c4   : > { %v1310_v23 = vpop.permute.xlu1 %1309  ;;  %v1306_v51 = vpop.permute.xlu0 %1305  ;;  %4847 = vmatprep.mubr.bf16.mxu0 %v4812_v63  ;;  %4898 = vmatprep.mubr.bf16.mxu1 %v4863_v58 }
 0x2c5   : > { %vm2833_vm3 = vcmp.eq.s32.totalorder %v1310_v23, %v8429_v34  ;;  %vm2832_vm4 = vcmp.eq.s32.totalorder %v1306_v51, %v8429_v34 }
 0x2c6   : > { %vm6675_vm5 = vmpackc.low %vm2833_vm3, %vm2832_vm4  ;;  %1566 = vbcast.lane.b32.xlu1 %v8941_v37, 376  ;;  %1562 = vbcast.lane.b32.xlu0 %v8941_v37, 368  ;;  %v9150_v37 = vrot.slane %v9142_v28, %v8365_v4 }
 0x2c7   : > { %7193 = vmatpush3.bf16.msk.msra.mxu0 %vm6675_vm5, %v7991_v40 }
 0x2c8   : > { %v1511_v52 = vpop.permute.xlu1 %1510  ;;  %v1507_v53 = vpop.permute.xlu0 %1506 }
 0x2c9   : > { %vm2881_vm6 = vcmp.eq.s32.totalorder %v1511_v52, %v8429_v34  ;;  %vm2880_vm7 = vcmp.eq.s32.totalorder %v1507_v53, %v8429_v34 }
 0x2ca   : > { %vm6723_vm8 = vmpackc.low %vm2881_vm6, %vm2880_vm7  ;;  %1499 = vbcast.lane.b32.xlu1 %v8950_v2, 376  ;;  %1495 = vbcast.lane.b32.xlu0 %v8950_v2, 368  ;;  %v9166_v2 = vrot.slane %v9154_v54, %v8365_v4 }
 0x2cb   : > { %7214 = vmatprep.subr.msk.bf16.mxu1 %vm6723_vm8, %v7991_v40 }
 0x2cc   : > { %v1444_v56 = vpop.permute.xlu1 %1443  ;;  %v1440_v57 = vpop.permute.xlu0 %1439 }
 0x2cd   : > { %vm2865_vm9 = vcmp.eq.s32.totalorder %v1444_v56, %v8429_v34  ;;  %vm2864_vm10 = vcmp.eq.s32.totalorder %v1440_v57, %v8429_v34 }
 0x2ce   : > { %vm6707_vm11 = vmpackc.low %vm2865_vm9, %vm2864_vm10  ;;  %1644 = vbcast.lane.b32.xlu1 %v9150_v37, 264  ;;  %1640 = vbcast.lane.b32.xlu0 %v9150_v37, 256 }
 0x2cf   : > { %7215 = vmatpush3.bf16.msk.msra.mxu1 %vm6707_vm11, %v7991_v40 }
 0x2d0   : > { %v1385_v59 = vpop.permute.xlu1 %1384  ;;  %v1381_v60 = vpop.permute.xlu0 %1380 }
 0x2d1   : > { %vm2851_vm12 = vcmp.eq.s32.totalorder %v1385_v59, %v8429_v34  ;;  %vm2850_vm13 = vcmp.eq.s32.totalorder %v1381_v60, %v8429_v34 }
 0x2d2   : > { %vm6693_vm14 = vmpackc.low %vm2851_vm12, %vm2850_vm13  ;;  %1577 = vbcast.lane.b32.xlu1 %v9166_v2, 264  ;;  %1573 = vbcast.lane.b32.xlu0 %v9166_v2, 256 }
 0x2d3   : > { %7194 = vmatprep.subr.msk.bf16.mxu0 %vm6693_vm14, %v7991_v40 }
 0x2d4   : > { %v1318_v0 = vpop.permute.xlu1 %1317  ;;  %v1314_v1 = vpop.permute.xlu0 %1313 }
 0x2d5   : > { %vm2835_vm15 = vcmp.eq.s32.totalorder %v1318_v0, %v8429_v34  ;;  %vm2834_vm0 = vcmp.eq.s32.totalorder %v1314_v1, %v8429_v34 }
 0x2d6   : > { %vm6677_vm1 = vmpackc.low %vm2835_vm15, %vm2834_vm0  ;;  %1778 = vbcast.lane.b32.xlu1 %v9175_v62, 264  ;;  %1774 = vbcast.lane.b32.xlu0 %v9175_v62, 256 }
 0x2d7   : > { %7195 = vmatpush3.bf16.msk.msra.mxu0 %vm6677_vm1, %v7991_v40 }
 0x2d8   : > { %v1519_v33 = vpop.permute.xlu1 %1518  ;;  %v1515_v7 = vpop.permute.xlu0 %1514 }
 0x2d9   : > { %vm2883_vm2 = vcmp.eq.s32.totalorder %v1519_v33, %v8429_v34  ;;  %vm2882_vm3 = vcmp.eq.s32.totalorder %v1515_v7, %v8429_v34 }
 0x2da   : > { %vm6725_vm4 = vmpackc.low %vm2883_vm2, %vm2882_vm3  ;;  %1711 = vbcast.lane.b32.xlu1 %v9184_v5, 264  ;;  %1707 = vbcast.lane.b32.xlu0 %v9184_v5, 256 }
 0x2db   : > { %7216 = vmatprep.subr.msk.bf16.mxu1 %vm6725_vm4, %v7991_v40 }
 0x2dc   : > { %v1452_v9 = vpop.permute.xlu1 %1451  ;;  %v1448_v10 = vpop.permute.xlu0 %1447 }
 0x2dd   : > { %vm2867_vm5 = vcmp.eq.s32.totalorder %v1452_v9, %v8429_v34  ;;  %vm2866_vm6 = vcmp.eq.s32.totalorder %v1448_v10, %v8429_v34  ;;  %v4808_v10 = vrot.slane %v9132_v22, %v8365_v4  ;;  %v4859_v22 = vrot.slane %v9156_v55, %v8365_v4 }
 0x2de   : > { %vm6709_vm7 = vmpackc.low %vm2867_vm5, %vm2866_vm6  ;;  %1652 = vbcast.lane.b32.xlu1 %v9150_v37, 280  ;;  %1648 = vbcast.lane.b32.xlu0 %v9150_v37, 272 }
 0x2df   : > { %7217 = vmatpush3.bf16.msk.msra.mxu1 %vm6709_vm7, %v7991_v40 }
 0x2e0   : > { %v1393_v11 = vpop.permute.xlu1 %1392  ;;  %v1389_v12 = vpop.permute.xlu0 %1388 }
 0x2e1   : > { %vm2853_vm8 = vcmp.eq.s32.totalorder %v1393_v11, %v8429_v34  ;;  %vm2852_vm9 = vcmp.eq.s32.totalorder %v1389_v12, %v8429_v34 }
 0x2e2   : > { %vm6695_vm10 = vmpackc.low %vm2853_vm8, %vm2852_vm9  ;;  %1585 = vbcast.lane.b32.xlu1 %v9166_v2, 280  ;;  %1581 = vbcast.lane.b32.xlu0 %v9166_v2, 272 }
 0x2e3   : > { %7196 = vmatprep.subr.msk.bf16.mxu0 %vm6695_vm10, %v7991_v40 }
 0x2e4   : > { %v1326_v13 = vpop.permute.xlu1 %1325  ;;  %v1322_v14 = vpop.permute.xlu0 %1321 }
 0x2e5   : > { %vm2837_vm11 = vcmp.eq.s32.totalorder %v1326_v13, %v8429_v34  ;;  %vm2836_vm12 = vcmp.eq.s32.totalorder %v1322_v14, %v8429_v34 }
 0x2e6   : > { %vm6679_vm13 = vmpackc.low %vm2837_vm11, %vm2836_vm12  ;;  %1786 = vbcast.lane.b32.xlu1 %v9175_v62, 280  ;;  %1782 = vbcast.lane.b32.xlu0 %v9175_v62, 272 }
 0x2e7   : > { %7197 = vmatpush3.bf16.msk.msra.mxu0 %vm6679_vm13, %v7991_v40 }
 0x2e8   : > { %v1527_v16 = vpop.permute.xlu1 %1526  ;;  %v1523_v17 = vpop.permute.xlu0 %1522 }
 0x2e9   : > { %vm2885_vm14 = vcmp.eq.s32.totalorder %v1527_v16, %v8429_v34  ;;  %vm2884_vm15 = vcmp.eq.s32.totalorder %v1523_v17, %v8429_v34 }
 0x2ea   : > { %vm6727_vm0 = vmpackc.low %vm2885_vm14, %vm2884_vm15  ;;  %1719 = vbcast.lane.b32.xlu1 %v9184_v5, 280  ;;  %1715 = vbcast.lane.b32.xlu0 %v9184_v5, 272 }
 0x2eb   : > { %7218 = vmatprep.subr.msk.bf16.mxu1 %vm6727_vm0, %v7991_v40 }
 0x2ec   : > { %v1460_v18 = vpop.permute.xlu1 %1459  ;;  %v1456_v19 = vpop.permute.xlu0 %1455 }
 0x2ed   : > { %vm2869_vm1 = vcmp.eq.s32.totalorder %v1460_v18, %v8429_v34  ;;  %vm2868_vm2 = vcmp.eq.s32.totalorder %v1456_v19, %v8429_v34  ;;  %v9322_v18 = vld.sshfl [vmem:[%s8328_s18 + $0x8] sm:$0xff pattern:$0x75316420] }
 0x2ee   : > { %vm6711_vm3 = vmpackc.low %vm2869_vm1, %vm2868_vm2  ;;  %1660 = vbcast.lane.b32.xlu1 %v9150_v37, 296  ;;  %1656 = vbcast.lane.b32.xlu0 %v9150_v37, 288  ;;  %v9328_v19 = vrot.slane %v9322_v18, %v8423_v32 }
 0x2ef   : > { %7219 = vmatpush3.bf16.msk.msra.mxu1 %vm6711_vm3, %v7991_v40 }
 0x2f0   : > { %v1401_v20 = vpop.permute.xlu1 %1400  ;;  %v1397_v21 = vpop.permute.xlu0 %1396 }
 0x2f1   : > { %vm2855_vm4 = vcmp.eq.s32.totalorder %v1401_v20, %v8429_v34  ;;  %vm2854_vm5 = vcmp.eq.s32.totalorder %v1397_v21, %v8429_v34 }
 0x2f2   : > { %vm6697_vm6 = vmpackc.low %vm2855_vm4, %vm2854_vm5  ;;  %1593 = vbcast.lane.b32.xlu1 %v9166_v2, 296  ;;  %1589 = vbcast.lane.b32.xlu0 %v9166_v2, 288 }
 0x2f3   : > { %7198 = vmatprep.subr.msk.bf16.mxu0 %vm6697_vm6, %v7991_v40 }
 0x2f4   : > { %v1334_v24 = vpop.permute.xlu1 %1333  ;;  %v1330_v25 = vpop.permute.xlu0 %1329 }
 0x2f5   : > { %vm2839_vm7 = vcmp.eq.s32.totalorder %v1334_v24, %v8429_v34  ;;  %vm2838_vm8 = vcmp.eq.s32.totalorder %v1330_v25, %v8429_v34  ;;  %v4491_v25 = vunpack.i.h.s16 %v9328_v19 }
 0x2f6   : > { %vm6681_vm9 = vmpackc.low %vm2839_vm7, %vm2838_vm8  ;;  %1794 = vbcast.lane.b32.xlu1 %v9175_v62, 296  ;;  %1790 = vbcast.lane.b32.xlu0 %v9175_v62, 288 }
 0x2f7   : > { %7199 = vmatpush3.bf16.msk.msra.mxu0 %vm6681_vm9, %v7991_v40 }
 0x2f8   : > { %v1535_v26 = vpop.permute.xlu1 %1534  ;;  %v1531_v27 = vpop.permute.xlu0 %1530 }
 0x2f9   : > { %vm2887_vm10 = vcmp.eq.s32.totalorder %v1535_v26, %v8429_v34  ;;  %vm2886_vm11 = vcmp.eq.s32.totalorder %v1531_v27, %v8429_v34  ;;  %v9351_v26 = vrot.slane %v9142_v28, %v8384_v15 }
 0x2fa   : > { %vm6729_vm12 = vmpackc.low %vm2887_vm10, %vm2886_vm11  ;;  %1727 = vbcast.lane.b32.xlu1 %v9184_v5, 296  ;;  %1723 = vbcast.lane.b32.xlu0 %v9184_v5, 288 }
 0x2fb   : > { %7220 = vmatprep.subr.msk.bf16.mxu1 %vm6729_vm12, %v7991_v40 }
 0x2fc   : > { %v1468_v31 = vpop.permute.xlu1 %1467  ;;  %v1464_v36 = vpop.permute.xlu0 %1463 }
 0x2fd   : > { %vm2871_vm13 = vcmp.eq.s32.totalorder %v1468_v31, %v8429_v34  ;;  %vm2870_vm14 = vcmp.eq.s32.totalorder %v1464_v36, %v8429_v34 }
 0x2fe   : > { %vm6713_vm15 = vmpackc.low %vm2871_vm13, %vm2870_vm14  ;;  %1668 = vbcast.lane.b32.xlu1 %v9150_v37, 312  ;;  %1664 = vbcast.lane.b32.xlu0 %v9150_v37, 304 }
 0x2ff   : > { %7221 = vmatpush3.bf16.msk.msra.mxu1 %vm6713_vm15, %v7991_v40 }
 0x300   : > { %v1409_v38 = vpop.permute.xlu1 %1408  ;;  %v1405_v39 = vpop.permute.xlu0 %1404 }
 0x301   : > { %vm2857_vm0 = vcmp.eq.s32.totalorder %v1409_v38, %v8429_v34  ;;  %vm2856_vm1 = vcmp.eq.s32.totalorder %v1405_v39, %v8429_v34 }
 0x302   : > { %vm6699_vm2 = vmpackc.low %vm2857_vm0, %vm2856_vm1  ;;  %1601 = vbcast.lane.b32.xlu1 %v9166_v2, 312  ;;  %1597 = vbcast.lane.b32.xlu0 %v9166_v2, 304 }
 0x303   : > { %7200 = vmatprep.subr.msk.bf16.mxu0 %vm6699_vm2, %v7991_v40 }
 0x304   : > { %v1342_v41 = vpop.permute.xlu1 %1341  ;;  %v1338_v42 = vpop.permute.xlu0 %1337 }
 0x305   : > { %vm2841_vm3 = vcmp.eq.s32.totalorder %v1342_v41, %v8429_v34  ;;  %vm2840_vm4 = vcmp.eq.s32.totalorder %v1338_v42, %v8429_v34  ;;  %v9373_v41 = vrot.slane %v9142_v28, %v8531_v61 }
 0x306   : > { %vm6683_vm5 = vmpackc.low %vm2841_vm3, %vm2840_vm4  ;;  %1802 = vbcast.lane.b32.xlu1 %v9175_v62, 312  ;;  %1798 = vbcast.lane.b32.xlu0 %v9175_v62, 304 }
 0x307   : > { %7201 = vmatpush3.bf16.msk.msra.mxu0 %vm6683_vm5, %v7991_v40 }
 0x308   : > { %v1543_v3 = vpop.permute.xlu1 %1542  ;;  %v1539_v43 = vpop.permute.xlu0 %1538 }
 0x309   : > { %vm2889_vm6 = vcmp.eq.s32.totalorder %v1543_v3, %v8429_v34  ;;  %vm2888_vm7 = vcmp.eq.s32.totalorder %v1539_v43, %v8429_v34  ;;  %v9382_v3 = vrot.slane %v9154_v54, %v8531_v61 }
 0x30a   : > { %vm6731_vm8 = vmpackc.low %vm2889_vm6, %vm2888_vm7  ;;  %1735 = vbcast.lane.b32.xlu1 %v9184_v5, 312  ;;  %1731 = vbcast.lane.b32.xlu0 %v9184_v5, 304 }
 0x30b   : > { %7222 = vmatprep.subr.msk.bf16.mxu1 %vm6731_vm8, %v7991_v40 }
 0x30c   : > { %v1476_v44 = vpop.permute.xlu1 %1475  ;;  %v1472_v45 = vpop.permute.xlu0 %1471 }
 0x30d   : > { %vm2873_vm9 = vcmp.eq.s32.totalorder %v1476_v44, %v8429_v34  ;;  %vm2872_vm10 = vcmp.eq.s32.totalorder %v1472_v45, %v8429_v34 }
 0x30e   : > { %vm6715_vm11 = vmpackc.low %vm2873_vm9, %vm2872_vm10  ;;  %1676 = vbcast.lane.b32.xlu1 %v9150_v37, 328  ;;  %1672 = vbcast.lane.b32.xlu0 %v9150_v37, 320 }
 0x30f   : > { %7223 = vmatpush3.bf16.msk.msra.mxu1 %vm6715_vm11, %v7991_v40 }
 0x310   : > { %v1417_v46 = vpop.permute.xlu1 %1416  ;;  %v1413_v48 = vpop.permute.xlu0 %1412 }
 0x311   : > { %vm2859_vm12 = vcmp.eq.s32.totalorder %v1417_v46, %v8429_v34  ;;  %vm2858_vm13 = vcmp.eq.s32.totalorder %v1413_v48, %v8429_v34 }
 0x312   : > { %vm6701_vm14 = vmpackc.low %vm2859_vm12, %vm2858_vm13  ;;  %1609 = vbcast.lane.b32.xlu1 %v9166_v2, 328  ;;  %1605 = vbcast.lane.b32.xlu0 %v9166_v2, 320 }
 0x313   : > { %7202 = vmatprep.subr.msk.bf16.mxu0 %vm6701_vm14, %v7991_v40 }
 0x314   : > { %v1350_v49 = vpop.permute.xlu1 %1349  ;;  %v1346_v50 = vpop.permute.xlu0 %1345 }
 0x315   : > { %vm2843_vm15 = vcmp.eq.s32.totalorder %v1350_v49, %v8429_v34  ;;  %vm2842_vm0 = vcmp.eq.s32.totalorder %v1346_v50, %v8429_v34 }
 0x316   : > { %vm6685_vm1 = vmpackc.low %vm2843_vm15, %vm2842_vm0  ;;  %1810 = vbcast.lane.b32.xlu1 %v9175_v62, 328  ;;  %1806 = vbcast.lane.b32.xlu0 %v9175_v62, 320 }
 0x317   : > { %7203 = vmatpush3.bf16.msk.msra.mxu0 %vm6685_vm1, %v7991_v40 }
 0x318   : > { %v1551_v23 = vpop.permute.xlu1 %1550  ;;  %v1547_v51 = vpop.permute.xlu0 %1546 }
 0x319   : > { %vm2891_vm2 = vcmp.eq.s32.totalorder %v1551_v23, %v8429_v34  ;;  %vm2890_vm3 = vcmp.eq.s32.totalorder %v1547_v51, %v8429_v34 }
 0x31a   : > { %vm6733_vm4 = vmpackc.low %vm2891_vm2, %vm2890_vm3  ;;  %1743 = vbcast.lane.b32.xlu1 %v9184_v5, 328  ;;  %1739 = vbcast.lane.b32.xlu0 %v9184_v5, 320 }
 0x31b   : > { %7224 = vmatprep.subr.msk.bf16.mxu1 %vm6733_vm4, %v7991_v40 }
 0x31c   : > { %v1484_v63 = vpop.permute.xlu1 %1483  ;;  %v1480_v52 = vpop.permute.xlu0 %1479 }
 0x31d   : > { %vm2875_vm5 = vcmp.eq.s32.totalorder %v1484_v63, %v8429_v34  ;;  %vm2874_vm6 = vcmp.eq.s32.totalorder %v1480_v52, %v8429_v34 }
 0x31e   : > { %vm6717_vm7 = vmpackc.low %vm2875_vm5, %vm2874_vm6  ;;  %1684 = vbcast.lane.b32.xlu1 %v9150_v37, 344  ;;  %1680 = vbcast.lane.b32.xlu0 %v9150_v37, 336 }
 0x31f   : > { %7225 = vmatpush3.bf16.msk.msra.mxu1 %vm6717_vm7, %v7991_v40 }
 0x320   : > { %v1425_v53 = vpop.permute.xlu1 %1424  ;;  %v1421_v6 = vpop.permute.xlu0 %1420 }
 0x321   : > { %vm2861_vm8 = vcmp.eq.s32.totalorder %v1425_v53, %v8429_v34  ;;  %vm2860_vm9 = vcmp.eq.s32.totalorder %v1421_v6, %v8429_v34 }
 0x322   : > { %vm6703_vm10 = vmpackc.low %vm2861_vm8, %vm2860_vm9  ;;  %1617 = vbcast.lane.b32.xlu1 %v9166_v2, 344  ;;  %1613 = vbcast.lane.b32.xlu0 %v9166_v2, 336 }
 0x323   : > { %7204 = vmatprep.subr.msk.bf16.mxu0 %vm6703_vm10, %v7991_v40 }
 0x324   : > { %v1358_v56 = vpop.permute.xlu1 %1357  ;;  %v1354_v57 = vpop.permute.xlu0 %1353 }
 0x325   : > { %vm2845_vm11 = vcmp.eq.s32.totalorder %v1358_v56, %v8429_v34  ;;  %vm2844_vm12 = vcmp.eq.s32.totalorder %v1354_v57, %v8429_v34 }
 0x326   : > { %vm6687_vm13 = vmpackc.low %vm2845_vm11, %vm2844_vm12  ;;  %1818 = vbcast.lane.b32.xlu1 %v9175_v62, 344  ;;  %1814 = vbcast.lane.b32.xlu0 %v9175_v62, 336 }
 0x327   : > { %7205 = vmatpush3.bf16.msk.msra.mxu0 %vm6687_vm13, %v7991_v40 }
 0x328   : > { %v1559_v58 = vpop.permute.xlu1 %1558  ;;  %v1555_v59 = vpop.permute.xlu0 %1554 }
 0x329   : > { %vm2893_vm14 = vcmp.eq.s32.totalorder %v1559_v58, %v8429_v34  ;;  %vm2892_vm15 = vcmp.eq.s32.totalorder %v1555_v59, %v8429_v34 }
 0x32a   : > { %vm6735_vm0 = vmpackc.low %vm2893_vm14, %vm2892_vm15  ;;  %1751 = vbcast.lane.b32.xlu1 %v9184_v5, 344  ;;  %1747 = vbcast.lane.b32.xlu0 %v9184_v5, 336 }
 0x32b   : > { %7226 = vmatprep.subr.msk.bf16.mxu1 %vm6735_vm0, %v7991_v40 }
 0x32c   : > { %v1492_v60 = vpop.permute.xlu1 %1491  ;;  %v1488_v0 = vpop.permute.xlu0 %1487 }
 0x32d   : > { %vm2877_vm1 = vcmp.eq.s32.totalorder %v1492_v60, %v8429_v34  ;;  %vm2876_vm2 = vcmp.eq.s32.totalorder %v1488_v0, %v8429_v34 }
 0x32e   : > { %vm6719_vm3 = vmpackc.low %vm2877_vm1, %vm2876_vm2  ;;  %1692 = vbcast.lane.b32.xlu1 %v9150_v37, 360  ;;  %1688 = vbcast.lane.b32.xlu0 %v9150_v37, 352 }
 0x32f   : > { %7227 = vmatpush3.bf16.msk.msra.mxu1 %vm6719_vm3, %v7991_v40 }
 0x330   : > { %v1433_v1 = vpop.permute.xlu1 %1432  ;;  %v1429_v33 = vpop.permute.xlu0 %1428 }
 0x331   : > { %vm2863_vm4 = vcmp.eq.s32.totalorder %v1433_v1, %v8429_v34  ;;  %vm2862_vm5 = vcmp.eq.s32.totalorder %v1429_v33, %v8429_v34 }
 0x332   : > { %vm6705_vm6 = vmpackc.low %vm2863_vm4, %vm2862_vm5  ;;  %1625 = vbcast.lane.b32.xlu1 %v9166_v2, 360  ;;  %1621 = vbcast.lane.b32.xlu0 %v9166_v2, 352 }
 0x333   : > { %7206 = vmatprep.subr.msk.bf16.mxu0 %vm6705_vm6, %v7991_v40 }
 0x334   : > { %v1366_v7 = vpop.permute.xlu1 %1365  ;;  %v1362_v9 = vpop.permute.xlu0 %1361 }
 0x335   : > { %vm2847_vm7 = vcmp.eq.s32.totalorder %v1366_v7, %v8429_v34  ;;  %vm2846_vm8 = vcmp.eq.s32.totalorder %v1362_v9, %v8429_v34 }
 0x336   : > { %vm6689_vm9 = vmpackc.low %vm2847_vm7, %vm2846_vm8  ;;  %1826 = vbcast.lane.b32.xlu1 %v9175_v62, 360  ;;  %1822 = vbcast.lane.b32.xlu0 %v9175_v62, 352 }
 0x337   : > { %7207 = vmatpush3.bf16.msk.msra.mxu0 %vm6689_vm9, %v7991_v40 }
 0x338   : > { %v1567_v11 = vpop.permute.xlu1 %1566  ;;  %v1563_v12 = vpop.permute.xlu0 %1562 }
 0x339   : > { %vm2895_vm10 = vcmp.eq.s32.totalorder %v1567_v11, %v8429_v34  ;;  %vm2894_vm11 = vcmp.eq.s32.totalorder %v1563_v12, %v8429_v34 }
 0x33a   : > { %vm6737_vm12 = vmpackc.low %vm2895_vm10, %vm2894_vm11  ;;  %1759 = vbcast.lane.b32.xlu1 %v9184_v5, 360  ;;  %1755 = vbcast.lane.b32.xlu0 %v9184_v5, 352 }
 0x33b   : > { %7228 = vmatprep.subr.msk.bf16.mxu1 %vm6737_vm12, %v7991_v40  ;;  %4848 = vmatmul.mubr.bf16.vlgmr.msra.gmra.mrb[12].mxu0 %v4808_v10 }
 0x33c   : > { %v1500_v13 = vpop.permute.xlu1 %1499  ;;  %v1496_v14 = vpop.permute.xlu0 %1495 }
 0x33d   : > { %vm2879_vm13 = vcmp.eq.s32.totalorder %v1500_v13, %v8429_v34  ;;  %vm2878_vm14 = vcmp.eq.s32.totalorder %v1496_v14, %v8429_v34 }
 0x33e   : > { %vm6721_vm15 = vmpackc.low %vm2879_vm13, %vm2878_vm14  ;;  %1700 = vbcast.lane.b32.xlu1 %v9150_v37, 376  ;;  %1696 = vbcast.lane.b32.xlu0 %v9150_v37, 368  ;;  %v9335_v37 = vpack.i.b16 %v9328_v19, %v9328_v19 }
 0x33f   : > { %7229 = vmatpush3.bf16.msk.msra.mxu1 %vm6721_vm15, %v7991_v40 }
 0x340   : > { %v1645_v16 = vpop.permute.xlu1 %1644  ;;  %v1641_v17 = vpop.permute.xlu0 %1640  ;;  %v4914_v21 = vrot.slane %v9335_v37, %v8375_v8 }
 0x341   : > { %vm2913_vm0 = vcmp.eq.s32.totalorder %v1645_v16, %v8429_v34  ;;  %vm2912_vm1 = vcmp.eq.s32.totalorder %v1641_v17, %v8429_v34 }
 0x342   : > { %vm6756_vm2 = vmpackc.low %vm2913_vm0, %vm2912_vm1  ;;  %1633 = vbcast.lane.b32.xlu1 %v9166_v2, 376  ;;  %1629 = vbcast.lane.b32.xlu0 %v9166_v2, 368 }
 0x343   : > { %7236 = vmatprep.subr.msk.bf16.mxu0 %vm6756_vm2, %v7991_v40  ;;  %4899 = vmatmul.mubr.bf16.vlgmr.msra.gmra.mrb[12].mxu1 %v4859_v22 }
 0x344   : > { %v1578_v55 = vpop.permute.xlu1 %1577  ;;  %v1574_v20 = vpop.permute.xlu0 %1573  ;;  %4949 = vmatprep.mubr.bf16.mxu0 %v4914_v21 }
 0x345   : > { %vm2897_vm3 = vcmp.eq.s32.totalorder %v1578_v55, %v8429_v34  ;;  %vm2896_vm4 = vcmp.eq.s32.totalorder %v1574_v20, %v8429_v34 }
 0x346   : > { %vm6740_vm5 = vmpackc.low %vm2897_vm3, %vm2896_vm4  ;;  %1834 = vbcast.lane.b32.xlu1 %v9175_v62, 376  ;;  %1830 = vbcast.lane.b32.xlu0 %v9175_v62, 368  ;;  %v9354_v62 = vpack.i.b16 %v4491_v25, %v4491_v25 }
 0x347   : > { %7237 = vmatpush3.bf16.msk.msra.mxu0 %vm6740_vm5, %v7991_v40 }
 0x348   : > { %v1779_v2 = vpop.permute.xlu1 %1778  ;;  %v1775_v24 = vpop.permute.xlu0 %1774  ;;  %v4965_v36 = vrot.slane %v9354_v62, %v8375_v8 }
 0x349   : > { %vm2945_vm6 = vcmp.eq.s32.totalorder %v1779_v2, %v8429_v34  ;;  %vm2944_vm7 = vcmp.eq.s32.totalorder %v1775_v24, %v8429_v34 }
 0x34a   : > { %vm6788_vm8 = vmpackc.low %vm2945_vm6, %vm2944_vm7  ;;  %1767 = vbcast.lane.b32.xlu1 %v9184_v5, 376  ;;  %1763 = vbcast.lane.b32.xlu0 %v9184_v5, 368  ;;  %v9364_v5 = vrot.slane %v9154_v54, %v8384_v15 }
 0x34b   : > { %7258 = vmatprep.subr.msk.bf16.mxu1 %vm6788_vm8, %v7991_v40  ;;  %5000 = vmatprep.mubr.bf16.mxu1 %v4965_v36 }
 0x34c   : > { %v1712_v27 = vpop.permute.xlu1 %1711  ;;  %v1708_v31 = vpop.permute.xlu0 %1707 }
 0x34d   : > { %vm2929_vm9 = vcmp.eq.s32.totalorder %v1712_v27, %v8429_v34  ;;  %vm2928_vm10 = vcmp.eq.s32.totalorder %v1708_v31, %v8429_v34 }
 0x34e   : > { %vm6772_vm11 = vmpackc.low %vm2929_vm9, %vm2928_vm10  ;;  %1912 = vbcast.lane.b32.xlu1 %v9351_v26, 264  ;;  %1908 = vbcast.lane.b32.xlu0 %v9351_v26, 256 }
 0x34f   : > { %7259 = vmatpush3.bf16.msk.msra.mxu1 %vm6772_vm11, %v7991_v40 }
 0x350   : > { %v1653_v38 = vpop.permute.xlu1 %1652  ;;  %v1649_v39 = vpop.permute.xlu0 %1648 }
 0x351   : > { %vm2915_vm12 = vcmp.eq.s32.totalorder %v1653_v38, %v8429_v34  ;;  %vm2914_vm13 = vcmp.eq.s32.totalorder %v1649_v39, %v8429_v34 }
 0x352   : > { %vm6758_vm14 = vmpackc.low %vm2915_vm12, %vm2914_vm13  ;;  %1845 = vbcast.lane.b32.xlu1 %v9364_v5, 264  ;;  %1841 = vbcast.lane.b32.xlu0 %v9364_v5, 256 }
 0x353   : > { %7238 = vmatprep.subr.msk.bf16.mxu0 %vm6758_vm14, %v7991_v40 }
 0x354   : > { %v1586_v15 = vpop.permute.xlu1 %1585  ;;  %v1582_v42 = vpop.permute.xlu0 %1581 }
 0x355   : > { %vm2899_vm15 = vcmp.eq.s32.totalorder %v1586_v15, %v8429_v34  ;;  %vm2898_vm0 = vcmp.eq.s32.totalorder %v1582_v42, %v8429_v34 }
 0x356   : > { %vm6742_vm1 = vmpackc.low %vm2899_vm15, %vm2898_vm0  ;;  %2046 = vbcast.lane.b32.xlu1 %v9373_v41, 264  ;;  %2042 = vbcast.lane.b32.xlu0 %v9373_v41, 256 }
 0x357   : > { %7239 = vmatpush3.bf16.msk.msra.mxu0 %vm6742_vm1, %v7991_v40 }
 0x358   : > { %v1787_v28 = vpop.permute.xlu1 %1786  ;;  %v1783_v43 = vpop.permute.xlu0 %1782 }
 0x359   : > { %vm2947_vm2 = vcmp.eq.s32.totalorder %v1787_v28, %v8429_v34  ;;  %vm2946_vm3 = vcmp.eq.s32.totalorder %v1783_v43, %v8429_v34  ;;  %v4910_v43 = vrot.slane %v9335_v37, %v8365_v4  ;;  %v4961_v37 = vrot.slane %v9354_v62, %v8365_v4 }
 0x35a   : > { %vm6790_vm4 = vmpackc.low %vm2947_vm2, %vm2946_vm3  ;;  %1979 = vbcast.lane.b32.xlu1 %v9382_v3, 264  ;;  %1975 = vbcast.lane.b32.xlu0 %v9382_v3, 256 }
 0x35b   : > { %7260 = vmatprep.subr.msk.bf16.mxu1 %vm6790_vm4, %v7991_v40 }
 0x35c   : > { %v1720_v44 = vpop.permute.xlu1 %1719  ;;  %v1716_v45 = vpop.permute.xlu0 %1715 }
 0x35d   : > { %vm2931_vm5 = vcmp.eq.s32.totalorder %v1720_v44, %v8429_v34  ;;  %vm2930_vm6 = vcmp.eq.s32.totalorder %v1716_v45, %v8429_v34 }
 0x35e   : > { %vm6774_vm7 = vmpackc.low %vm2931_vm5, %vm2930_vm6  ;;  %1920 = vbcast.lane.b32.xlu1 %v9351_v26, 280  ;;  %1916 = vbcast.lane.b32.xlu0 %v9351_v26, 272 }
 0x35f   : > { %7261 = vmatpush3.bf16.msk.msra.mxu1 %vm6774_vm7, %v7991_v40 }
 0x360   : > { %v1661_v61 = vpop.permute.xlu1 %1660  ;;  %v1657_v54 = vpop.permute.xlu0 %1656 }
 0x361   : > { %vm2917_vm8 = vcmp.eq.s32.totalorder %v1661_v61, %v8429_v34  ;;  %vm2916_vm9 = vcmp.eq.s32.totalorder %v1657_v54, %v8429_v34 }
 0x362   : > { %vm6760_vm10 = vmpackc.low %vm2917_vm8, %vm2916_vm9  ;;  %1853 = vbcast.lane.b32.xlu1 %v9364_v5, 280  ;;  %1849 = vbcast.lane.b32.xlu0 %v9364_v5, 272 }
 0x363   : > { %7240 = vmatprep.subr.msk.bf16.mxu0 %vm6760_vm10, %v7991_v40 }
 0x364   : > { %v1594_v46 = vpop.permute.xlu1 %1593  ;;  %v1590_v48 = vpop.permute.xlu0 %1589 }
 0x365   : > { %vm2901_vm11 = vcmp.eq.s32.totalorder %v1594_v46, %v8429_v34  ;;  %vm2900_vm12 = vcmp.eq.s32.totalorder %v1590_v48, %v8429_v34  ;;  %v4465_v46 = vcombine.high %v9322_v18, %v9322_v18 }
 0x366   : > { %vm6744_vm13 = vmpackc.low %vm2901_vm11, %vm2900_vm12  ;;  %2054 = vbcast.lane.b32.xlu1 %v9373_v41, 280  ;;  %2050 = vbcast.lane.b32.xlu0 %v9373_v41, 272 }
 0x367   : > { %7241 = vmatpush3.bf16.msk.msra.mxu0 %vm6744_vm13, %v7991_v40 }
 0x368   : > { %v1795_v49 = vpop.permute.xlu1 %1794  ;;  %v1791_v50 = vpop.permute.xlu0 %1790 }
 0x369   : > { %vm2949_vm14 = vcmp.eq.s32.totalorder %v1795_v49, %v8429_v34  ;;  %vm2948_vm15 = vcmp.eq.s32.totalorder %v1791_v50, %v8429_v34  ;;  %v9524_v50 = vrot.slane %v4465_v46, %v8423_v32 }
 0x36a   : > { %vm6792_vm0 = vmpackc.low %vm2949_vm14, %vm2948_vm15  ;;  %1987 = vbcast.lane.b32.xlu1 %v9382_v3, 280  ;;  %1983 = vbcast.lane.b32.xlu0 %v9382_v3, 272 }
 0x36b   : > { %7262 = vmatprep.subr.msk.bf16.mxu1 %vm6792_vm0, %v7991_v40  ;;  %v9531_v18 = vpack.i.b16 %v9524_v50, %v9524_v50 }
 0x36c   : > { %v1728_v23 = vpop.permute.xlu1 %1727  ;;  %v1724_v51 = vpop.permute.xlu0 %1723 }
 0x36d   : > { %vm2933_vm1 = vcmp.eq.s32.totalorder %v1728_v23, %v8429_v34  ;;  %vm2932_vm2 = vcmp.eq.s32.totalorder %v1724_v51, %v8429_v34  ;;  %v5016_v32 = vrot.slane %v9531_v18, %v8375_v8  ;;  %v4493_v51 = vunpack.i.h.s16 %v9524_v50 }
 0x36e   : > { %vm6776_vm3 = vmpackc.low %vm2933_vm1, %vm2932_vm2  ;;  %1928 = vbcast.lane.b32.xlu1 %v9351_v26, 296  ;;  %1924 = vbcast.lane.b32.xlu0 %v9351_v26, 288 }
 0x36f   : > { %7263 = vmatpush3.bf16.msk.msra.mxu1 %vm6776_vm3, %v7991_v40 }
 0x370   : > { %v1669_v63 = vpop.permute.xlu1 %1668  ;;  %v1665_v52 = vpop.permute.xlu0 %1664 }
 0x371   : > { %vm2919_vm4 = vcmp.eq.s32.totalorder %v1669_v63, %v8429_v34  ;;  %vm2918_vm5 = vcmp.eq.s32.totalorder %v1665_v52, %v8429_v34  ;;  %v9546_v63 = vld [vmem:[%s8321_s6 + $0x18] sm:$0xff]  ;;  %v9553_v52 = vpack.i.b16 %v4493_v51, %v4493_v51 }
 0x372   : > { %vm6762_vm6 = vmpackc.low %vm2919_vm4, %vm2918_vm5  ;;  %1861 = vbcast.lane.b32.xlu1 %v9364_v5, 296  ;;  %1857 = vbcast.lane.b32.xlu0 %v9364_v5, 288 }
 0x373   : > { %7242 = vmatprep.subr.msk.bf16.mxu0 %vm6762_vm6, %v7991_v40 }
 0x374   : > { %v1602_v53 = vpop.permute.xlu1 %1601  ;;  %v1598_v6 = vpop.permute.xlu0 %1597 }
 0x375   : > { %vm2903_vm7 = vcmp.eq.s32.totalorder %v1602_v53, %v8429_v34  ;;  %vm2902_vm8 = vcmp.eq.s32.totalorder %v1598_v6, %v8429_v34 }
 0x376   : > { %vm6746_vm9 = vmpackc.low %vm2903_vm7, %vm2902_vm8  ;;  %2062 = vbcast.lane.b32.xlu1 %v9373_v41, 296  ;;  %2058 = vbcast.lane.b32.xlu0 %v9373_v41, 288 }
 0x377   : > { %7243 = vmatpush3.bf16.msk.msra.mxu0 %vm6746_vm9, %v7991_v40 }
 0x378   : > { %v1803_v56 = vpop.permute.xlu1 %1802  ;;  %v1799_v57 = vpop.permute.xlu0 %1798 }
 0x379   : > { %vm2951_vm10 = vcmp.eq.s32.totalorder %v1803_v56, %v8429_v34  ;;  %vm2950_vm11 = vcmp.eq.s32.totalorder %v1799_v57, %v8429_v34  ;;  %v5067_v56 = vrot.slane %v9553_v52, %v8375_v8 }
 0x37a   : > { %vm6794_vm12 = vmpackc.low %vm2951_vm10, %vm2950_vm11  ;;  %1995 = vbcast.lane.b32.xlu1 %v9382_v3, 296  ;;  %1991 = vbcast.lane.b32.xlu0 %v9382_v3, 288 }
 0x37b   : > { %7264 = vmatprep.subr.msk.bf16.mxu1 %vm6794_vm12, %v7991_v40 }
 0x37c   : > { %v1736_v58 = vpop.permute.xlu1 %1735  ;;  %v1732_v59 = vpop.permute.xlu0 %1731 }
 0x37d   : > { %vm2935_vm13 = vcmp.eq.s32.totalorder %v1736_v58, %v8429_v34  ;;  %vm2934_vm14 = vcmp.eq.s32.totalorder %v1732_v59, %v8429_v34 }
 0x37e   : > { %vm6778_vm15 = vmpackc.low %vm2935_vm13, %vm2934_vm14  ;;  %1936 = vbcast.lane.b32.xlu1 %v9351_v26, 312  ;;  %1932 = vbcast.lane.b32.xlu0 %v9351_v26, 304 }
 0x37f   : > { %7265 = vmatpush3.bf16.msk.msra.mxu1 %vm6778_vm15, %v7991_v40 }
 0x380   : > { %v1677_v60 = vpop.permute.xlu1 %1676  ;;  %v1673_v0 = vpop.permute.xlu0 %1672 }
 0x381   : > { %vm2921_vm0 = vcmp.eq.s32.totalorder %v1677_v60, %v8429_v34  ;;  %vm2920_vm1 = vcmp.eq.s32.totalorder %v1673_v0, %v8429_v34  ;;  %v9575_v60 = vrot.slane %v9546_v63, %v8766_v29 }
 0x382   : > { %vm6764_vm2 = vmpackc.low %vm2921_vm0, %vm2920_vm1  ;;  %1869 = vbcast.lane.b32.xlu1 %v9364_v5, 312  ;;  %1865 = vbcast.lane.b32.xlu0 %v9364_v5, 304 }
 0x383   : > { %7244 = vmatprep.subr.msk.bf16.mxu0 %vm6764_vm2, %v7991_v40 }
 0x384   : > { %v1610_v1 = vpop.permute.xlu1 %1609  ;;  %v1606_v33 = vpop.permute.xlu0 %1605 }
 0x385   : > { %vm2905_vm3 = vcmp.eq.s32.totalorder %v1610_v1, %v8429_v34  ;;  %vm2904_vm4 = vcmp.eq.s32.totalorder %v1606_v33, %v8429_v34 }
 0x386   : > { %vm6748_vm5 = vmpackc.low %vm2905_vm3, %vm2904_vm4  ;;  %2070 = vbcast.lane.b32.xlu1 %v9373_v41, 312  ;;  %2066 = vbcast.lane.b32.xlu0 %v9373_v41, 304 }
 0x387   : > { %7245 = vmatpush3.bf16.msk.msra.mxu0 %vm6748_vm5, %v7991_v40 }
 0x388   : > { %v1811_v7 = vpop.permute.xlu1 %1810  ;;  %v1807_v9 = vpop.permute.xlu0 %1806 }
 0x389   : > { %vm2953_vm6 = vcmp.eq.s32.totalorder %v1811_v7, %v8429_v34  ;;  %vm2952_vm7 = vcmp.eq.s32.totalorder %v1807_v9, %v8429_v34 }
 0x38a   : > { %vm6796_vm8 = vmpackc.low %vm2953_vm6, %vm2952_vm7  ;;  %2003 = vbcast.lane.b32.xlu1 %v9382_v3, 312  ;;  %1999 = vbcast.lane.b32.xlu0 %v9382_v3, 304 }
 0x38b   : > { %7266 = vmatprep.subr.msk.bf16.mxu1 %vm6796_vm8, %v7991_v40 }
 0x38c   : > { %v1744_v10 = vpop.permute.xlu1 %1743  ;;  %v1740_v11 = vpop.permute.xlu0 %1739 }
 0x38d   : > { %vm2937_vm9 = vcmp.eq.s32.totalorder %v1744_v10, %v8429_v34  ;;  %vm2936_vm10 = vcmp.eq.s32.totalorder %v1740_v11, %v8429_v34 }
 0x38e   : > { %vm6780_vm11 = vmpackc.low %vm2937_vm9, %vm2936_vm10  ;;  %1944 = vbcast.lane.b32.xlu1 %v9351_v26, 328  ;;  %1940 = vbcast.lane.b32.xlu0 %v9351_v26, 320 }
 0x38f   : > { %7267 = vmatpush3.bf16.msk.msra.mxu1 %vm6780_vm11, %v7991_v40 }
 0x390   : > { %v1685_v12 = vpop.permute.xlu1 %1684  ;;  %v1681_v13 = vpop.permute.xlu0 %1680 }
 0x391   : > { %vm2923_vm12 = vcmp.eq.s32.totalorder %v1685_v12, %v8429_v34  ;;  %vm2922_vm13 = vcmp.eq.s32.totalorder %v1681_v13, %v8429_v34 }
 0x392   : > { %vm6766_vm14 = vmpackc.low %vm2923_vm12, %vm2922_vm13  ;;  %1877 = vbcast.lane.b32.xlu1 %v9364_v5, 328  ;;  %1873 = vbcast.lane.b32.xlu0 %v9364_v5, 320 }
 0x393   : > { %7246 = vmatprep.subr.msk.bf16.mxu0 %vm6766_vm14, %v7991_v40 }
 0x394   : > { %v1618_v14 = vpop.permute.xlu1 %1617  ;;  %v1614_v22 = vpop.permute.xlu0 %1613 }
 0x395   : > { %vm2907_vm15 = vcmp.eq.s32.totalorder %v1618_v14, %v8429_v34  ;;  %vm2906_vm0 = vcmp.eq.s32.totalorder %v1614_v22, %v8429_v34 }
 0x396   : > { %vm6750_vm1 = vmpackc.low %vm2907_vm15, %vm2906_vm0  ;;  %2078 = vbcast.lane.b32.xlu1 %v9373_v41, 328  ;;  %2074 = vbcast.lane.b32.xlu0 %v9373_v41, 320 }
 0x397   : > { %7247 = vmatpush3.bf16.msk.msra.mxu0 %vm6750_vm1, %v7991_v40 }
 0x398   : > { %v1819_v16 = vpop.permute.xlu1 %1818  ;;  %v1815_v17 = vpop.permute.xlu0 %1814 }
 0x399   : > { %vm2955_vm2 = vcmp.eq.s32.totalorder %v1819_v16, %v8429_v34  ;;  %vm2954_vm3 = vcmp.eq.s32.totalorder %v1815_v17, %v8429_v34 }
 0x39a   : > { %vm6798_vm4 = vmpackc.low %vm2955_vm2, %vm2954_vm3  ;;  %2011 = vbcast.lane.b32.xlu1 %v9382_v3, 328  ;;  %2007 = vbcast.lane.b32.xlu0 %v9382_v3, 320 }
 0x39b   : > { %7268 = vmatprep.subr.msk.bf16.mxu1 %vm6798_vm4, %v7991_v40 }
 0x39c   : > { %v1752_v55 = vpop.permute.xlu1 %1751  ;;  %v1748_v20 = vpop.permute.xlu0 %1747 }
 0x39d   : > { %vm2939_vm5 = vcmp.eq.s32.totalorder %v1752_v55, %v8429_v34  ;;  %vm2938_vm6 = vcmp.eq.s32.totalorder %v1748_v20, %v8429_v34 }
 0x39e   : > { %vm6782_vm7 = vmpackc.low %vm2939_vm5, %vm2938_vm6  ;;  %1952 = vbcast.lane.b32.xlu1 %v9351_v26, 344  ;;  %1948 = vbcast.lane.b32.xlu0 %v9351_v26, 336 }
 0x39f   : > { %7269 = vmatpush3.bf16.msk.msra.mxu1 %vm6782_vm7, %v7991_v40 }
 0x3a0   : > { %v1693_v21 = vpop.permute.xlu1 %1692  ;;  %v1689_v2 = vpop.permute.xlu0 %1688 }
 0x3a1   : > { %vm2925_vm8 = vcmp.eq.s32.totalorder %v1693_v21, %v8429_v34  ;;  %vm2924_vm9 = vcmp.eq.s32.totalorder %v1689_v2, %v8429_v34 }
 0x3a2   : > { %vm6768_vm10 = vmpackc.low %vm2925_vm8, %vm2924_vm9  ;;  %1885 = vbcast.lane.b32.xlu1 %v9364_v5, 344  ;;  %1881 = vbcast.lane.b32.xlu0 %v9364_v5, 336 }
 0x3a3   : > { %7248 = vmatprep.subr.msk.bf16.mxu0 %vm6768_vm10, %v7991_v40 }
 0x3a4   : > { %v1626_v24 = vpop.permute.xlu1 %1625  ;;  %v1622_v25 = vpop.permute.xlu0 %1621 }
 0x3a5   : > { %vm2909_vm11 = vcmp.eq.s32.totalorder %v1626_v24, %v8429_v34  ;;  %vm2908_vm12 = vcmp.eq.s32.totalorder %v1622_v25, %v8429_v34 }
 0x3a6   : > { %vm6752_vm13 = vmpackc.low %vm2909_vm11, %vm2908_vm12  ;;  %2086 = vbcast.lane.b32.xlu1 %v9373_v41, 344  ;;  %2082 = vbcast.lane.b32.xlu0 %v9373_v41, 336 }
 0x3a7   : > { %7249 = vmatpush3.bf16.msk.msra.mxu0 %vm6752_vm13, %v7991_v40 }
 0x3a8   : > { %v1827_v27 = vpop.permute.xlu1 %1826  ;;  %v1823_v31 = vpop.permute.xlu0 %1822 }
 0x3a9   : > { %vm2957_vm14 = vcmp.eq.s32.totalorder %v1827_v27, %v8429_v34  ;;  %vm2956_vm15 = vcmp.eq.s32.totalorder %v1823_v31, %v8429_v34 }
 0x3aa   : > { %vm6800_vm0 = vmpackc.low %vm2957_vm14, %vm2956_vm15  ;;  %2019 = vbcast.lane.b32.xlu1 %v9382_v3, 344  ;;  %2015 = vbcast.lane.b32.xlu0 %v9382_v3, 336 }
 0x3ab   : > { %7270 = vmatprep.subr.msk.bf16.mxu1 %vm6800_vm0, %v7991_v40 }
 0x3ac   : > { %v1760_v36 = vpop.permute.xlu1 %1759  ;;  %v1756_v38 = vpop.permute.xlu0 %1755 }
 0x3ad   : > { %vm2941_vm1 = vcmp.eq.s32.totalorder %v1760_v36, %v8429_v34  ;;  %vm2940_vm2 = vcmp.eq.s32.totalorder %v1756_v38, %v8429_v34 }
 0x3ae   : > { %vm6784_vm3 = vmpackc.low %vm2941_vm1, %vm2940_vm2  ;;  %1960 = vbcast.lane.b32.xlu1 %v9351_v26, 360  ;;  %1956 = vbcast.lane.b32.xlu0 %v9351_v26, 352 }
 0x3af   : > { %7271 = vmatpush3.bf16.msk.msra.mxu1 %vm6784_vm3, %v7991_v40 }
 0x3b0   : > { %v1701_v39 = vpop.permute.xlu1 %1700  ;;  %v1697_v15 = vpop.permute.xlu0 %1696 }
 0x3b1   : > { %vm2927_vm4 = vcmp.eq.s32.totalorder %v1701_v39, %v8429_v34  ;;  %vm2926_vm5 = vcmp.eq.s32.totalorder %v1697_v15, %v8429_v34 }
 0x3b2   : > { %vm6770_vm6 = vmpackc.low %vm2927_vm4, %vm2926_vm5  ;;  %1893 = vbcast.lane.b32.xlu1 %v9364_v5, 360  ;;  %1889 = vbcast.lane.b32.xlu0 %v9364_v5, 352 }
 0x3b3   : > { %7250 = vmatprep.subr.msk.bf16.mxu0 %vm6770_vm6, %v7991_v40 }
 0x3b4   : > { %v1634_v42 = vpop.permute.xlu1 %1633  ;;  %v1630_v28 = vpop.permute.xlu0 %1629 }
 0x3b5   : > { %vm2911_vm7 = vcmp.eq.s32.totalorder %v1634_v42, %v8429_v34  ;;  %vm2910_vm8 = vcmp.eq.s32.totalorder %v1630_v28, %v8429_v34 }
 0x3b6   : > { %vm6754_vm9 = vmpackc.low %vm2911_vm7, %vm2910_vm8  ;;  %2094 = vbcast.lane.b32.xlu1 %v9373_v41, 360  ;;  %2090 = vbcast.lane.b32.xlu0 %v9373_v41, 352 }
 0x3b7   : > { %7251 = vmatpush3.bf16.msk.msra.mxu0 %vm6754_vm9, %v7991_v40 }
 0x3b8   : > { %v1835_v44 = vpop.permute.xlu1 %1834  ;;  %v1831_v45 = vpop.permute.xlu0 %1830 }
 0x3b9   : > { %vm2959_vm10 = vcmp.eq.s32.totalorder %v1835_v44, %v8429_v34  ;;  %vm2958_vm11 = vcmp.eq.s32.totalorder %v1831_v45, %v8429_v34 }
 0x3ba   : > { %vm6802_vm12 = vmpackc.low %vm2959_vm10, %vm2958_vm11  ;;  %2027 = vbcast.lane.b32.xlu1 %v9382_v3, 360  ;;  %2023 = vbcast.lane.b32.xlu0 %v9382_v3, 352 }
 0x3bb   : > { %7272 = vmatprep.subr.msk.bf16.mxu1 %vm6802_vm12, %v7991_v40  ;;  %4950 = vmatmul.mubr.bf16.vlgmr.msra.gmra.mrb[16].mxu0 %v4910_v43 }
 0x3bc   : > { %v1768_v61 = vpop.permute.xlu1 %1767  ;;  %v1764_v54 = vpop.permute.xlu0 %1763  ;;  %5051 = vmatprep.mubr.bf16.mxu0 %v5016_v32 }
 0x3bd   : > { %vm2943_vm13 = vcmp.eq.s32.totalorder %v1768_v61, %v8429_v34  ;;  %vm2942_vm14 = vcmp.eq.s32.totalorder %v1764_v54, %v8429_v34 }
 0x3be   : > { %vm6786_vm15 = vmpackc.low %vm2943_vm13, %vm2942_vm14  ;;  %1968 = vbcast.lane.b32.xlu1 %v9351_v26, 376  ;;  %1964 = vbcast.lane.b32.xlu0 %v9351_v26, 368 }
 0x3bf   : > { %7273 = vmatpush3.bf16.msk.msra.mxu1 %vm6786_vm15, %v7991_v40 }
 0x3c0   : > { %v1913_v48 = vpop.permute.xlu1 %1912  ;;  %v1909_v49 = vpop.permute.xlu0 %1908 }
 0x3c1   : > { %vm2977_vm0 = vcmp.eq.s32.totalorder %v1913_v48, %v8429_v34  ;;  %vm2976_vm1 = vcmp.eq.s32.totalorder %v1909_v49, %v8429_v34 }
 0x3c2   : > { %vm6821_vm2 = vmpackc.low %vm2977_vm0, %vm2976_vm1  ;;  %1901 = vbcast.lane.b32.xlu1 %v9364_v5, 376  ;;  %1897 = vbcast.lane.b32.xlu0 %v9364_v5, 368 }
 0x3c3   : > { %7280 = vmatprep.subr.msk.bf16.mxu0 %vm6821_vm2, %v7991_v40  ;;  %5001 = vmatmul.mubr.bf16.vlgmr.msra.gmra.mrb[16].mxu1 %v4961_v37 }
 0x3c4   : > { %v1846_v26 = vpop.permute.xlu1 %1845  ;;  %v1842_v62 = vpop.permute.xlu0 %1841  ;;  %5102 = vmatprep.mubr.bf16.mxu1 %v5067_v56 }
 0x3c5   : > { %vm2961_vm3 = vcmp.eq.s32.totalorder %v1846_v26, %v8429_v34  ;;  %vm2960_vm4 = vcmp.eq.s32.totalorder %v1842_v62, %v8429_v34 }
 0x3c6   : > { %vm6805_vm5 = vmpackc.low %vm2961_vm3, %vm2960_vm4  ;;  %2102 = vbcast.lane.b32.xlu1 %v9373_v41, 376  ;;  %2098 = vbcast.lane.b32.xlu0 %v9373_v41, 368  ;;  %v9550_v41 = vrot.slane %v9546_v63, %v8644_v47 }
 0x3c7   : > { %7281 = vmatpush3.bf16.msk.msra.mxu0 %vm6805_vm5, %v7991_v40 }
 0x3c8   : > { %v2047_v5 = vpop.permute.xlu1 %2046  ;;  %v2043_v23 = vpop.permute.xlu0 %2042 }
 0x3c9   : > { %vm3009_vm6 = vcmp.eq.s32.totalorder %v2047_v5, %v8429_v34  ;;  %vm3008_vm7 = vcmp.eq.s32.totalorder %v2043_v23, %v8429_v34 }
 0x3ca   : > { %vm6853_vm8 = vmpackc.low %vm3009_vm6, %vm3008_vm7  ;;  %2035 = vbcast.lane.b32.xlu1 %v9382_v3, 376  ;;  %2031 = vbcast.lane.b32.xlu0 %v9382_v3, 368  ;;  %v9562_v3 = vld [vmem:[%s8321_s6 + $0x10] sm:$0xff] }
 0x3cb   : > { %7302 = vmatprep.subr.msk.bf16.mxu1 %vm6853_vm8, %v7991_v40  ;;  %v9566_v57 = vrot.slane %v9562_v3, %v8644_v47  ;;  %v9584_v1 = vrot.slane %v9562_v3, %v8766_v29 }
 0x3cc   : > { %v1980_v53 = vpop.permute.xlu1 %1979  ;;  %v1976_v6 = vpop.permute.xlu0 %1975 }
 0x3cd   : > { %vm2993_vm9 = vcmp.eq.s32.totalorder %v1980_v53, %v8429_v34  ;;  %vm2992_vm10 = vcmp.eq.s32.totalorder %v1976_v6, %v8429_v34 }
 0x3ce   : > { %vm6837_vm11 = vmpackc.low %vm2993_vm9, %vm2992_vm10  ;;  %2180 = vbcast.lane.b32.xlu1 %v9550_v41, 264  ;;  %2176 = vbcast.lane.b32.xlu0 %v9550_v41, 256 }
 0x3cf   : > { %7303 = vmatpush3.bf16.msk.msra.mxu1 %vm6837_vm11, %v7991_v40 }
 0x3d0   : > { %v1921_v58 = vpop.permute.xlu1 %1920  ;;  %v1917_v59 = vpop.permute.xlu0 %1916 }
 0x3d1   : > { %vm2979_vm12 = vcmp.eq.s32.totalorder %v1921_v58, %v8429_v34  ;;  %vm2978_vm13 = vcmp.eq.s32.totalorder %v1917_v59, %v8429_v34 }
 0x3d2   : > { %vm6823_vm14 = vmpackc.low %vm2979_vm12, %vm2978_vm13  ;;  %2113 = vbcast.lane.b32.xlu1 %v9566_v57, 264  ;;  %2109 = vbcast.lane.b32.xlu0 %v9566_v57, 256 }
 0x3d3   : > { %7282 = vmatprep.subr.msk.bf16.mxu0 %vm6823_vm14, %v7991_v40 }
 0x3d4   : > { %v1854_v47 = vpop.permute.xlu1 %1853  ;;  %v1850_v0 = vpop.permute.xlu0 %1849 }
 0x3d5   : > { %vm2963_vm15 = vcmp.eq.s32.totalorder %v1854_v47, %v8429_v34  ;;  %vm2962_vm0 = vcmp.eq.s32.totalorder %v1850_v0, %v8429_v34 }
 0x3d6   : > { %vm6807_vm1 = vmpackc.low %vm2963_vm15, %vm2962_vm0  ;;  %2314 = vbcast.lane.b32.xlu1 %v9575_v60, 264  ;;  %2310 = vbcast.lane.b32.xlu0 %v9575_v60, 256 }
 0x3d7   : > { %7283 = vmatpush3.bf16.msk.msra.mxu0 %vm6807_vm1, %v7991_v40 }
 0x3d8   : > { %v2055_v33 = vpop.permute.xlu1 %2054  ;;  %v2051_v7 = vpop.permute.xlu0 %2050 }
 0x3d9   : > { %vm3011_vm2 = vcmp.eq.s32.totalorder %v2055_v33, %v8429_v34  ;;  %vm3010_vm3 = vcmp.eq.s32.totalorder %v2051_v7, %v8429_v34  ;;  %v5012_v33 = vrot.slane %v9531_v18, %v8365_v4  ;;  %v5063_v18 = vrot.slane %v9553_v52, %v8365_v4 }
 0x3da   : > { %vm6855_vm4 = vmpackc.low %vm3011_vm2, %vm3010_vm3  ;;  %2247 = vbcast.lane.b32.xlu1 %v9584_v1, 264  ;;  %2243 = vbcast.lane.b32.xlu0 %v9584_v1, 256 }
 0x3db   : > { %7304 = vmatprep.subr.msk.bf16.mxu1 %vm6855_vm4, %v7991_v40 }
 0x3dc   : > { %v1988_v9 = vpop.permute.xlu1 %1987  ;;  %v1984_v10 = vpop.permute.xlu0 %1983 }
 0x3dd   : > { %vm2995_vm5 = vcmp.eq.s32.totalorder %v1988_v9, %v8429_v34  ;;  %vm2994_vm6 = vcmp.eq.s32.totalorder %v1984_v10, %v8429_v34 }
 0x3de   : > { %vm6839_vm7 = vmpackc.low %vm2995_vm5, %vm2994_vm6  ;;  %2188 = vbcast.lane.b32.xlu1 %v9550_v41, 280  ;;  %2184 = vbcast.lane.b32.xlu0 %v9550_v41, 272 }
 0x3df   : > { %7305 = vmatpush3.bf16.msk.msra.mxu1 %vm6839_vm7, %v7991_v40 }
 0x3e0   : > { %v1929_v29 = vpop.permute.xlu1 %1928  ;;  %v1925_v11 = vpop.permute.xlu0 %1924 }
 0x3e1   : > { %vm2981_vm8 = vcmp.eq.s32.totalorder %v1929_v29, %v8429_v34  ;;  %vm2980_vm9 = vcmp.eq.s32.totalorder %v1925_v11, %v8429_v34 }
 0x3e2   : > { %vm6825_vm10 = vmpackc.low %vm2981_vm8, %vm2980_vm9  ;;  %2121 = vbcast.lane.b32.xlu1 %v9566_v57, 280  ;;  %2117 = vbcast.lane.b32.xlu0 %v9566_v57, 272 }
 0x3e3   : > { %7284 = vmatprep.subr.msk.bf16.mxu0 %vm6825_vm10, %v7991_v40 }
 0x3e4   : > { %v1862_v12 = vpop.permute.xlu1 %1861  ;;  %v1858_v13 = vpop.permute.xlu0 %1857 }
 0x3e5   : > { %vm2965_vm11 = vcmp.eq.s32.totalorder %v1862_v12, %v8429_v34  ;;  %vm2964_vm12 = vcmp.eq.s32.totalorder %v1858_v13, %v8429_v34  ;;  %v4480_v13 = vcombine.high %v9328_v19, %v9328_v19 }
 0x3e6   : > { %vm6809_vm13 = vmpackc.low %vm2965_vm11, %vm2964_vm12  ;;  %2322 = vbcast.lane.b32.xlu1 %v9575_v60, 280  ;;  %2318 = vbcast.lane.b32.xlu0 %v9575_v60, 272 }
 0x3e7   : > { %7285 = vmatpush3.bf16.msk.msra.mxu0 %vm6809_vm13, %v7991_v40 }
 0x3e8   : > { %v2063_v14 = vpop.permute.xlu1 %2062  ;;  %v2059_v22 = vpop.permute.xlu0 %2058 }
 0x3e9   : > { %vm3013_vm14 = vcmp.eq.s32.totalorder %v2063_v14, %v8429_v34  ;;  %vm3012_vm15 = vcmp.eq.s32.totalorder %v2059_v22, %v8429_v34 }
 0x3ea   : > { %vm6857_vm0 = vmpackc.low %vm3013_vm14, %vm3012_vm15  ;;  %2255 = vbcast.lane.b32.xlu1 %v9584_v1, 280  ;;  %2251 = vbcast.lane.b32.xlu0 %v9584_v1, 272 }
 0x3eb   : > { %7306 = vmatprep.subr.msk.bf16.mxu1 %vm6857_vm0, %v7991_v40 }
 0x3ec   : > { %v1996_v16 = vpop.permute.xlu1 %1995  ;;  %v1992_v17 = vpop.permute.xlu0 %1991 }
 0x3ed   : > { %vm2997_vm1 = vcmp.eq.s32.totalorder %v1996_v16, %v8429_v34  ;;  %vm2996_vm2 = vcmp.eq.s32.totalorder %v1992_v17, %v8429_v34  ;;  %v4495_v16 = vunpack.i.h.s16 %v4480_v13  ;;  %v9743_v17 = vrot.slane %v9546_v63, %v8905_v35 }
 0x3ee   : > { %vm6841_vm3 = vmpackc.low %vm2997_vm1, %vm2996_vm2  ;;  %2196 = vbcast.lane.b32.xlu1 %v9550_v41, 296  ;;  %2192 = vbcast.lane.b32.xlu0 %v9550_v41, 288 }
 0x3ef   : > { %7307 = vmatpush3.bf16.msk.msra.mxu1 %vm6841_vm3, %v7991_v40 }
 0x3f0   : > { %v1937_v55 = vpop.permute.xlu1 %1936  ;;  %v1933_v20 = vpop.permute.xlu0 %1932 }
 0x3f1   : > { %vm2983_vm4 = vcmp.eq.s32.totalorder %v1937_v55, %v8429_v34  ;;  %vm2982_vm5 = vcmp.eq.s32.totalorder %v1933_v20, %v8429_v34 }
 0x3f2   : > { %vm6827_vm6 = vmpackc.low %vm2983_vm4, %vm2982_vm5  ;;  %2129 = vbcast.lane.b32.xlu1 %v9566_v57, 296  ;;  %2125 = vbcast.lane.b32.xlu0 %v9566_v57, 288 }
 0x3f3   : > { %7286 = vmatprep.subr.msk.bf16.mxu0 %vm6827_vm6, %v7991_v40 }
 0x3f4   : > { %v1870_v21 = vpop.permute.xlu1 %1869  ;;  %v1866_v2 = vpop.permute.xlu0 %1865 }
 0x3f5   : > { %vm2967_vm7 = vcmp.eq.s32.totalorder %v1870_v21, %v8429_v34  ;;  %vm2966_vm8 = vcmp.eq.s32.totalorder %v1866_v2, %v8429_v34 }
 0x3f6   : > { %vm6811_vm9 = vmpackc.low %vm2967_vm7, %vm2966_vm8  ;;  %2330 = vbcast.lane.b32.xlu1 %v9575_v60, 296  ;;  %2326 = vbcast.lane.b32.xlu0 %v9575_v60, 288 }
 0x3f7   : > { %7287 = vmatpush3.bf16.msk.msra.mxu0 %vm6811_vm9, %v7991_v40 }
 0x3f8   : > { %v2071_v24 = vpop.permute.xlu1 %2070  ;;  %v2067_v25 = vpop.permute.xlu0 %2066 }
 0x3f9   : > { %vm3015_vm10 = vcmp.eq.s32.totalorder %v2071_v24, %v8429_v34  ;;  %vm3014_vm11 = vcmp.eq.s32.totalorder %v2067_v25, %v8429_v34  ;;  %v9765_v25 = vrot.slane %v9546_v63, %v8932_v30 }
 0x3fa   : > { %vm6859_vm12 = vmpackc.low %vm3015_vm10, %vm3014_vm11  ;;  %2263 = vbcast.lane.b32.xlu1 %v9584_v1, 296  ;;  %2259 = vbcast.lane.b32.xlu0 %v9584_v1, 288 }
 0x3fb   : > { %7308 = vmatprep.subr.msk.bf16.mxu1 %vm6859_vm12, %v7991_v40 }
 0x3fc   : > { %v2004_v27 = vpop.permute.xlu1 %2003  ;;  %v2000_v31 = vpop.permute.xlu0 %1999 }
 0x3fd   : > { %vm2999_vm13 = vcmp.eq.s32.totalorder %v2004_v27, %v8429_v34  ;;  %vm2998_vm14 = vcmp.eq.s32.totalorder %v2000_v31, %v8429_v34  ;;  %v9774_v31 = vrot.slane %v9562_v3, %v8932_v30 }
 0x3fe   : > { %vm6843_vm15 = vmpackc.low %vm2999_vm13, %vm2998_vm14  ;;  %2204 = vbcast.lane.b32.xlu1 %v9550_v41, 312  ;;  %2200 = vbcast.lane.b32.xlu0 %v9550_v41, 304 }
 0x3ff   : > { %7309 = vmatpush3.bf16.msk.msra.mxu1 %vm6843_vm15, %v7991_v40 }
 0x400   : > { %v1945_v36 = vpop.permute.xlu1 %1944  ;;  %v1941_v38 = vpop.permute.xlu0 %1940 }
 0x401   : > { %vm2985_vm0 = vcmp.eq.s32.totalorder %v1945_v36, %v8429_v34  ;;  %vm2984_vm1 = vcmp.eq.s32.totalorder %v1941_v38, %v8429_v34 }
 0x402   : > { %vm6829_vm2 = vmpackc.low %vm2985_vm0, %vm2984_vm1  ;;  %2137 = vbcast.lane.b32.xlu1 %v9566_v57, 312  ;;  %2133 = vbcast.lane.b32.xlu0 %v9566_v57, 304 }
 0x403   : > { %7288 = vmatprep.subr.msk.bf16.mxu0 %vm6829_vm2, %v7991_v40 }
 0x404   : > { %v1878_v39 = vpop.permute.xlu1 %1877  ;;  %v1874_v15 = vpop.permute.xlu0 %1873 }
 0x405   : > { %vm2969_vm3 = vcmp.eq.s32.totalorder %v1878_v39, %v8429_v34  ;;  %vm2968_vm4 = vcmp.eq.s32.totalorder %v1874_v15, %v8429_v34 }
 0x406   : > { %vm6813_vm5 = vmpackc.low %vm2969_vm3, %vm2968_vm4  ;;  %2338 = vbcast.lane.b32.xlu1 %v9575_v60, 312  ;;  %2334 = vbcast.lane.b32.xlu0 %v9575_v60, 304 }
 0x407   : > { %7289 = vmatpush3.bf16.msk.msra.mxu0 %vm6813_vm5, %v7991_v40 }
 0x408   : > { %v2079_v42 = vpop.permute.xlu1 %2078  ;;  %v2075_v28 = vpop.permute.xlu0 %2074 }
 0x409   : > { %vm3017_vm6 = vcmp.eq.s32.totalorder %v2079_v42, %v8429_v34  ;;  %vm3016_vm7 = vcmp.eq.s32.totalorder %v2075_v28, %v8429_v34 }
 0x40a   : > { %vm6861_vm8 = vmpackc.low %vm3017_vm6, %vm3016_vm7  ;;  %2271 = vbcast.lane.b32.xlu1 %v9584_v1, 312  ;;  %2267 = vbcast.lane.b32.xlu0 %v9584_v1, 304 }
 0x40b   : > { %7310 = vmatprep.subr.msk.bf16.mxu1 %vm6861_vm8, %v7991_v40 }
 0x40c   : > { %v2012_v43 = vpop.permute.xlu1 %2011  ;;  %v2008_v44 = vpop.permute.xlu0 %2007 }
 0x40d   : > { %vm3001_vm9 = vcmp.eq.s32.totalorder %v2012_v43, %v8429_v34  ;;  %vm3000_vm10 = vcmp.eq.s32.totalorder %v2008_v44, %v8429_v34 }
 0x40e   : > { %vm6845_vm11 = vmpackc.low %vm3001_vm9, %vm3000_vm10  ;;  %2212 = vbcast.lane.b32.xlu1 %v9550_v41, 328  ;;  %2208 = vbcast.lane.b32.xlu0 %v9550_v41, 320 }
 0x40f   : > { %7311 = vmatpush3.bf16.msk.msra.mxu1 %vm6845_vm11, %v7991_v40 }
 0x410   : > { %v1953_v45 = vpop.permute.xlu1 %1952  ;;  %v1949_v61 = vpop.permute.xlu0 %1948 }
 0x411   : > { %vm2987_vm12 = vcmp.eq.s32.totalorder %v1953_v45, %v8429_v34  ;;  %vm2986_vm13 = vcmp.eq.s32.totalorder %v1949_v61, %v8429_v34 }
 0x412   : > { %vm6831_vm14 = vmpackc.low %vm2987_vm12, %vm2986_vm13  ;;  %2145 = vbcast.lane.b32.xlu1 %v9566_v57, 328  ;;  %2141 = vbcast.lane.b32.xlu0 %v9566_v57, 320 }
 0x413   : > { %7290 = vmatprep.subr.msk.bf16.mxu0 %vm6831_vm14, %v7991_v40 }
 0x414   : > { %v1886_v54 = vpop.permute.xlu1 %1885  ;;  %v1882_v37 = vpop.permute.xlu0 %1881 }
 0x415   : > { %vm2971_vm15 = vcmp.eq.s32.totalorder %v1886_v54, %v8429_v34  ;;  %vm2970_vm0 = vcmp.eq.s32.totalorder %v1882_v37, %v8429_v34 }
 0x416   : > { %vm6815_vm1 = vmpackc.low %vm2971_vm15, %vm2970_vm0  ;;  %2346 = vbcast.lane.b32.xlu1 %v9575_v60, 328  ;;  %2342 = vbcast.lane.b32.xlu0 %v9575_v60, 320 }
 0x417   : > { %7291 = vmatpush3.bf16.msk.msra.mxu0 %vm6815_vm1, %v7991_v40 }
 0x418   : > { %v2087_v46 = vpop.permute.xlu1 %2086  ;;  %v2083_v48 = vpop.permute.xlu0 %2082 }
 0x419   : > { %vm3019_vm2 = vcmp.eq.s32.totalorder %v2087_v46, %v8429_v34  ;;  %vm3018_vm3 = vcmp.eq.s32.totalorder %v2083_v48, %v8429_v34 }
 0x41a   : > { %vm6863_vm4 = vmpackc.low %vm3019_vm2, %vm3018_vm3  ;;  %2279 = vbcast.lane.b32.xlu1 %v9584_v1, 328  ;;  %2275 = vbcast.lane.b32.xlu0 %v9584_v1, 320 }
 0x41b   : > { %7312 = vmatprep.subr.msk.bf16.mxu1 %vm6863_vm4, %v7991_v40 }
 0x41c   : > { %v2020_v49 = vpop.permute.xlu1 %2019  ;;  %v2016_v26 = vpop.permute.xlu0 %2015 }
 0x41d   : > { %vm3003_vm5 = vcmp.eq.s32.totalorder %v2020_v49, %v8429_v34  ;;  %vm3002_vm6 = vcmp.eq.s32.totalorder %v2016_v26, %v8429_v34 }
 0x41e   : > { %vm6847_vm7 = vmpackc.low %vm3003_vm5, %vm3002_vm6  ;;  %2220 = vbcast.lane.b32.xlu1 %v9550_v41, 344  ;;  %2216 = vbcast.lane.b32.xlu0 %v9550_v41, 336 }
 0x41f   : > { %7313 = vmatpush3.bf16.msk.msra.mxu1 %vm6847_vm7, %v7991_v40 }
 0x420   : > { %v1961_v62 = vpop.permute.xlu1 %1960  ;;  %v1957_v32 = vpop.permute.xlu0 %1956 }
 0x421   : > { %vm2989_vm8 = vcmp.eq.s32.totalorder %v1961_v62, %v8429_v34  ;;  %vm2988_vm9 = vcmp.eq.s32.totalorder %v1957_v32, %v8429_v34 }
 0x422   : > { %vm6833_vm10 = vmpackc.low %vm2989_vm8, %vm2988_vm9  ;;  %2153 = vbcast.lane.b32.xlu1 %v9566_v57, 344  ;;  %2149 = vbcast.lane.b32.xlu0 %v9566_v57, 336 }
 0x423   : > { %7292 = vmatprep.subr.msk.bf16.mxu0 %vm6833_vm10, %v7991_v40 }
 0x424   : > { %v1894_v5 = vpop.permute.xlu1 %1893  ;;  %v1890_v23 = vpop.permute.xlu0 %1889 }
 0x425   : > { %vm2973_vm11 = vcmp.eq.s32.totalorder %v1894_v5, %v8429_v34  ;;  %vm2972_vm12 = vcmp.eq.s32.totalorder %v1890_v23, %v8429_v34 }
 0x426   : > { %vm6817_vm13 = vmpackc.low %vm2973_vm11, %vm2972_vm12  ;;  %2354 = vbcast.lane.b32.xlu1 %v9575_v60, 344  ;;  %2350 = vbcast.lane.b32.xlu0 %v9575_v60, 336 }
 0x427   : > { %7293 = vmatpush3.bf16.msk.msra.mxu0 %vm6817_vm13, %v7991_v40 }
 0x428   : > { %v2095_v51 = vpop.permute.xlu1 %2094  ;;  %v2091_v53 = vpop.permute.xlu0 %2090 }
 0x429   : > { %vm3021_vm14 = vcmp.eq.s32.totalorder %v2095_v51, %v8429_v34  ;;  %vm3020_vm15 = vcmp.eq.s32.totalorder %v2091_v53, %v8429_v34 }
 0x42a   : > { %vm6865_vm0 = vmpackc.low %vm3021_vm14, %vm3020_vm15  ;;  %2287 = vbcast.lane.b32.xlu1 %v9584_v1, 344  ;;  %2283 = vbcast.lane.b32.xlu0 %v9584_v1, 336 }
 0x42b   : > { %7314 = vmatprep.subr.msk.bf16.mxu1 %vm6865_vm0, %v7991_v40 }
 0x42c   : > { %v2028_v6 = vpop.permute.xlu1 %2027  ;;  %v2024_v56 = vpop.permute.xlu0 %2023 }
 0x42d   : > { %vm3005_vm1 = vcmp.eq.s32.totalorder %v2028_v6, %v8429_v34  ;;  %vm3004_vm2 = vcmp.eq.s32.totalorder %v2024_v56, %v8429_v34 }
 0x42e   : > { %vm6849_vm3 = vmpackc.low %vm3005_vm1, %vm3004_vm2  ;;  %2228 = vbcast.lane.b32.xlu1 %v9550_v41, 360  ;;  %2224 = vbcast.lane.b32.xlu0 %v9550_v41, 352 }
 0x42f   : > { %7315 = vmatpush3.bf16.msk.msra.mxu1 %vm6849_vm3, %v7991_v40 }
 0x430   : > { %v1969_v58 = vpop.permute.xlu1 %1968  ;;  %v1965_v59 = vpop.permute.xlu0 %1964 }
 0x431   : > { %vm2991_vm4 = vcmp.eq.s32.totalorder %v1969_v58, %v8429_v34  ;;  %vm2990_vm5 = vcmp.eq.s32.totalorder %v1965_v59, %v8429_v34 }
 0x432   : > { %vm6835_vm6 = vmpackc.low %vm2991_vm4, %vm2990_vm5  ;;  %2161 = vbcast.lane.b32.xlu1 %v9566_v57, 360  ;;  %2157 = vbcast.lane.b32.xlu0 %v9566_v57, 352 }
 0x433   : > { %7294 = vmatprep.subr.msk.bf16.mxu0 %vm6835_vm6, %v7991_v40 }
 0x434   : > { %v1902_v47 = vpop.permute.xlu1 %1901  ;;  %v1898_v0 = vpop.permute.xlu0 %1897 }
 0x435   : > { %vm2975_vm7 = vcmp.eq.s32.totalorder %v1902_v47, %v8429_v34  ;;  %vm2974_vm8 = vcmp.eq.s32.totalorder %v1898_v0, %v8429_v34 }
 0x436   : > { %vm6819_vm9 = vmpackc.low %vm2975_vm7, %vm2974_vm8  ;;  %2362 = vbcast.lane.b32.xlu1 %v9575_v60, 360  ;;  %2358 = vbcast.lane.b32.xlu0 %v9575_v60, 352 }
 0x437   : > { %7295 = vmatpush3.bf16.msk.msra.mxu0 %vm6819_vm9, %v7991_v40 }
 0x438   : > { %v2103_v7 = vpop.permute.xlu1 %2102  ;;  %v2099_v9 = vpop.permute.xlu0 %2098 }
 0x439   : > { %vm3023_vm10 = vcmp.eq.s32.totalorder %v2103_v7, %v8429_v34  ;;  %vm3022_vm11 = vcmp.eq.s32.totalorder %v2099_v9, %v8429_v34 }
 0x43a   : > { %vm6867_vm12 = vmpackc.low %vm3023_vm10, %vm3022_vm11  ;;  %2295 = vbcast.lane.b32.xlu1 %v9584_v1, 360  ;;  %2291 = vbcast.lane.b32.xlu0 %v9584_v1, 352 }
 0x43b   : > { %7316 = vmatprep.subr.msk.bf16.mxu1 %vm6867_vm12, %v7991_v40  ;;  %5052 = vmatmul.mubr.bf16.vlgmr.msra.gmra.mrb[20].mxu0 %v5012_v33 }
 0x43c   : > { %v2036_v10 = vpop.permute.xlu1 %2035  ;;  %v2032_v29 = vpop.permute.xlu0 %2031 }
 0x43d   : > { %vm3007_vm13 = vcmp.eq.s32.totalorder %v2036_v10, %v8429_v34  ;;  %vm3006_vm14 = vcmp.eq.s32.totalorder %v2032_v29, %v8429_v34 }
 0x43e   : > { %vm6851_vm15 = vmpackc.low %vm3007_vm13, %vm3006_vm14  ;;  %2236 = vbcast.lane.b32.xlu1 %v9550_v41, 376  ;;  %2232 = vbcast.lane.b32.xlu0 %v9550_v41, 368  ;;  %v9728_v41 = vpack.i.b16 %v4480_v13, %v4480_v13 }
 0x43f   : > { %7317 = vmatpush3.bf16.msk.msra.mxu1 %vm6851_vm15, %v7991_v40 }
 0x440   : > { %v2181_v11 = vpop.permute.xlu1 %2180  ;;  %v2177_v12 = vpop.permute.xlu0 %2176  ;;  %v5118_v22 = vrot.slane %v9728_v41, %v8375_v8 }
 0x441   : > { %vm3041_vm0 = vcmp.eq.s32.totalorder %v2181_v11, %v8429_v34  ;;  %vm3040_vm1 = vcmp.eq.s32.totalorder %v2177_v12, %v8429_v34 }
 0x442   : > { %vm6886_vm2 = vmpackc.low %vm3041_vm0, %vm3040_vm1  ;;  %2169 = vbcast.lane.b32.xlu1 %v9566_v57, 376  ;;  %2165 = vbcast.lane.b32.xlu0 %v9566_v57, 368 }
 0x443   : > { %7324 = vmatprep.subr.msk.bf16.mxu0 %vm6886_vm2, %v7991_v40  ;;  %5103 = vmatmul.mubr.bf16.vlgmr.msra.gmra.mrb[20].mxu1 %v5063_v18 }
 0x444   : > { %v2114_v52 = vpop.permute.xlu1 %2113  ;;  %v2110_v14 = vpop.permute.xlu0 %2109  ;;  %5153 = vmatprep.mubr.bf16.mxu0 %v5118_v22 }
 0x445   : > { %vm3025_vm3 = vcmp.eq.s32.totalorder %v2114_v52, %v8429_v34  ;;  %vm3024_vm4 = vcmp.eq.s32.totalorder %v2110_v14, %v8429_v34  ;;  %v7076_v22 = vpop.f32.mrb[0].mxu0 }
 0x446   : > { %vm6870_vm5 = vmpackc.low %vm3025_vm3, %vm3024_vm4  ;;  %2370 = vbcast.lane.b32.xlu1 %v9575_v60, 376  ;;  %2366 = vbcast.lane.b32.xlu0 %v9575_v60, 368  ;;  %v9746_v60 = vpack.i.b16 %v4495_v16, %v4495_v16  ;;  %v7077_v16 = vpop.f32.mrb[1].mxu0 }
 0x447   : > { %7325 = vmatpush3.bf16.msk.msra.mxu0 %vm6870_vm5, %v7991_v40 }
 0x448   : > { %v2315_v19 = vpop.permute.xlu1 %2314  ;;  %v2311_v57 = vpop.permute.xlu0 %2310  ;;  %v5169_v21 = vrot.slane %v9746_v60, %v8375_v8 }
 0x449   : > { %vm3073_vm6 = vcmp.eq.s32.totalorder %v2315_v19, %v8429_v34  ;;  %vm3072_vm7 = vcmp.eq.s32.totalorder %v2311_v57, %v8429_v34 }
 0x44a   : > { %vm6918_vm8 = vmpackc.low %vm3073_vm6, %vm3072_vm7  ;;  %2303 = vbcast.lane.b32.xlu1 %v9584_v1, 376  ;;  %2299 = vbcast.lane.b32.xlu0 %v9584_v1, 368  ;;  %v9756_v1 = vrot.slane %v9562_v3, %v8905_v35 }
 0x44b   : > { %7346 = vmatprep.subr.msk.bf16.mxu1 %vm6918_vm8, %v7991_v40  ;;  %5204 = vmatprep.mubr.bf16.mxu1 %v5169_v21  ;;  %v7079_v21 = vpop.f32.mrb[2].mxu0 }
 0x44c   : > { %v2248_v55 = vpop.permute.xlu1 %2247  ;;  %v2244_v20 = vpop.permute.xlu0 %2243 }
 0x44d   : > { %vm3057_vm9 = vcmp.eq.s32.totalorder %v2248_v55, %v8429_v34  ;;  %vm3056_vm10 = vcmp.eq.s32.totalorder %v2244_v20, %v8429_v34  ;;  %v7098_v55 = vpop.f32.mrb[0].mxu1  ;;  %v7078_v20 = vadd.f32 %v7077_v16, %v7076_v22 }
 0x44e   : > { %vm6902_vm11 = vmpackc.low %vm3057_vm9, %vm3056_vm10  ;;  %2448 = vbcast.lane.b32.xlu1 %v9743_v17, 264  ;;  %2444 = vbcast.lane.b32.xlu0 %v9743_v17, 256 }
 0x44f   : > { %7347 = vmatpush3.bf16.msk.msra.mxu1 %vm6902_vm11, %v7991_v40 }
 0x450   : > { %v2189_v2 = vpop.permute.xlu1 %2188  ;;  %v2185_v24 = vpop.permute.xlu0 %2184 }
 0x451   : > { %vm3043_vm12 = vcmp.eq.s32.totalorder %v2189_v2, %v8429_v34  ;;  %vm3042_vm13 = vcmp.eq.s32.totalorder %v2185_v24, %v8429_v34  ;;  %v7099_v2 = vpop.f32.mrb[1].mxu1 }
 0x452   : > { %vm6888_vm14 = vmpackc.low %vm3043_vm12, %vm3042_vm13  ;;  %2381 = vbcast.lane.b32.xlu1 %v9756_v1, 264  ;;  %2377 = vbcast.lane.b32.xlu0 %v9756_v1, 256  ;;  %v7100_v24 = vadd.f32 %v7099_v2, %v7098_v55  ;;  %v5165_v2 = vrot.slane %v9746_v60, %v8365_v4 }
 0x453   : > { %7326 = vmatprep.subr.msk.bf16.mxu0 %vm6888_vm14, %v7991_v40 }
 0x454   : > { %v2122_v35 = vpop.permute.xlu1 %2121  ;;  %v2118_v27 = vpop.permute.xlu0 %2117 }
 0x455   : > { %vm3027_vm15 = vcmp.eq.s32.totalorder %v2122_v35, %v8429_v34  ;;  %vm3026_vm0 = vcmp.eq.s32.totalorder %v2118_v27, %v8429_v34  ;;  %v7080_v35 = vpop.f32.mrb[3].mxu0  ;;  %v7101_v27 = vpop.f32.mrb[2].mxu1 }
 0x456   : > { %vm6872_vm1 = vmpackc.low %vm3027_vm15, %vm3026_vm0  ;;  %2582 = vbcast.lane.b32.xlu1 %v9765_v25, 264  ;;  %2578 = vbcast.lane.b32.xlu0 %v9765_v25, 256 }
 0x457   : > { %7327 = vmatpush3.bf16.msk.msra.mxu0 %vm6872_vm1, %v7991_v40 }
 0x458   : > { %v2323_v63 = vpop.permute.xlu1 %2322  ;;  %v2319_v36 = vpop.permute.xlu0 %2318 }
 0x459   : > { %vm3075_vm2 = vcmp.eq.s32.totalorder %v2323_v63, %v8429_v34  ;;  %vm3074_vm3 = vcmp.eq.s32.totalorder %v2319_v36, %v8429_v34 }
 0x45a   : > { %vm6920_vm4 = vmpackc.low %vm3075_vm2, %vm3074_vm3  ;;  %2515 = vbcast.lane.b32.xlu1 %v9774_v31, 264  ;;  %2511 = vbcast.lane.b32.xlu0 %v9774_v31, 256 }
 0x45b   : > { %7348 = vmatprep.subr.msk.bf16.mxu1 %vm6920_vm4, %v7991_v40 }
 0x45c   : > { %v2256_v38 = vpop.permute.xlu1 %2255  ;;  %v2252_v39 = vpop.permute.xlu0 %2251 }
 0x45d   : > { %vm3059_vm5 = vcmp.eq.s32.totalorder %v2256_v38, %v8429_v34  ;;  %vm3058_vm6 = vcmp.eq.s32.totalorder %v2252_v39, %v8429_v34  ;;  %v5348_v38 = vrot.slane %v7100_v24, 7  ;;  %v7102_v39 = vpop.f32.mrb[3].mxu1 }
 0x45e   : > { %vm6904_vm7 = vmpackc.low %vm3059_vm5, %vm3058_vm6  ;;  %2456 = vbcast.lane.b32.xlu1 %v9743_v17, 280  ;;  %2452 = vbcast.lane.b32.xlu0 %v9743_v17, 272 }
 0x45f   : > { %7349 = vmatpush3.bf16.msk.msra.mxu1 %vm6904_vm7, %v7991_v40 }
 0x460   : > { %v2197_v30 = vpop.permute.xlu1 %2196  ;;  %v2193_v3 = vpop.permute.xlu0 %2192 }
 0x461   : > { %vm3045_vm8 = vcmp.eq.s32.totalorder %v2197_v30, %v8429_v34  ;;  %vm3044_vm9 = vcmp.eq.s32.totalorder %v2193_v3, %v8429_v34  ;;  %v7120_v30 = vpop.f32.mrb[4].mxu0 }
 0x462   : > { %vm6890_vm10 = vmpackc.low %vm3045_vm8, %vm3044_vm9  ;;  %2389 = vbcast.lane.b32.xlu1 %v9756_v1, 280  ;;  %2385 = vbcast.lane.b32.xlu0 %v9756_v1, 272  ;;  %v7121_v3 = vpop.f32.mrb[5].mxu0 }
 0x463   : > { %7328 = vmatprep.subr.msk.bf16.mxu0 %vm6890_vm10, %v7991_v40 }
 0x464   : > { %v2130_v15 = vpop.permute.xlu1 %2129  ;;  %v2126_v42 = vpop.permute.xlu0 %2125 }
 0x465   : > { %vm3029_vm11 = vcmp.eq.s32.totalorder %v2130_v15, %v8429_v34  ;;  %vm3028_vm12 = vcmp.eq.s32.totalorder %v2126_v42, %v8429_v34  ;;  %v7142_v15 = vpop.f32.mrb[4].mxu1 }
 0x466   : > { %vm6874_vm13 = vmpackc.low %vm3029_vm11, %vm3028_vm12  ;;  %2590 = vbcast.lane.b32.xlu1 %v9765_v25, 280  ;;  %2586 = vbcast.lane.b32.xlu0 %v9765_v25, 272 }
 0x467   : > { %7329 = vmatpush3.bf16.msk.msra.mxu0 %vm6874_vm13, %v7991_v40 }
 0x468   : > { %v2331_v28 = vpop.permute.xlu1 %2330  ;;  %v2327_v43 = vpop.permute.xlu0 %2326 }
 0x469   : > { %vm3077_vm14 = vcmp.eq.s32.totalorder %v2331_v28, %v8429_v34  ;;  %vm3076_vm15 = vcmp.eq.s32.totalorder %v2327_v43, %v8429_v34  ;;  %v7122_v28 = vadd.f32 %v7121_v3, %v7120_v30  ;;  %v7123_v43 = vpop.f32.mrb[6].mxu0 }
 0x46a   : > { %vm6922_vm0 = vmpackc.low %vm3077_vm14, %vm3076_vm15  ;;  %2523 = vbcast.lane.b32.xlu1 %v9774_v31, 280  ;;  %2519 = vbcast.lane.b32.xlu0 %v9774_v31, 272 }
 0x46b   : > { %7350 = vmatprep.subr.msk.bf16.mxu1 %vm6922_vm0, %v7991_v40 }
 0x46c   : > { %v2264_v44 = vpop.permute.xlu1 %2263  ;;  %v2260_v45 = vpop.permute.xlu0 %2259 }
 0x46d   : > { %vm3061_vm1 = vcmp.eq.s32.totalorder %v2264_v44, %v8429_v34  ;;  %vm3060_vm2 = vcmp.eq.s32.totalorder %v2260_v45, %v8429_v34  ;;  %v7143_v44 = vpop.f32.mrb[5].mxu1 }
 0x46e   : > { %vm6906_vm3 = vmpackc.low %vm3061_vm1, %vm3060_vm2  ;;  %2464 = vbcast.lane.b32.xlu1 %v9743_v17, 296  ;;  %2460 = vbcast.lane.b32.xlu0 %v9743_v17, 288 }
 0x46f   : > { %7351 = vmatpush3.bf16.msk.msra.mxu1 %vm6906_vm3, %v7991_v40 }
 0x470   : > { %v2205_v61 = vpop.permute.xlu1 %2204  ;;  %v2201_v54 = vpop.permute.xlu0 %2200 }
 0x471   : > { %vm3047_vm4 = vcmp.eq.s32.totalorder %v2205_v61, %v8429_v34  ;;  %vm3046_vm5 = vcmp.eq.s32.totalorder %v2201_v54, %v8429_v34  ;;  %v7144_v54 = vadd.f32 %v7143_v44, %v7142_v15 }
 0x472   : > { %vm6892_vm6 = vmpackc.low %vm3047_vm4, %vm3046_vm5  ;;  %2397 = vbcast.lane.b32.xlu1 %v9756_v1, 296  ;;  %2393 = vbcast.lane.b32.xlu0 %v9756_v1, 288 }
 0x473   : > { %7330 = vmatprep.subr.msk.bf16.mxu0 %vm6892_vm6, %v7991_v40 }
 0x474   : > { %v2138_v37 = vpop.permute.xlu1 %2137  ;;  %v2134_v46 = vpop.permute.xlu0 %2133 }
 0x475   : > { %vm3031_vm7 = vcmp.eq.s32.totalorder %v2138_v37, %v8429_v34  ;;  %vm3030_vm8 = vcmp.eq.s32.totalorder %v2134_v46, %v8429_v34  ;;  %v4481_v37 = vcombine.high %v9524_v50, %v9524_v50  ;;  %v5351_v46 = vrot.slane %v7122_v28, 6 }
 0x476   : > { %vm6876_vm9 = vmpackc.low %vm3031_vm7, %vm3030_vm8  ;;  %2598 = vbcast.lane.b32.xlu1 %v9765_v25, 296  ;;  %2594 = vbcast.lane.b32.xlu0 %v9765_v25, 288  ;;  %v5114_v50 = vrot.slane %v9728_v41, %v8365_v4 }
 0x477   : > { %7331 = vmatpush3.bf16.msk.msra.mxu0 %vm6876_vm9, %v7991_v40 }
 0x478   : > { %v2339_v48 = vpop.permute.xlu1 %2338  ;;  %v2335_v49 = vpop.permute.xlu0 %2334 }
 0x479   : > { %vm3079_vm10 = vcmp.eq.s32.totalorder %v2339_v48, %v8429_v34  ;;  %vm3078_vm11 = vcmp.eq.s32.totalorder %v2335_v49, %v8429_v34  ;;  %v7124_v48 = vpop.f32.mrb[7].mxu0  ;;  %v7145_v49 = vpop.f32.mrb[6].mxu1 }
 0x47a   : > { %vm6924_vm12 = vmpackc.low %vm3079_vm10, %vm3078_vm11  ;;  %2531 = vbcast.lane.b32.xlu1 %v9774_v31, 296  ;;  %2527 = vbcast.lane.b32.xlu0 %v9774_v31, 288 }
 0x47b   : > { %7352 = vmatprep.subr.msk.bf16.mxu1 %vm6924_vm12, %v7991_v40 }
 0x47c   : > { %v2272_v26 = vpop.permute.xlu1 %2271  ;;  %v2268_v62 = vpop.permute.xlu0 %2267 }
 0x47d   : > { %vm3063_vm13 = vcmp.eq.s32.totalorder %v2272_v26, %v8429_v34  ;;  %vm3062_vm14 = vcmp.eq.s32.totalorder %v2268_v62, %v8429_v34  ;;  %v5354_v26 = vrot.slane %v7144_v54, 5  ;;  %v7146_v62 = vpop.f32.mrb[7].mxu1 }
 0x47e   : > { %vm6908_vm15 = vmpackc.low %vm3063_vm13, %vm3062_vm14  ;;  %2472 = vbcast.lane.b32.xlu1 %v9743_v17, 312  ;;  %2468 = vbcast.lane.b32.xlu0 %v9743_v17, 304 }
 0x47f   : > { %7353 = vmatpush3.bf16.msk.msra.mxu1 %vm6908_vm15, %v7991_v40 }
 0x480   : > { %v2213_v32 = vpop.permute.xlu1 %2212  ;;  %v2209_v5 = vpop.permute.xlu0 %2208 }
 0x481   : > { %vm3049_vm0 = vcmp.eq.s32.totalorder %v2213_v32, %v8429_v34  ;;  %vm3048_vm1 = vcmp.eq.s32.totalorder %v2209_v5, %v8429_v34  ;;  %v7164_v32 = vpop.f32.mrb[8].mxu0  ;;  %v9899_v5 = vpack.i.b16 %v4481_v37, %v4481_v37 }
 0x482   : > { %vm6894_vm2 = vmpackc.low %vm3049_vm0, %vm3048_vm1  ;;  %2405 = vbcast.lane.b32.xlu1 %v9756_v1, 312  ;;  %2401 = vbcast.lane.b32.xlu0 %v9756_v1, 304 }
 0x483   : > { %7332 = vmatprep.subr.msk.bf16.mxu0 %vm6894_vm2, %v7991_v40 }
 0x484   : > { %v2146_v23 = vpop.permute.xlu1 %2145  ;;  %v2142_v51 = vpop.permute.xlu0 %2141 }
 0x485   : > { %vm3033_vm3 = vcmp.eq.s32.totalorder %v2146_v23, %v8429_v34  ;;  %vm3032_vm4 = vcmp.eq.s32.totalorder %v2142_v51, %v8429_v34  ;;  %v7165_v51 = vpop.f32.mrb[9].mxu0 }
 0x486   : > { %vm6878_vm5 = vmpackc.low %vm3033_vm3, %vm3032_vm4  ;;  %2606 = vbcast.lane.b32.xlu1 %v9765_v25, 312  ;;  %2602 = vbcast.lane.b32.xlu0 %v9765_v25, 304 }
 0x487   : > { %7333 = vmatpush3.bf16.msk.msra.mxu0 %vm6878_vm5, %v7991_v40 }
 0x488   : > { %v2347_v53 = vpop.permute.xlu1 %2346  ;;  %v2343_v6 = vpop.permute.xlu0 %2342 }
 0x489   : > { %vm3081_vm6 = vcmp.eq.s32.totalorder %v2347_v53, %v8429_v34  ;;  %vm3080_vm7 = vcmp.eq.s32.totalorder %v2343_v6, %v8429_v34  ;;  %v7186_v53 = vpop.f32.mrb[8].mxu1 }
 0x48a   : > { %vm6926_vm8 = vmpackc.low %vm3081_vm6, %vm3080_vm7  ;;  %2539 = vbcast.lane.b32.xlu1 %v9774_v31, 312  ;;  %2535 = vbcast.lane.b32.xlu0 %v9774_v31, 304 }
 0x48b   : > { %7354 = vmatprep.subr.msk.bf16.mxu1 %vm6926_vm8, %v7991_v40 }
 0x48c   : > { %v2280_v56 = vpop.permute.xlu1 %2279  ;;  %v2276_v58 = vpop.permute.xlu0 %2275 }
 0x48d   : > { %vm3065_vm9 = vcmp.eq.s32.totalorder %v2280_v56, %v8429_v34  ;;  %vm3064_vm10 = vcmp.eq.s32.totalorder %v2276_v58, %v8429_v34 }
 0x48e   : > { %vm6910_vm11 = vmpackc.low %vm3065_vm9, %vm3064_vm10  ;;  %2480 = vbcast.lane.b32.xlu1 %v9743_v17, 328  ;;  %2476 = vbcast.lane.b32.xlu0 %v9743_v17, 320 }
 0x48f   : > { %7355 = vmatpush3.bf16.msk.msra.mxu1 %vm6910_vm11, %v7991_v40 }
 0x490   : > { %v2221_v59 = vpop.permute.xlu1 %2220  ;;  %v2217_v47 = vpop.permute.xlu0 %2216 }
 0x491   : > { %vm3051_vm12 = vcmp.eq.s32.totalorder %v2221_v59, %v8429_v34  ;;  %vm3050_vm13 = vcmp.eq.s32.totalorder %v2217_v47, %v8429_v34  ;;  %v7166_v59 = vadd.f32 %v7165_v51, %v7164_v32  ;;  %v5220_v47 = vrot.slane %v9899_v5, %v8375_v8 }
 0x492   : > { %vm6896_vm14 = vmpackc.low %vm3051_vm12, %vm3050_vm13  ;;  %2413 = vbcast.lane.b32.xlu1 %v9756_v1, 328  ;;  %2409 = vbcast.lane.b32.xlu0 %v9756_v1, 320 }
 0x493   : > { %7334 = vmatprep.subr.msk.bf16.mxu0 %vm6896_vm14, %v7991_v40  ;;  %v5357_v41 = vrot.slane %v7166_v59, 4 }
 0x494   : > { %v2154_v0 = vpop.permute.xlu1 %2153  ;;  %v2150_v33 = vpop.permute.xlu0 %2149 }
 0x495   : > { %vm3035_vm15 = vcmp.eq.s32.totalorder %v2154_v0, %v8429_v34  ;;  %vm3034_vm0 = vcmp.eq.s32.totalorder %v2150_v33, %v8429_v34  ;;  %v7167_v0 = vpop.f32.mrb[10].mxu0  ;;  %v7187_v33 = vpop.f32.mrb[9].mxu1 }
 0x496   : > { %vm6880_vm1 = vmpackc.low %vm3035_vm15, %vm3034_vm0  ;;  %2614 = vbcast.lane.b32.xlu1 %v9765_v25, 328  ;;  %2610 = vbcast.lane.b32.xlu0 %v9765_v25, 320 }
 0x497   : > { %7335 = vmatpush3.bf16.msk.msra.mxu0 %vm6880_vm1, %v7991_v40 }
 0x498   : > { %v2355_v7 = vpop.permute.xlu1 %2354  ;;  %v2351_v9 = vpop.permute.xlu0 %2350 }
 0x499   : > { %vm3083_vm2 = vcmp.eq.s32.totalorder %v2355_v7, %v8429_v34  ;;  %vm3082_vm3 = vcmp.eq.s32.totalorder %v2351_v9, %v8429_v34  ;;  %v7188_v7 = vadd.f32 %v7187_v33, %v7186_v53  ;;  %v7168_v9 = vpop.f32.mrb[11].mxu0 }
 0x49a   : > { %vm6928_vm4 = vmpackc.low %vm3083_vm2, %vm3082_vm3  ;;  %2547 = vbcast.lane.b32.xlu1 %v9774_v31, 328  ;;  %2543 = vbcast.lane.b32.xlu0 %v9774_v31, 320 }
 0x49b   : > { %7356 = vmatprep.subr.msk.bf16.mxu1 %vm6928_vm4, %v7991_v40  ;;  %vm5349_vm4 = vcmask 1041409  }
 0x49c   : > { %v2288_v10 = vpop.permute.xlu1 %2287  ;;  %v2284_v29 = vpop.permute.xlu0 %2283  ;;  %v5350_v42 = vsel %vm5349_vm4, %v5348_v38, %v7078_v20 }
 0x49d   : > { %vm3067_vm5 = vcmp.eq.s32.totalorder %v2288_v10, %v8429_v34  ;;  %vm3066_vm6 = vcmp.eq.s32.totalorder %v2284_v29, %v8429_v34  ;;  %v7189_v10 = vpop.f32.mrb[10].mxu1 }
 0x49e   : > { %vm6912_vm7 = vmpackc.low %vm3067_vm5, %vm3066_vm6  ;;  %2488 = vbcast.lane.b32.xlu1 %v9743_v17, 344  ;;  %2484 = vbcast.lane.b32.xlu0 %v9743_v17, 336  ;;  %v7190_v29 = vpop.f32.mrb[11].mxu1 }
 0x49f   : > { %7357 = vmatpush3.bf16.msk.msra.mxu1 %vm6912_vm7, %v7991_v40 }
 0x4a0   : > { %v2229_v18 = vpop.permute.xlu1 %2228  ;;  %v2225_v11 = vpop.permute.xlu0 %2224 }
 0x4a1   : > { %vm3053_vm8 = vcmp.eq.s32.totalorder %v2229_v18, %v8429_v34  ;;  %vm3052_vm9 = vcmp.eq.s32.totalorder %v2225_v11, %v8429_v34  ;;  %v7208_v18 = vpop.f32.mrb[12].mxu0 }
 0x4a2   : > { %vm6898_vm10 = vmpackc.low %vm3053_vm8, %vm3052_vm9  ;;  %2421 = vbcast.lane.b32.xlu1 %v9756_v1, 344  ;;  %2417 = vbcast.lane.b32.xlu0 %v9756_v1, 336  ;;  %vm5352_vm8 = vcmask 1042434   ;;  %v7209_v22 = vpop.f32.mrb[13].mxu0 }
 0x4a3   : > { %7336 = vmatprep.subr.msk.bf16.mxu0 %vm6898_vm10, %v7991_v40  ;;  %v5353_v23 = vsel %vm5352_vm8, %v5351_v46, %v5350_v42  ;;  %v7210_v16 = vadd.f32 %v7209_v22, %v7208_v18  ;;  %v7211_v21 = vpop.f32.mrb[14].mxu0 }
 0x4a4   : > { %v2162_v12 = vpop.permute.xlu1 %2161  ;;  %v2158_v13 = vpop.permute.xlu0 %2157 }
 0x4a5   : > { %vm3037_vm11 = vcmp.eq.s32.totalorder %v2162_v12, %v8429_v34  ;;  %vm3036_vm12 = vcmp.eq.s32.totalorder %v2158_v13, %v8429_v34  ;;  %v7212_v35 = vpop.f32.mrb[15].mxu0  ;;  %v5363_v38 = vrot.slane %v7210_v16, 2 }
 0x4a6   : > { %vm6882_vm13 = vmpackc.low %vm3037_vm11, %vm3036_vm12  ;;  %2622 = vbcast.lane.b32.xlu1 %v9765_v25, 344  ;;  %2618 = vbcast.lane.b32.xlu0 %v9765_v25, 336  ;;  %vm5355_vm11 = vcmask 1043459   ;;  %v7252_v3 = vpop.f32.mrb[16].mxu0 }
 0x4a7   : > { %7337 = vmatpush3.bf16.msk.msra.mxu0 %vm6882_vm13, %v7991_v40  ;;  %v5356_v58 = vsel %vm5355_vm11, %v5354_v26, %v5353_v23  ;;  %v7253_v42 = vpop.f32.mrb[17].mxu0 }
 0x4a8   : > { %v2363_v52 = vpop.permute.xlu1 %2362  ;;  %v2359_v14 = vpop.permute.xlu0 %2358 }
 0x4a9   : > { %vm3085_vm14 = vcmp.eq.s32.totalorder %v2363_v52, %v8429_v34  ;;  %vm3084_vm15 = vcmp.eq.s32.totalorder %v2359_v14, %v8429_v34  ;;  %v5360_v52 = vrot.slane %v7188_v7, 3  ;;  %v4497_v14 = vunpack.i.h.s16 %v4481_v37 }
 0x4aa   : > { %vm6930_vm0 = vmpackc.low %vm3085_vm14, %vm3084_vm15  ;;  %2555 = vbcast.lane.b32.xlu1 %v9774_v31, 344  ;;  %2551 = vbcast.lane.b32.xlu0 %v9774_v31, 336  ;;  %vm5358_vm15 = vcmask 1044484  }
 0x4ab   : > { %7358 = vmatprep.subr.msk.bf16.mxu1 %vm6930_vm0, %v7991_v40  ;;  %v5359_v13 = vsel %vm5358_vm15, %v5357_v41, %v5356_v58  ;;  %v9919_v20 = vpack.i.b16 %v4497_v14, %v4497_v14 }
 0x4ac   : > { %v2296_v19 = vpop.permute.xlu1 %2295  ;;  %v2292_v57 = vpop.permute.xlu0 %2291 }
 0x4ad   : > { %vm3069_vm1 = vcmp.eq.s32.totalorder %v2296_v19, %v8429_v34  ;;  %vm3068_vm2 = vcmp.eq.s32.totalorder %v2292_v57, %v8429_v34  ;;  %v7230_v19 = vpop.f32.mrb[12].mxu1 }
 0x4ae   : > { %vm6914_vm3 = vmpackc.low %vm3069_vm1, %vm3068_vm2  ;;  %2496 = vbcast.lane.b32.xlu1 %v9743_v17, 360  ;;  %2492 = vbcast.lane.b32.xlu0 %v9743_v17, 352  ;;  %vm5361_vm1 = vcmask 1045509   ;;  %v7231_v55 = vpop.f32.mrb[13].mxu1 }
 0x4af   : > { %7359 = vmatpush3.bf16.msk.msra.mxu1 %vm6914_vm3, %v7991_v40  ;;  %v5362_v57 = vsel %vm5361_vm1, %v5360_v52, %v5359_v13  ;;  %v7232_v24 = vadd.f32 %v7231_v55, %v7230_v19  ;;  %v7233_v27 = vpop.f32.mrb[14].mxu1 }
 0x4b0   : > { %v2237_v63 = vpop.permute.xlu1 %2236  ;;  %v2233_v36 = vpop.permute.xlu0 %2232 }
 0x4b1   : > { %vm3055_vm5 = vcmp.eq.s32.totalorder %v2237_v63, %v8429_v34  ;;  %vm3054_vm6 = vcmp.eq.s32.totalorder %v2233_v36, %v8429_v34  ;;  %v5366_v39 = vrot.slane %v7232_v24, 1  ;;  %v7234_v30 = vpop.f32.mrb[15].mxu1 }
 0x4b2   : > { %vm6900_vm7 = vmpackc.low %vm3055_vm5, %vm3054_vm6  ;;  %2429 = vbcast.lane.b32.xlu1 %v9756_v1, 360  ;;  %2425 = vbcast.lane.b32.xlu0 %v9756_v1, 352  ;;  %vm5364_vm6 = vcmask 1046534   ;;  %v7274_v15 = vpop.f32.mrb[16].mxu1 }
 0x4b3   : > { %7338 = vmatprep.subr.msk.bf16.mxu0 %vm6900_vm7, %v7991_v40  ;;  %vm5367_vm7 = vcmask 1047559   ;;  %v5365_v60 = vsel %vm5364_vm6, %v5363_v38, %v5362_v57  ;;  %v7275_v28 = vpop.f32.mrb[17].mxu1 }
 0x4b4   : > { %v2170_v45 = vpop.permute.xlu1 %2169  ;;  %v2166_v61 = vpop.permute.xlu0 %2165 }
 0x4b5   : > { %vm3039_vm9 = vcmp.eq.s32.totalorder %v2170_v45, %v8429_v34  ;;  %vm3038_vm10 = vcmp.eq.s32.totalorder %v2166_v61, %v8429_v34  ;;  %v7254_v45 = vadd.f32 %v7253_v42, %v7252_v3  ;;  %v7276_v61 = vadd.f32 %v7275_v28, %v7274_v15  ;;  %v7277_v54 = vpop.f32.mrb[18].mxu1 }
 0x4b6   : > { %vm6884_vm12 = vmpackc.low %vm3039_vm9, %vm3038_vm10  ;;  %2630 = vbcast.lane.b32.xlu1 %v9765_v25, 360  ;;  %2626 = vbcast.lane.b32.xlu0 %v9765_v25, 352  ;;  %v7278_v48 = vpop.f32.mrb[19].mxu1 }
 0x4b7   : > { %7339 = vmatpush3.bf16.msk.msra.mxu0 %vm6884_vm12, %v7991_v40  ;;  %v5369_v37 = vrot.slane %v7276_v61, 7 }
 0x4b8   : > { %v2371_v6 = vpop.permute.xlu1 %2370  ;;  %v2367_v56 = vpop.permute.xlu0 %2366 }
 0x4b9   : > { %vm3087_vm13 = vcmp.eq.s32.totalorder %v2371_v6, %v8429_v34  ;;  %vm3086_vm14 = vcmp.eq.s32.totalorder %v2367_v56, %v8429_v34  ;;  %v9941_v62 = vsel %vm5349_vm4, %v5369_v37, %v7254_v45 }
 0x4ba   : > { %vm6932_vm0 = vmpackc.low %vm3087_vm13, %vm3086_vm14  ;;  %2563 = vbcast.lane.b32.xlu1 %v9774_v31, 360  ;;  %2559 = vbcast.lane.b32.xlu0 %v9774_v31, 352 }
 0x4bb   : > { %7360 = vmatprep.subr.msk.bf16.mxu1 %vm6932_vm0, %v7991_v40  ;;  %5154 = vmatmul.mubr.bf16.vlgmr.msra.gmra.mrb[24].mxu0 %v5114_v50 }
 0x4bc   : > { %v2304_v11 = vpop.permute.xlu1 %2303  ;;  %v2300_v12 = vpop.permute.xlu0 %2299  ;;  %5255 = vmatprep.mubr.bf16.mxu0 %v5220_v47 }
 0x4bd   : > { %vm3071_vm2 = vcmp.eq.s32.totalorder %v2304_v11, %v8429_v34  ;;  %vm3070_vm3 = vcmp.eq.s32.totalorder %v2300_v12, %v8429_v34 }
 0x4be   : > { %vm6916_vm5 = vmpackc.low %vm3071_vm2, %vm3070_vm3  ;;  %2504 = vbcast.lane.b32.xlu1 %v9743_v17, 376  ;;  %2500 = vbcast.lane.b32.xlu0 %v9743_v17, 368  ;;  %v5271_v17 = vrot.slane %v9919_v20, %v8375_v8  ;;  %v9933_v8 = vsel %vm5367_vm7, %v5366_v39, %v5365_v60 }
 0x4bf   : > { %7361 = vmatpush3.bf16.msk.msra.mxu1 %vm6916_vm5, %v7991_v40 }
 0x4c0   : > { %v2449_v63 = vpop.permute.xlu1 %2448  ;;  %v2445_v36 = vpop.permute.xlu0 %2444 }
 0x4c1   : > { %vm3105_vm9 = vcmp.eq.s32.totalorder %v2449_v63, %v8429_v34  ;;  %vm3104_vm10 = vcmp.eq.s32.totalorder %v2445_v36, %v8429_v34 }
 0x4c2   : > { %vm6951_vm12 = vmpackc.low %vm3105_vm9, %vm3104_vm10  ;;  %2437 = vbcast.lane.b32.xlu1 %v9756_v1, 376  ;;  %2433 = vbcast.lane.b32.xlu0 %v9756_v1, 368  ;;  %v7255_v1 = vpop.f32.mrb[18].mxu0 }
 0x4c3   : > { %7368 = vmatprep.subr.msk.bf16.mxu0 %vm6951_vm12, %v7991_v40  ;;  %5205 = vmatmul.mubr.bf16.vlgmr.msra.gmra.mrb[24].mxu1 %v5165_v2  ;;  %v7256_v46 = vpop.f32.mrb[19].mxu0 }
 0x4c4   : > { %v2382_v43 = vpop.permute.xlu1 %2381  ;;  %v2378_v44 = vpop.permute.xlu0 %2377  ;;  %5306 = vmatprep.mubr.bf16.mxu1 %v5271_v17 }
 0x4c5   : > { %vm3089_vm13 = vcmp.eq.s32.totalorder %v2382_v43, %v8429_v34  ;;  %vm3088_vm14 = vcmp.eq.s32.totalorder %v2378_v44, %v8429_v34 }
 0x4c6   : > { %vm6935_vm0 = vmpackc.low %vm3089_vm13, %vm3088_vm14  ;;  %2638 = vbcast.lane.b32.xlu1 %v9765_v25, 376  ;;  %2634 = vbcast.lane.b32.xlu0 %v9765_v25, 368 }
 0x4c7   : > { %7369 = vmatpush3.bf16.msk.msra.mxu0 %vm6935_vm0, %v7991_v40 }
 0x4c8   : > { %v2583_v49 = vpop.permute.xlu1 %2582  ;;  %v2579_v26 = vpop.permute.xlu0 %2578 }
 0x4c9   : > { %vm3137_vm2 = vcmp.eq.s32.totalorder %v2583_v49, %v8429_v34  ;;  %vm3136_vm3 = vcmp.eq.s32.totalorder %v2579_v26, %v8429_v34 }
 0x4ca   : > { %vm6983_vm5 = vmpackc.low %vm3137_vm2, %vm3136_vm3  ;;  %2571 = vbcast.lane.b32.xlu1 %v9774_v31, 376  ;;  %2567 = vbcast.lane.b32.xlu0 %v9774_v31, 368 }
 0x4cb   : > { %7390 = vmatprep.subr.msk.bf16.mxu1 %vm6983_vm5, %v7991_v40 }
 0x4cc   : > { %v2516_v25 = vpop.permute.xlu1 %2515  ;;  %v2512_v32 = vpop.permute.xlu0 %2511 }
 0x4cd   : > { %vm3121_vm9 = vcmp.eq.s32.totalorder %v2516_v25, %v8429_v34  ;;  %vm3120_vm10 = vcmp.eq.s32.totalorder %v2512_v32, %v8429_v34 }
 0x4ce   : > { %vm6967_vm12 = vmpackc.low %vm3121_vm9, %vm3120_vm10 }
 0x4cf   : > { %7391 = vmatpush3.bf16.msk.msra.mxu1 %vm6967_vm12, %v7991_v40 }
 0x4d0   : > { %v2457_v50 = vpop.permute.xlu1 %2456  ;;  %v2453_v23 = vpop.permute.xlu0 %2452 }
 0x4d1   : > { %vm3107_vm4 = vcmp.eq.s32.totalorder %v2457_v50, %v8429_v34  ;;  %vm3106_vm13 = vcmp.eq.s32.totalorder %v2453_v23, %v8429_v34 }
 0x4d2   : > { %vm6953_vm14 = vmpackc.low %vm3107_vm4, %vm3106_vm13 }
 0x4d3   : > { %7370 = vmatprep.subr.msk.bf16.mxu0 %vm6953_vm14, %v7991_v40 }
 0x4d4   : > { %v2390_v31 = vpop.permute.xlu1 %2389  ;;  %v2386_v51 = vpop.permute.xlu0 %2385 }
 0x4d5   : > { %vm3091_vm0 = vcmp.eq.s32.totalorder %v2390_v31, %v8429_v34  ;;  %vm3090_vm2 = vcmp.eq.s32.totalorder %v2386_v51, %v8429_v34 }
 0x4d6   : > { %vm6937_vm3 = vmpackc.low %vm3091_vm0, %vm3090_vm2 }
 0x4d7   : > { %7371 = vmatpush3.bf16.msk.msra.mxu0 %vm6937_vm3, %v7991_v40 }
 0x4d8   : > { %v2591_v53 = vpop.permute.xlu1 %2590  ;;  %v2587_v6 = vpop.permute.xlu0 %2586 }
 0x4d9   : > { %vm3139_vm5 = vcmp.eq.s32.totalorder %v2591_v53, %v8429_v34  ;;  %vm3138_vm9 = vcmp.eq.s32.totalorder %v2587_v6, %v8429_v34 }
 0x4da   : > { %vm6985_vm10 = vmpackc.low %vm3139_vm5, %vm3138_vm9 }
 0x4db   : > { %7392 = vmatprep.subr.msk.bf16.mxu1 %vm6985_vm10, %v7991_v40 }
 0x4dc   : > { %v2524_v56 = vpop.permute.xlu1 %2523  ;;  %v2520_v58 = vpop.permute.xlu0 %2519 }
 0x4dd   : > { %vm3123_vm12 = vcmp.eq.s32.totalorder %v2524_v56, %v8429_v34  ;;  %vm3122_vm4 = vcmp.eq.s32.totalorder %v2520_v58, %v8429_v34 }
 0x4de   : > { %vm6969_vm13 = vmpackc.low %vm3123_vm12, %vm3122_vm4 }
 0x4df   : > { %7393 = vmatpush3.bf16.msk.msra.mxu1 %vm6969_vm13, %v7991_v40 }
 0x4e0   : > { %v2465_v59 = vpop.permute.xlu1 %2464  ;;  %v2461_v47 = vpop.permute.xlu0 %2460 }
 0x4e1   : > { %vm3109_vm14 = vcmp.eq.s32.totalorder %v2465_v59, %v8429_v34  ;;  %vm3108_vm0 = vcmp.eq.s32.totalorder %v2461_v47, %v8429_v34  ;;  %v7037_v59 = vld [vmem:[%s10256_s3] sm:$0xff]   ;;  %v5216_v47 = vrot.slane %v9899_v5, %v8365_v4  ;;  %v5267_v5 = vrot.slane %v9919_v20, %v8365_v4 }
 0x4e2   : > { %vm6955_vm2 = vmpackc.low %vm3109_vm14, %vm3108_vm0 }
 0x4e3   : > { %7372 = vmatprep.subr.msk.bf16.mxu0 %vm6955_vm2, %v7991_v40 }
 0x4e4   : > { %v2398_v0 = vpop.permute.xlu1 %2397  ;;  %v2394_v33 = vpop.permute.xlu0 %2393 }
 0x4e5   : > { %vm3093_vm3 = vcmp.eq.s32.totalorder %v2398_v0, %v8429_v34  ;;  %vm3092_vm5 = vcmp.eq.s32.totalorder %v2394_v33, %v8429_v34 }
 0x4e6   : > { %vm6939_vm9 = vmpackc.low %vm3093_vm3, %vm3092_vm5 }
 0x4e7   : > { %7373 = vmatpush3.bf16.msk.msra.mxu0 %vm6939_vm9, %v7991_v40 }
 0x4e8   : > { %v2599_v41 = vpop.permute.xlu1 %2598  ;;  %v2595_v7 = vpop.permute.xlu0 %2594 }
 0x4e9   : > { %vm3141_vm10 = vcmp.eq.s32.totalorder %v2599_v41, %v8429_v34  ;;  %vm3140_vm12 = vcmp.eq.s32.totalorder %v2595_v7, %v8429_v34 }
 0x4ea   : > { %vm6987_vm4 = vmpackc.low %vm3141_vm10, %vm3140_vm12 }
 0x4eb   : > { %7394 = vmatprep.subr.msk.bf16.mxu1 %vm6987_vm4, %v7991_v40 }
 0x4ec   : > { %v2532_v9 = vpop.permute.xlu1 %2531  ;;  %v2528_v10 = vpop.permute.xlu0 %2527 }
 0x4ed   : > { %vm3125_vm13 = vcmp.eq.s32.totalorder %v2532_v9, %v8429_v34  ;;  %vm3124_vm14 = vcmp.eq.s32.totalorder %v2528_v10, %v8429_v34 }
 0x4ee   : > { %vm6971_vm0 = vmpackc.low %vm3125_vm13, %vm3124_vm14 }
 0x4ef   : > { %7395 = vmatpush3.bf16.msk.msra.mxu1 %vm6971_vm0, %v7991_v40 }
 0x4f0   : > { %v2473_v29 = vpop.permute.xlu1 %2472  ;;  %v2469_v18 = vpop.permute.xlu0 %2468 }
 0x4f1   : > { %vm3111_vm2 = vcmp.eq.s32.totalorder %v2473_v29, %v8429_v34  ;;  %vm3110_vm3 = vcmp.eq.s32.totalorder %v2469_v18, %v8429_v34 }
 0x4f2   : > { %vm6957_vm5 = vmpackc.low %vm3111_vm2, %vm3110_vm3 }
 0x4f3   : > { %7374 = vmatprep.subr.msk.bf16.mxu0 %vm6957_vm5, %v7991_v40 }
 0x4f4   : > { %v2406_v11 = vpop.permute.xlu1 %2405  ;;  %v2402_v12 = vpop.permute.xlu0 %2401 }
 0x4f5   : > { %vm3095_vm9 = vcmp.eq.s32.totalorder %v2406_v11, %v8429_v34  ;;  %vm3094_vm10 = vcmp.eq.s32.totalorder %v2402_v12, %v8429_v34 }
 0x4f6   : > { %vm6941_vm12 = vmpackc.low %vm3095_vm9, %vm3094_vm10 }
 0x4f7   : > { %7375 = vmatpush3.bf16.msk.msra.mxu0 %vm6941_vm12, %v7991_v40 }
 0x4f8   : > { %v2607_v13 = vpop.permute.xlu1 %2606  ;;  %v2603_v52 = vpop.permute.xlu0 %2602 }
 0x4f9   : > { %vm3143_vm4 = vcmp.eq.s32.totalorder %v2607_v13, %v8429_v34  ;;  %vm3142_vm13 = vcmp.eq.s32.totalorder %v2603_v52, %v8429_v34 }
 0x4fa   : > { %vm6989_vm14 = vmpackc.low %vm3143_vm4, %vm3142_vm13 }
 0x4fb   : > { %7396 = vmatprep.subr.msk.bf16.mxu1 %vm6989_vm14, %v7991_v40 }
 0x4fc   : > { %v2540_v14 = vpop.permute.xlu1 %2539  ;;  %v2536_v22 = vpop.permute.xlu0 %2535 }
 0x4fd   : > { %vm3127_vm0 = vcmp.eq.s32.totalorder %v2540_v14, %v8429_v34  ;;  %vm3126_vm2 = vcmp.eq.s32.totalorder %v2536_v22, %v8429_v34  ;;  %v7059_v14 = vld [vmem:[%s10256_s3 + $0x18] sm:$0xff]  }
 0x4fe   : > { %vm6973_vm3 = vmpackc.low %vm3127_vm0, %vm3126_vm2 }
 0x4ff   : > { %7397 = vmatpush3.bf16.msk.msra.mxu1 %vm6973_vm3, %v7991_v40 }
 0x500   : > { %v2481_v19 = vpop.permute.xlu1 %2480  ;;  %v2477_v57 = vpop.permute.xlu0 %2476 }
 0x501   : > { %vm3113_vm5 = vcmp.eq.s32.totalorder %v2481_v19, %v8429_v34  ;;  %vm3112_vm9 = vcmp.eq.s32.totalorder %v2477_v57, %v8429_v34 }
 0x502   : > { %vm6959_vm10 = vmpackc.low %vm3113_vm5, %vm3112_vm9 }
 0x503   : > { %7376 = vmatprep.subr.msk.bf16.mxu0 %vm6959_vm10, %v7991_v40 }
 0x504   : > { %v2414_v16 = vpop.permute.xlu1 %2413  ;;  %v2410_v55 = vpop.permute.xlu0 %2409 }
 0x505   : > { %vm3097_vm12 = vcmp.eq.s32.totalorder %v2414_v16, %v8429_v34  ;;  %vm3096_vm4 = vcmp.eq.s32.totalorder %v2410_v55, %v8429_v34 }
 0x506   : > { %vm6943_vm13 = vmpackc.low %vm3097_vm12, %vm3096_vm4 }
 0x507   : > { %7377 = vmatpush3.bf16.msk.msra.mxu0 %vm6943_vm13, %v7991_v40 }
 0x508   : > { %v2615_v21 = vpop.permute.xlu1 %2614  ;;  %v2611_v2 = vpop.permute.xlu0 %2610 }
 0x509   : > { %vm3145_vm14 = vcmp.eq.s32.totalorder %v2615_v21, %v8429_v34  ;;  %vm3144_vm0 = vcmp.eq.s32.totalorder %v2611_v2, %v8429_v34 }
 0x50a   : > { %vm6991_vm2 = vmpackc.low %vm3145_vm14, %vm3144_vm0 }
 0x50b   : > { %7398 = vmatprep.subr.msk.bf16.mxu1 %vm6991_vm2, %v7991_v40 }
 0x50c   : > { %v2548_v24 = vpop.permute.xlu1 %2547  ;;  %v2544_v35 = vpop.permute.xlu0 %2543 }
 0x50d   : > { %vm3129_vm3 = vcmp.eq.s32.totalorder %v2548_v24, %v8429_v34  ;;  %vm3128_vm5 = vcmp.eq.s32.totalorder %v2544_v35, %v8429_v34 }
 0x50e   : > { %vm6975_vm9 = vmpackc.low %vm3129_vm3, %vm3128_vm5  ;;  %v7296_v27 = vpop.f32.mrb[20].mxu0 }
 0x50f   : > { %7399 = vmatpush3.bf16.msk.msra.mxu1 %vm6975_vm9, %v7991_v40  ;;  %v7297_v63 = vpop.f32.mrb[21].mxu0 }
 0x510   : > { %v2489_v36 = vpop.permute.xlu1 %2488  ;;  %v2485_v38 = vpop.permute.xlu0 %2484  ;;  %v7298_v17 = vadd.f32 %v7297_v63, %v7296_v27 }
 0x511   : > { %vm3115_vm10 = vcmp.eq.s32.totalorder %v2489_v36, %v8429_v34  ;;  %vm3114_vm12 = vcmp.eq.s32.totalorder %v2485_v38, %v8429_v34  ;;  %v7299_v39 = vpop.f32.mrb[22].mxu0 }
 0x512   : > { %vm6961_vm4 = vmpackc.low %vm3115_vm10, %vm3114_vm12  ;;  %v5371_v30 = vrot.slane %v7298_v17, 6  ;;  %v7300_v60 = vpop.f32.mrb[23].mxu0 }
 0x513   : > { %7378 = vmatprep.subr.msk.bf16.mxu0 %vm6961_vm4, %v7991_v40 }
 0x514   : > { %v2422_v3 = vpop.permute.xlu1 %2421  ;;  %v2418_v15 = vpop.permute.xlu0 %2417  ;;  %v5372_v42 = vsel %vm5352_vm8, %v5371_v30, %v9941_v62 }
 0x515   : > { %vm3099_vm13 = vcmp.eq.s32.totalorder %v2422_v3, %v8429_v34  ;;  %vm3098_vm14 = vcmp.eq.s32.totalorder %v2418_v15, %v8429_v34  ;;  %v5315_v3 = vld [vmem:[#allocation2 + $0x8] sm:$0xff]  ;;  %v5314_v15 = vld [vmem:[#allocation2] sm:$0xff] }
 0x516   : > { %vm6945_vm0 = vmpackc.low %vm3099_vm13, %vm3098_vm14  ;;  %v7318_v28 = vpop.f32.mrb[20].mxu1 }
 0x517   : > { %7379 = vmatpush3.bf16.msk.msra.mxu0 %vm6945_vm0, %v7991_v40  ;;  %v7319_v43 = vpop.f32.mrb[21].mxu1 }
 0x518   : > { %v2623_v44 = vpop.permute.xlu1 %2622  ;;  %v2619_v45 = vpop.permute.xlu0 %2618  ;;  %v7320_v61 = vadd.f32 %v7319_v43, %v7318_v28 }
 0x519   : > { %vm3147_vm2 = vcmp.eq.s32.totalorder %v2623_v44, %v8429_v34  ;;  %vm3146_vm3 = vcmp.eq.s32.totalorder %v2619_v45, %v8429_v34  ;;  %v7321_v1 = vpop.f32.mrb[22].mxu1  ;;  %v5473_v45 = vld [vmem:[%s8351_s0] sm:$0xff] (!%p7001_p4) }
 0x51a   : > { %vm6993_vm5 = vmpackc.low %vm3147_vm2, %vm3146_vm3  ;;  %v5373_v54 = vrot.slane %v7320_v61, 5  ;;  %v7322_v37 = vpop.f32.mrb[23].mxu1  ;;  %v7992_v61 = vmov (!%p7001_p4), 0   ;;  %v7993_v1 = vmov (!%p7001_p4), 0.0  }
 0x51b   : > { %7400 = vmatprep.subr.msk.bf16.mxu1 %vm6993_vm5, %v7991_v40  ;;  %7669 = vset.pattern.permute.xlu0 (!%p7001_p4), %v7992_v61  ;;  %v5474_v37 = vld [vmem:[%s8351_s0 + $0x8] sm:$0xff] (!%p7001_p4) }
 0x51c   : > { %v2556_v46 = vpop.permute.xlu1 %2555  ;;  %v2552_v48 = vpop.permute.xlu0 %2551  ;;  %v10011_v49 = vsel %vm5355_vm11, %v5373_v54, %v5372_v42  ;;  %v7670_v54 = vld [vmem:[#allocation8] sm:$0xff] (!%p7001_p4)   ;;  %5477 = vperm.xlu0 (!%p7001_p4), %7669, %v5473_v45  }
 0x51d   : > { %vm3131_vm8 = vcmp.eq.s32.totalorder %v2556_v46, %v8429_v34  ;;  %vm3130_vm9 = vcmp.eq.s32.totalorder %v2552_v48, %v8429_v34  ;;  %v7671_v46 = vld [vmem:[#allocation8 + $0x8] sm:$0xff] (!%p7001_p4)   ;;  %v7672_v48 = vld [vmem:[#allocation8 + $0x10] sm:$0xff] (!%p7001_p4)  }
 0x51e   : > { %vm6977_vm10 = vmpackc.low %vm3131_vm8, %vm3130_vm9 }
 0x51f   : > { %7401 = vmatpush3.bf16.msk.msra.mxu1 %vm6977_vm10, %v7991_v40 }
 0x520   : > { %v2497_v26 = vpop.permute.xlu1 %2496  ;;  %v2493_v62 = vpop.permute.xlu0 %2492  ;;  %5482 = vperm.xlu0 (!%p7001_p4), %7669, %v5474_v37  }
 0x521   : > { %vm3117_vm12 = vcmp.eq.s32.totalorder %v2497_v26, %v8429_v34  ;;  %vm3116_vm4 = vcmp.eq.s32.totalorder %v2493_v62, %v8429_v34  ;;  %v7674_v26 = vld [vmem:[#allocation8 + $0x20] sm:$0xff] (!%p7001_p4)   ;;  %v7675_v62 = vld [vmem:[#allocation8 + $0x28] sm:$0xff] (!%p7001_p4)  }
 0x522   : > { %vm6963_vm13 = vmpackc.low %vm3117_vm12, %vm3116_vm4 }
 0x523   : > { %7380 = vmatprep.subr.msk.bf16.mxu0 %vm6963_vm13, %v7991_v40 }
 0x524   : > { %v2430_v25 = vpop.permute.xlu1 %2429  ;;  %v2426_v32 = vpop.permute.xlu0 %2425 }
 0x525   : > { %vm3101_vm11 = vcmp.eq.s32.totalorder %v2430_v25, %v8429_v34  ;;  %vm3100_vm14 = vcmp.eq.s32.totalorder %v2426_v32, %v8429_v34  ;;  %v7678_v25 = vld [vmem:[#allocation9] sm:$0xff] (!%p7001_p4)   ;;  %v7676_v32 = vld [vmem:[#allocation8 + $0x30] sm:$0xff] (!%p7001_p4)  }
 0x526   : > { %vm6947_vm0 = vmpackc.low %vm3101_vm11, %vm3100_vm14 }
 0x527   : > { %7381 = vmatpush3.bf16.msk.msra.mxu0 %vm6947_vm0, %v7991_v40 }
 0x528   : > { %v2631_v50 = vpop.permute.xlu1 %2630  ;;  %v2627_v23 = vpop.permute.xlu0 %2626 }
 0x529   : > { %vm3149_vm2 = vcmp.eq.s32.totalorder %v2631_v50, %v8429_v34  ;;  %vm3148_vm3 = vcmp.eq.s32.totalorder %v2627_v23, %v8429_v34  ;;  %v7679_v50 = vld [vmem:[#allocation9 + $0x8] sm:$0xff] (!%p7001_p4)   ;;  %v7677_v23 = vld [vmem:[#allocation8 + $0x38] sm:$0xff] (!%p7001_p4)  }
 0x52a   : > { %vm6995_vm5 = vmpackc.low %vm3149_vm2, %vm3148_vm3  ;;  %vm5383_vm2 = vcmask 523264  }
 0x52b   : > { %7402 = vmatprep.subr.msk.bf16.mxu1 %vm6995_vm5, %v7991_v40 }
 0x52c   : > { %v2564_v31 = vpop.permute.xlu1 %2563  ;;  %v2560_v51 = vpop.permute.xlu0 %2559 }
 0x52d   : > { %vm3133_vm8 = vcmp.eq.s32.totalorder %v2564_v31, %v8429_v34  ;;  %vm3132_vm9 = vcmp.eq.s32.totalorder %v2560_v51, %v8429_v34  ;;  %v7680_v31 = vld [vmem:[#allocation9 + $0x10] sm:$0xff] (!%p7001_p4)   ;;  %v7681_v51 = vld [vmem:[#allocation9 + $0x18] sm:$0xff] (!%p7001_p4)  }
 0x52e   : > { %vm6979_vm10 = vmpackc.low %vm3133_vm8, %vm3132_vm9 }
 0x52f   : > { %7403 = vmatpush3.bf16.msk.msra.mxu1 %vm6979_vm10, %v7991_v40 }
 0x530   : > { %v2505_v53 = vpop.permute.xlu1 %2504  ;;  %v2501_v6 = vpop.permute.xlu0 %2500 }
 0x531   : > { %vm3119_vm12 = vcmp.eq.s32.totalorder %v2505_v53, %v8429_v34  ;;  %vm3118_vm4 = vcmp.eq.s32.totalorder %v2501_v6, %v8429_v34 }
 0x532   : > { %vm6965_vm13 = vmpackc.low %vm3119_vm12, %vm3118_vm4 }
 0x533   : > { %7382 = vmatprep.subr.msk.bf16.mxu0 %vm6965_vm13, %v7991_v40 }
 0x534   : > { %v2438_v56 = vpop.permute.xlu1 %2437  ;;  %v2434_v58 = vpop.permute.xlu0 %2433 }
 0x535   : > { %vm3103_vm11 = vcmp.eq.s32.totalorder %v2438_v56, %v8429_v34  ;;  %vm3102_vm14 = vcmp.eq.s32.totalorder %v2434_v58, %v8429_v34 }
 0x536   : > { %vm6949_vm0 = vmpackc.low %vm3103_vm11, %vm3102_vm14 }
 0x537   : > { %7383 = vmatpush3.bf16.msk.msra.mxu0 %vm6949_vm0, %v7991_v40 }
 0x538   : > { %v2639_v0 = vpop.permute.xlu1 %2638  ;;  %v2635_v33 = vpop.permute.xlu0 %2634  ;;  %7500 = vmatprep.subr.bf16.mxu0 %v7037_v59 }
 0x539   : > { %vm3151_vm3 = vcmp.eq.s32.totalorder %v2639_v0, %v8429_v34  ;;  %vm3150_vm5 = vcmp.eq.s32.totalorder %v2635_v33, %v8429_v34 }
 0x53a   : > { %vm6997_vm8 = vmpackc.low %vm3151_vm3, %vm3150_vm5  ;;  %5256 = vmatmul.mubr.bf16.vlgmr.msra.gmra.mrb[28].mxu0 %v5216_v47 }
 0x53b   : > { %7404 = vmatprep.subr.msk.bf16.mxu1 %vm6997_vm8, %v7991_v40  ;;  %7456 = vmatprep.mubr.msk.f32.mxu0 %vm5383_vm2, %v9933_v8  ;;  %v7057_v8 = vld [vmem:[%s10256_s3 + $0x8] sm:$0xff]  }
 0x53c   : > { %v2572_v41 = vpop.permute.xlu1 %2571  ;;  %v2568_v7 = vpop.permute.xlu0 %2567  ;;  %7502 = vmatpush3.bf16.msra.mxu0 %v7037_v59 }
 0x53d   : > { %vm3135_vm9 = vcmp.eq.s32.totalorder %v2572_v41, %v8429_v34  ;;  %vm3134_vm10 = vcmp.eq.s32.totalorder %v2568_v7, %v8429_v34  ;;  %7504 = vmatprep.subr.bf16.mxu0 %v7057_v8  ;;  %v7058_v34 = vld [vmem:[%s10256_s3 + $0x10] sm:$0xff]  }
 0x53e   : > { %vm6981_vm12 = vmpackc.low %vm3135_vm9, %vm3134_vm10  ;;  %v7682_v7 = vld [vmem:[#allocation9 + $0x20] sm:$0xff] (!%p7001_p4)  }
 0x53f   : > { %7405 = vmatpush3.bf16.msk.msra.mxu1 %vm6981_vm12, %v7991_v40 }
 0x540   : > { %7506 = vmatpush3.bf16.msra.mxu0 %v7057_v8  ;;  %7479 = vmatprep.subr.bf16.mxu1 (!%p7001_p4), %v7993_v1 }
 0x541   : > { %7508 = vmatprep.subr.bf16.mxu0 %v7058_v34 }
 0x542   : > { %5307 = vmatmul.mubr.bf16.vlgmr.msra.gmra.mrb[28].mxu1 %v5267_v5  ;;  %v7683_v5 = vld [vmem:[#allocation9 + $0x28] sm:$0xff] (!%p7001_p4)  }
 0x543   : > { %7480 = vmatpush3.bf16.msra.mxu1 (!%p7001_p4), %v7678_v25 }
 0x544   : > { %7510 = vmatpush3.bf16.msra.mxu0 %v7058_v34  ;;  %7481 = vmatprep.subr.bf16.mxu1 (!%p7001_p4), %v7993_v1 }
 0x545   : > { %7512 = vmatprep.subr.bf16.mxu0 %v7059_v14 }
 0x547   : > { %7482 = vmatpush3.bf16.msra.mxu1 (!%p7001_p4), %v7679_v50 }
 0x548   : > { %7514 = vmatpush3.bf16.msra.mxu0 %v7059_v14  ;;  %7483 = vmatprep.subr.bf16.mxu1 (!%p7001_p4), %v7993_v1 }
 0x549   : > { %7459 = vmatprep.subr.bf16.mxu0 (!%p7001_p4), %v7993_v1 }
 0x54b   : > { %7484 = vmatpush3.bf16.msra.mxu1 (!%p7001_p4), %v7680_v31 }
 0x54c   : > { %7485 = vmatprep.subr.bf16.mxu1 (!%p7001_p4), %v7993_v1 }
 0x54f   : > { %7486 = vmatpush3.bf16.msra.mxu1 (!%p7001_p4), %v7681_v51 }
 0x550   : > { %7487 = vmatprep.subr.bf16.mxu1 (!%p7001_p4), %v7993_v1 }
 0x553   : > { %7488 = vmatpush3.bf16.msra.mxu1 (!%p7001_p4), %v7682_v7 }
 0x554   : > { %7489 = vmatprep.subr.bf16.mxu1 (!%p7001_p4), %v7993_v1 }
 0x557   : > { %7490 = vmatpush3.bf16.msra.mxu1 (!%p7001_p4), %v7683_v5 }
 0x558   : > { %7491 = vmatprep.subr.bf16.mxu1 (!%p7001_p4), %v7993_v1 }
 0x58e   : > { %v7340_v9 = vpop.f32.mrb[24].mxu0 }
 0x58f   : > { %v7341_v10 = vpop.f32.mrb[25].mxu0 }
 0x590   : > { %v7342_v29 = vadd.f32 %v7341_v10, %v7340_v9  ;;  %v7343_v18 = vpop.f32.mrb[26].mxu0  ;;  %v7684_v9 = vld [vmem:[#allocation9 + $0x30] sm:$0xff] (!%p7001_p4)   ;;  %v7685_v10 = vld [vmem:[#allocation9 + $0x38] sm:$0xff] (!%p7001_p4)  }
 0x591   : > { %v7344_v11 = vpop.f32.mrb[27].mxu0  ;;  %7492 = vmatpush3.bf16.msra.mxu1 (!%p7001_p4), %v7684_v9 }
 0x592   : > { %v5375_v12 = vrot.slane %v7342_v29, 4  ;;  %7493 = vmatprep.subr.bf16.mxu1 (!%p7001_p4), %v7993_v1  ;;  %v7002_v29 = vld [vmem:[%s10258_s12] ss:$0 sm:$0xff] (!%p7001_p4) }
 0x594   : > { %v5376_v4 = vsel %vm5358_vm15, %v5375_v12, %v10011_v49  ;;  %vm7994_vm15 = vmmov (!%p7001_p4), 0   ;;  %v7673_v49 = vld [vmem:[#allocation8 + $0x18] sm:$0xff] (!%p7001_p4)  }
 0x595   : > { %7495 = vmatprep.mubr.msk.bf16.mxu1 (!%p7001_p4), %vm7994_vm15, %v7993_v1  ;;  %7494 = vmatpush3.bf16.msra.mxu1 (!%p7001_p4), %v7685_v10 }
 0x596   : > { %v7362_v40 = vpop.f32.mrb[24].mxu1 }
 0x597   : > { %v7363_v20 = vpop.f32.mrb[25].mxu1 }
 0x598   : > { %v7364_v13 = vadd.f32 %v7363_v20, %v7362_v40  ;;  %v7365_v52 = vpop.f32.mrb[26].mxu1 }
 0x599   : > { %v7366_v22 = vpop.f32.mrb[27].mxu1  ;;  %v7013_v52 = vld [vmem:[%s10259_s26] ss:$0 sm:$0xff] (!%p7001_p4) }
 0x59a   : > { %v5377_v19 = vrot.slane %v7364_v13, 3 }
 0x59b   : > { %v5478_v53 = vpop.permute.xlu0 (!%p7001_p4), %5477 }
 0x59c   : > { %v5378_v57 = vsel %vm5361_vm1, %v5377_v19, %v5376_v4  ;;  %7686 = vrcp.f32 (!%p7001_p4), %v5478_v53 }
 0x59f   : > { %v5483_v6 = vpop.permute.xlu0 (!%p7001_p4), %5482 }
 0x5a0   : > { %7688 = vrcp.f32 (!%p7001_p4), %v5483_v6 }
 0x5a6   : > { %v7687_v56 = vpop.eup (!%p7001_p4), %7686 }
 0x5aa   : > { %v7689_v47 = vpop.eup (!%p7001_p4), %7688 }
 0x60d   : > { %v7384_v16 = vpop.f32.mrb[28].mxu0 }
 0x60e   : > { %v7385_v55 = vpop.f32.mrb[29].mxu0 }
 0x60f   : > { %v7386_v21 = vadd.f32 %v7385_v55, %v7384_v16  ;;  %v7387_v2 = vpop.f32.mrb[30].mxu0 }
 0x610   : > { %v7388_v24 = vpop.f32.mrb[31].mxu0 }
 0x611   : > { %v5379_v35 = vrot.slane %v7386_v21, 2 }
 0x613   : > { %v5380_v27 = vsel %vm5364_vm6, %v5379_v35, %v5378_v57 }
 0x615   : > { %v7406_v63 = vpop.f32.mrb[28].mxu1 }
 0x616   : > { %v7407_v36 = vpop.f32.mrb[29].mxu1 }
 0x617   : > { %v7408_v38 = vadd.f32 %v7407_v36, %v7406_v63  ;;  %v7409_v17 = vpop.f32.mrb[30].mxu1 }
 0x618   : > { %v7410_v39 = vpop.f32.mrb[31].mxu1 }
 0x619   : > { %v5381_v30 = vrot.slane %v7408_v38, 1 }
 0x61b   : > { %v5382_v60 = vsel %vm5367_vm7, %v5381_v30, %v5380_v27 }
 0x61c   : > { %7457 = vmatmul.mubr.msk.f32.vlgmr.msra.gmra.mrb[32].mxu0 %vm5383_vm2, %v5382_v60 }
 0x61d   : > { %7460 = vmatpush3.bf16.msra.mxu0 (!%p7001_p4), %v7670_v54  ;;  %7475 = vmatprep.mubr.msk.bf16.mxu0 (!%p7001_p4), %vm7994_vm15, %v7993_v1 }
 0x61e   : > { %7461 = vmatprep.subr.bf16.mxu0 (!%p7001_p4), %v7993_v1 }
 0x621   : > { %7462 = vmatpush3.bf16.msra.mxu0 (!%p7001_p4), %v7671_v46 }
 0x622   : > { %7463 = vmatprep.subr.bf16.mxu0 (!%p7001_p4), %v7993_v1 }
 0x625   : > { %7464 = vmatpush3.bf16.msra.mxu0 (!%p7001_p4), %v7672_v48 }
 0x626   : > { %7465 = vmatprep.subr.bf16.mxu0 (!%p7001_p4), %v7993_v1 }
 0x629   : > { %7466 = vmatpush3.bf16.msra.mxu0 (!%p7001_p4), %v7673_v49 }
 0x62a   : > { %7467 = vmatprep.subr.bf16.mxu0 (!%p7001_p4), %v7993_v1 }
 0x62d   : > { %7468 = vmatpush3.bf16.msra.mxu0 (!%p7001_p4), %v7674_v26 }
 0x62e   : > { %7469 = vmatprep.subr.bf16.mxu0 (!%p7001_p4), %v7993_v1 }
 0x631   : > { %7470 = vmatpush3.bf16.msra.mxu0 (!%p7001_p4), %v7675_v62 }
 0x632   : > { %7471 = vmatprep.subr.bf16.mxu0 (!%p7001_p4), %v7993_v1 }
 0x635   : > { %7472 = vmatpush3.bf16.msra.mxu0 (!%p7001_p4), %v7676_v32 }
 0x636   : > { %7473 = vmatprep.subr.bf16.mxu0 (!%p7001_p4), %v7993_v1 }
 0x639   : > { %7474 = vmatpush3.bf16.msra.mxu0 (!%p7001_p4), %v7677_v23 }
 0x6ed   : > { %5470 = sbr.rel (%p7001_p4) target bundleno = 2237 (0x8bd), region = 76 }
 0x6ef   : > { %v7458_v42 = vpop.f32.mrb[32].mxu0 }
 0x6f0   : > { %v5464_v28 = vadd.f32 %v7458_v42, %v5315_v3  ;;  %v5454_v43 = vpop.f32.mrb[33].mxu0 }
 0x6f1   : > { %v5463_v44 = vadd.f32 %v5454_v43, %v5314_v15 }
 0x6f2   : > { %5466 = vst [vmem:[#allocation2 + $0x8] sm:$0xff] %v5464_v28 }
 0x6f3   : > { %5465 = vst [vmem:[#allocation2] sm:$0xff] %v5463_v44 }
 0x6f9   : > { %v5472_v59 = vld [vmem:[#allocation2 + $0x8] sm:$0xff] }
 0x6fa   : > { %v5471_v58 = vld [vmem:[#allocation2] sm:$0xff]  ;;  %v5488_v33 = vmul.f32 %v7689_v47, %v5472_v59 }
 0x6fb   : > { %v5486_v0 = vmul.f32 %v7687_v56, %v5471_v58 }
 0x6fd   : > { %v5489_v41 = vpack.c.bf16 %v5488_v33, %v5486_v0 }
 0x6ff   : > { %7476 = vmatmul.mubr.bf16.vlgmr.msra.gmra.mrb[0].mxu0 %v5489_v41 }
 0x7d2   : > { %v5595_v18 = vpop.f32.mrb[0].mxu0 }
 0x7d3   : > { %v5596_v8 = vadd.f32 %v7002_v29, %v5595_v18  ;;  %v7477_v11 = vpop.f32.mrb[1].mxu0 }
 0x7d4   : > { %v5598_v12 = vpop.f32.mrb[2].mxu0 }
 0x7d5   : > { %v5599_v34 = vadd.f32 %v7002_v29, %v5598_v12  ;;  %v7478_v4 = vpop.f32.mrb[3].mxu0  ;;  %7690 = vtanh.f32 %v5596_v8 }
 0x7d7   : > { %7692 = vtanh.f32 %v5599_v34 }
 0x7df   : > { %v7691_v40 = vpop.eup %7690 }
 0x7e1   : > { %v7693_v20 = vpop.eup %7692 }
 0x7e2   : > { %v5604_v13 = vpack.c.bf16 %v7693_v20, %v7691_v40 }
 0x7e4   : > { %7056 = vst [vmem:[%s8353_s9] sm:$0xff] %v5604_v13   ;;  %7496 = vmatmul.mubr.bf16.vlgmr.msra.gmra.mrb[0].mxu1 %v5604_v13 }
 0x8b7   : > { %v5719_v14 = vpop.f32.mrb[0].mxu1 }
 0x8b8   : > { %v5720_v22 = vadd.f32 %v7013_v52, %v5719_v14  ;;  %v7497_v19 = vpop.f32.mrb[1].mxu1 }
 0x8b9   : > { %v5722_v57 = vpop.f32.mrb[2].mxu1 }
 0x8ba   : > { %5726 = vst [vmem:[%s8355_s20] sm:$0xff] %v5720_v22  ;;  %v5723_v16 = vadd.f32 %v7013_v52, %v5722_v57  ;;  %v7498_v55 = vpop.f32.mrb[3].mxu1 }
 0x8bc   : > { %5727 = vst [vmem:[%s8355_s20 + $0x8] sm:$0xff] %v5723_v16 }
 0x8bd PF: > { %s10260_s29 = sld [smem:[#allocation24_spill]]  ;;  %s7034_s0 = sshll.u32 %s7964_s16, 7 }
 0x8be   : > { %s10261_s27 = sld [smem:[#allocation35_spill]]  ;;  %s5747_s7 = sshll.u32 %s8353_s9, 4  ;;  %s10101_s7 = int_to_ptr.vmem [resolvable:$true] %s5747_s7 }
 0x8bf   : > { %s5729_s4 = scalar_lea.sflag [#allocation5], %s8343_s28  ;;  %s7810_s6 = scalar_lea.vmem %s10101_s7, 128 }
 0x8c0   : > { %p7811_p3 = scmp.ne.s32.totalorder %s10101_s7, %s7810_s6  ;;  %s7995_s22 = smov [#allocation11]  }
 0x8c1   : > { %s7814_s8 = sshll.u32 %s7995_s22, 4  ;;  %s7815_s8 = int_to_ptr.vmem [resolvable:$false] %s7814_s8 }
 0x8c2   : > { %s7816_s17 = scalar_lea.vmem %s7815_s8, 256  ;;  %p7817_p5 = scmp.lt.s32.totalorder %s10101_s7, %s7815_s8 }
 0x8c3   : > { %p10262_p2 = scmp.ne.s32.totalorder %s10260_s29, 0  ;;  %p7818_p12 = scmp.lt.s32.totalorder %s7816_s17, %s7810_s6 }
 0x8c4   : > { %s10098_s5 = scalar_lea.hbm %s10261_s27, %s7034_s0 }
 0x8c5   : > { %p7812_p6 = pnand %p7811_p3, %p10262_p2  ;;  %p7819_p13 = por %p7818_p12, %p7817_p5 }
 0x8c7   : > { %p7813_p10 = pneg %p7812_p6 }
 0x8c9   : > { %p7820_p0 = pnand %p7819_p13, %p7813_p10 }
 0x8cb   : > { %7823 = shalt.err (!%p7820_p0)
}
 0x8cc   : > { %s7824_s9 = scalar_lea.hbm %s10098_s5, 128  ;;  %s7828_s12 = scalar_lea.hbm %s10261_s27, 256 }
 0x8cd   : > { %p7825_p7 = scmp.ne.s32.totalorder %s10098_s5, %s7824_s9  ;;  %p7829_p1 = scmp.lt.u32.totalorder %s10098_s5, %s10261_s27 }
 0x8ce   : > { %p7830_p8 = scmp.lt.u32.totalorder %s7828_s12, %s7824_s9  ;;  %p7832_p3 = scmp.lt.u32.totalorder %s7824_s9, %s10098_s5 }
 0x8cf   : > { %p7826_p9 = pnand %p7825_p7, %p10262_p2 }
 0x8d0   : > { %p7831_p4 = por %p7830_p8, %p7829_p1 }
 0x8d1   : > { %p7827_p11 = pneg %p7826_p9 }
 0x8d2   : > { %p7833_p6 = por %p7832_p3, %p7831_p4 }
 0x8d4   : > { %p7834_p10 = pnand %p7833_p6, %p7827_p11 }
 0x8d6   : > { %7837 = shalt.err (!%p7834_p10)
}
 0x8d7   : > { %s7996_s26 = smov 64   ;;  %s7997_s0 = smov 4  }
 0x8d8   : > { %7527 = dma.vmem_to_hbm [thread:$0]  (%p10262_p2), %s10101_s7, 128, %s10098_s5, %s5729_s4, %s7996_s26, %s7996_s26, %s7997_s0  }
 0x8d9   : > { %s7035_s23 = sshll.u32 %s7964_s16, 8  ;;  %s5763_s15 = sshll.u32 %s8355_s20, 4  ;;  %s10134_s15 = int_to_ptr.vmem [resolvable:$true] %s5763_s15 }
 0x8da   : > { %s10263_s8 = sld [smem:[#allocation36_spill]]  ;;  %s5734_s9 = scalar_lea.sflag [#allocation13], %s8343_s28 }
 0x8db   : > { %s7838_s18 = scalar_lea.vmem %s10134_s15, 256  ;;  %s7998_s25 = smov [#allocation12]  }
 0x8dc   : > { %p7839_p5 = scmp.ne.s32.totalorder %s10134_s15, %s7838_s18  ;;  %s7842_s5 = sshll.u32 %s7998_s25, 4  ;;  %s7843_s5 = int_to_ptr.vmem [resolvable:$false] %s7842_s5 }
 0x8dd   : > { %s7844_s16 = scalar_lea.vmem %s7843_s5, 512  ;;  %p7845_p0 = scmp.lt.s32.totalorder %s10134_s15, %s7843_s5 }
 0x8de   : > { %p7840_p12 = pnand %p7839_p5, %p10262_p2  ;;  %p7846_p7 = scmp.lt.s32.totalorder %s7844_s16, %s7838_s18 }
 0x8e0   : > { %s10132_s17 = scalar_lea.hbm %s10263_s8, %s7035_s23  ;;  %p7841_p13 = pneg %p7840_p12 }
 0x8e1   : > { %p7847_p9 = por %p7846_p7, %p7845_p0 }
 0x8e3   : > { %p7848_p11 = pnand %p7847_p9, %p7841_p13 }
 0x8e5   : > { %7851 = shalt.err (!%p7848_p11)
}
 0x8e6   : > { %s7852_s20 = scalar_lea.hbm %s10132_s17, 256  ;;  %s7856_s12 = scalar_lea.hbm %s10263_s8, 512 }
 0x8e7   : > { %p7853_p1 = scmp.ne.s32.totalorder %s10132_s17, %s7852_s20  ;;  %p7857_p3 = scmp.lt.u32.totalorder %s10132_s17, %s10263_s8 }
 0x8e8   : > { %p7858_p6 = scmp.lt.u32.totalorder %s7856_s12, %s7852_s20  ;;  %p7860_p5 = scmp.lt.u32.totalorder %s7852_s20, %s10132_s17 }
 0x8e9   : > { %p7854_p8 = pnand %p7853_p1, %p10262_p2 }
 0x8ea   : > { %p7859_p10 = por %p7858_p6, %p7857_p3 }
 0x8eb   : > { %p7855_p4 = pneg %p7854_p8 }
 0x8ec   : > { %p7861_p12 = por %p7860_p5, %p7859_p10 }
 0x8ee   : > { %p7862_p13 = pnand %p7861_p12, %p7855_p4 }
 0x8f0   : > { %7865 = shalt.err (!%p7862_p13)
}
 0x8f1   : > { %s7999_s26 = smov 128   ;;  %s8000_s0 = smov 8  }
 0x8f2   : > { %7528 = dma.vmem_to_hbm [thread:$0]  (%p10262_p2), %s10134_s15, 256, %s10132_s17, %s5734_s9, %s7999_s26, %s7999_s26, %s8000_s0  }
 0x8f3 PF: > { %s10264_s23 = sld [smem:[#allocation20_spill]]  ;;  %s10265_s6 = sld [smem:[#allocation25_spill]] }
 0x8f4   : > { %p7557_p0 = scmp.ge.s32.totalorder %s7976_s19, 2 }
 0x8f9   : > { %s5778_s22 = sand.u32 1, %s10264_s23   ;;  %p10266_p7 = scmp.ne.s32.totalorder %s10265_s6, 0 }
 0x8fa   : > { %s5779_s18 = scalar_lea.sflag [#allocation5], %s5778_s22 }
 0x8fb   : > { %p7546_p9 = pnand %p7557_p0, %p10266_p7 }
 0x8fd   : > { %7927 = dma.done.wait (!%p7546_p9), %s5779_s18, 128  }
 0x8fe   : > { %7929 = vsyncadd (!%p7546_p9), %s5779_s18, 4294967168  ;;  %s5788_s25 = scalar_lea.sflag [#allocation13], %s5778_s22 }
 0x8ff   : > { %7931 = dma.done.wait (!%p7546_p9), %s5788_s25, 256  }
 0x900   : > { %7933 = vsyncadd (!%p7546_p9), %s5788_s25, 4294967040  ;;  %s33_s19 = sadd.s32 1, %s7976_s19   ;;  %s10267_s28 = sld [smem:[#allocation28_spill]] }
 0x901   : > { %p30_p11 = scmp.ge.s32.totalorder %s33_s19, 6   ;;  %s10268_s15 = sld [smem:[#allocation22_spill]] }
 0x902   : > { %s10269_s16 = sld [smem:[#allocation23_spill]]  ;;  %s10270_s17 = sld [smem:[#allocation26_spill]] }
 0x903   : > { %s10271_s18 = sld [smem:[#allocation27_spill]]  ;;  %s10272_s30 = smov %s7940_s10 }
 0x904   : > { %s10273_s10 = smov %s7944_s11  ;;  %s10274_s11 = smov %s8243_s21 }
 0x905   : > { %s10275_s12 = smov %s7952_s13  ;;  %s10276_s13 = smov %s7956_s14 }
 0x906   : > { %s10277_s14 = smov %s10267_s28  ;;  %32 = sbr.rel (!%p30_p11) target bundleno = 23 (0x17), region = 146 }
 0x90d   :  { %5793 = vsyncpa [#allocation4], 1 }
 0x90e   :  { %5795 = vsyncpa [#allocation4 + $0x1], 1 }
 0x90f   :  { %5796 = vsyncpa [#allocation7], 1 }
 0x910   :  { %5798 = vsyncpa [#allocation7 + $0x1], 1 }
 0x911   :  { %5799 = vsyncpa [#allocation10], 1 }
 0x912   :  { %5800 = vsyncpa [#allocation5], 1 }
 0x913   :  { %5802 = vsyncpa [#allocation5 + $0x1], 1 }
 0x914   :  { %5803 = vsyncpa [#allocation13], 1 }
 0x915   :  { %5805 = vsyncpa [#allocation13 + $0x1], 1 }

</bundles_post_ra>
